<compile_context>
chip_gen: v6e
topology: v6e:2x2x1
jax: 0.10.0
libtpu: 0.0.40
codegen_flags: <defaults>
</compile_context>

<pallas_src>
import functools

import jax
import jax.numpy as jnp
from jax.experimental import pallas as pl
from jax.experimental.pallas import tpu as pltpu


# ----------------------------------------------------------------------------
# Module configuration (mirrors BattleEmbeddingModule.__init__ defaults)
# ----------------------------------------------------------------------------
PLAYER_EMB = 4
PLAYER_INFO_EMB = 2
CARD_EMB = 32
STATUS_EMB = 16
MONSTER_EMB = 16
RELICS_EMB = 16
POTIONS_EMB = 8

# (in_features, out_features) per unique linear layer
LAYER_DEFS = {
    "player": (9, PLAYER_EMB),
    "status": (86, STATUS_EMB),
    "player_info": (8, PLAYER_INFO_EMB),
    "card": (370 * 2, CARD_EMB),
    "potions": (43, POTIONS_EMB),
    "relics": (180, RELICS_EMB),
    "monster": (101, MONSTER_EMB),
}

# Order of embedding_models / split_with_sizes in the forward pass
SEGMENT_LAYERS = (
    ["player", "status", "player_info"]
    + ["card"] * 13
    + ["potions", "relics"]
    + ["monster"] * 5
)
SPLIT_SIZES = [LAYER_DEFS[n][0] for n in SEGMENT_LAYERS]   # sums to 10451
OUT_SIZES = [LAYER_DEFS[n][1] for n in SEGMENT_LAYERS]     # sums to 542
K_TOTAL = sum(SPLIT_SIZES)
N_TOTAL = sum(OUT_SIZES)

N_CARD_SEG, N_MON_SEG = 13, 5
CARD_IN, CARD_OUT = LAYER_DEFS["card"]
MON_IN, MON_OUT = LAYER_DEFS["monster"]

# Contiguous regions of `battle` along the feature dim:
#   head [0:103)        player(9) + status(86) + player_info(8)
#   card [103:9723)     13 x card(740)
#   tail [9723:10451)   potions(43) + relics(180) + 5 x monster(101)
HEAD_ORDER = ("player", "status", "player_info")
HEAD_IN = sum(LAYER_DEFS[n][0] for n in HEAD_ORDER)    # 103
HEAD_OUT = sum(LAYER_DEFS[n][1] for n in HEAD_ORDER)   # 22

CARD_LO = HEAD_IN                                      # 103
TAIL_LO = CARD_LO + N_CARD_SEG * CARD_IN               # 9723

TAIL_SMALL = ("potions", "relics")
TAIL_IN = sum(LAYER_DEFS[n][0] for n in TAIL_SMALL) + N_MON_SEG * MON_IN    # 728
TAIL_OUT = sum(LAYER_DEFS[n][1] for n in TAIL_SMALL) + N_MON_SEG * MON_OUT  # 104

# Output column layout (matches torch.cat segment order exactly):
#   [0:22)    player+status+player_info
#   [22:438)  13 x card(32)
#   [438:542) potions(8)+relics(16)+5 x monster(16)
CARD_OUT_LO = HEAD_OUT                                 # 22
TAIL_OUT_LO = HEAD_OUT + N_CARD_SEG * CARD_OUT         # 438
assert TAIL_OUT_LO + TAIL_OUT == N_TOTAL


# ----------------------------------------------------------------------------
# Pallas kernel: column-split `battle` in VMEM, three weight matrices
# (resident), assemble one lane-dense (tb, 542) output block.
# ----------------------------------------------------------------------------
def _embed_kernel(x_ref, wh_ref, wc_ref, wt_ref, o_ref):
    # Head: player / status / player_info via a small block-diagonal weight.
    o_ref[:, 0:HEAD_OUT] = jnp.dot(
        x_ref[:, 0:HEAD_IN], wh_ref[...], preferred_element_type=jnp.float32)

    # 13 card segments, shared weight, statically unrolled.
    wc = wc_ref[...]
    for j in range(N_CARD_SEG):
        lo = CARD_LO + j * CARD_IN
        co = CARD_OUT_LO + j * CARD_OUT
        o_ref[:, co:co + CARD_OUT] = jnp.dot(
            x_ref[:, lo:lo + CARD_IN], wc, preferred_element_type=jnp.float32)

    # Tail: potions / relics / 5 monsters via one block-diagonal weight
    # (monster weight repeated on the diagonal) -> single 104-lane result.
    o_ref[:, TAIL_OUT_LO:N_TOTAL] = jnp.dot(
        x_ref[:, TAIL_LO:K_TOTAL], wt_ref[...],
        preferred_element_type=jnp.float32)


@functools.partial(jax.jit, static_argnames=("tb",))
def _forward_impl(battle, wh, wc, wt, tb):
    b = battle.shape[0]
    x = battle.astype(jnp.float32)

    b_pad = ((b + tb - 1) // tb) * tb
    if b_pad != b:
        # Ragged last block only (rare path): zero rows -> zero outputs, sliced off.
        x = jnp.pad(x, ((0, b_pad - b), (0, 0)))
    nb = b_pad // tb

    flops = 2 * b_pad * (HEAD_IN * HEAD_OUT
                         + N_CARD_SEG * CARD_IN * CARD_OUT
                         + TAIL_IN * TAIL_OUT)
    bytes_accessed = 4 * (b_pad * K_TOTAL + b_pad * N_TOTAL
                          + HEAD_IN * HEAD_OUT + CARD_IN * CARD_OUT
                          + TAIL_IN * TAIL_OUT)

    out = pl.pallas_call(
        _embed_kernel,
        out_shape=jax.ShapeDtypeStruct((b_pad, N_TOTAL), jnp.float32),
        grid_spec=pltpu.PrefetchScalarGridSpec(
            num_scalar_prefetch=0,
            grid=(nb,),
            in_specs=[
                # battle: tiled over batch only; full-extent last dim (legal,
                # no 128-padding of K needed).
                pl.BlockSpec((tb, K_TOTAL), lambda i: (i, 0)),
                # Weights: single resident block across the whole grid.
                pl.BlockSpec((HEAD_IN, HEAD_OUT), lambda i: (0, 0)),
                pl.BlockSpec((CARD_IN, CARD_OUT), lambda i: (0, 0)),
                pl.BlockSpec((TAIL_IN, TAIL_OUT), lambda i: (0, 0)),
            ],
            out_specs=pl.BlockSpec((tb, N_TOTAL), lambda i: (i, 0)),
        ),
        compiler_params=pltpu.CompilerParams(
            dimension_semantics=("parallel",),
            # tb=256 input block is ~10.7 MB; double-buffered ~21.4 MB plus
            # outputs/weights -> raise above the v5e/v6e default scoped limit,
            # stay under v7x's 64 MiB physical VMEM.
            vmem_limit_bytes=48 * 1024 * 1024,
        ),
        cost_estimate=pl.CostEstimate(
            flops=flops, transcendentals=0, bytes_accessed=bytes_accessed),
    )(x, wh, wc, wt)

    return out[:b] if b_pad != b else out


def _pick_tb(b):
    """Batch tile: <=256 (v7x VMEM), avoid batch padding whenever possible."""
    if b <= 256:
        return b                      # single full-extent block, no pad
    for tb in (256, 192, 128, 64, 32, 16, 8):
        if b % tb == 0:
            return tb                 # divides b -> no pad, nb >= 2 blocks
    return 256                        # ragged fallback: pad last block only


def battle_embedding_forward(battle, prepared_weights):
    """battle: (B, 10451) float32 -> (B, 542) float32."""
    assert battle.shape[-1] == K_TOTAL, battle.shape
    wh, wc, wt = prepared_weights
    # TODO(synk): for v7x at tiny batch (single grid block) add a second
    # "parallel" grid axis splitting the 13 card segments across the two TCs.
    return _forward_impl(battle, wh, wc, wt, tb=_pick_tb(battle.shape[0]))


# ----------------------------------------------------------------------------
# Parameter construction (matches torch Linear weight shapes: (out, in))
# ----------------------------------------------------------------------------
def init_params(key):
    params = {}
    names = sorted(LAYER_DEFS.keys())
    keys = jax.random.split(key, len(names))
    for name, k in zip(names, keys):
        in_f, out_f = LAYER_DEFS[name]
        bound = 1.0 / jnp.sqrt(in_f)
        params[name] = jax.random.uniform(
            k, (out_f, in_f), jnp.float32, minval=-bound, maxval=bound)
    return params


def prepare_weights(params):
    """Build the three kernel weights ONCE (hoisted out of the forward path)."""
    # Head block-diagonal: player, status, player_info.
    wh = jnp.zeros((HEAD_IN, HEAD_OUT), jnp.float32)
    r = c = 0
    for name in HEAD_ORDER:
        in_f, out_f = LAYER_DEFS[name]
        wh = wh.at[r:r + in_f, c:c + out_f].set(params[name].T)
        r += in_f
        c += out_f
    # Shared card weight.
    wc = params["card"].T.astype(jnp.float32)            # (740, 32)
    # Tail block-diagonal: potions, relics, monster x5 (shared monster weight).
    wt = jnp.zeros((TAIL_IN, TAIL_OUT), jnp.float32)
    r = c = 0
    for name in TAIL_SMALL:
        in_f, out_f = LAYER_DEFS[name]
        wt = wt.at[r:r + in_f, c:c + out_f].set(params[name].T)
        r += in_f
        c += out_f
    for _ in range(N_MON_SEG):
        wt = wt.at[r:r + MON_IN, c:c + MON_OUT].set(params["monster"].T)
        r += MON_IN
        c += MON_OUT
    return (jax.device_put(wh), jax.device_put(wc), jax.device_put(wt))


# Pure-JAX reference: replicates split + per-segment Linear + concat
def battle_embedding_ref(battle, params):
    outs = []
    k_off = 0
    for name in SEGMENT_LAYERS:
        in_f, _ = LAYER_DEFS[name]
        seg = battle[:, k_off:k_off + in_f]
        outs.append(seg @ params[name].T)
        k_off += in_f
    return jnp.concatenate(outs, axis=-1)


if __name__ == "__main__":
    key = jax.random.PRNGKey(0)
    k_param, k_input = jax.random.split(key)

    params = init_params(k_param)
    weights = prepare_weights(params)   # built once, outside the per-call path

    batch = 2
    battle = jax.random.normal(k_input, (batch, K_TOTAL), jnp.float32)

    out = battle_embedding_forward(battle, weights)
    out = jax.block_until_ready(out)

    ref = battle_embedding_ref(battle, params)
    assert out.shape == (batch, N_TOTAL), out.shape
    assert jnp.allclose(out, ref, atol=1e-3, rtol=1e-3), float(
        jnp.max(jnp.abs(out - ref)))

    print("KERNEL_OK")
</pallas_src>

<mosaic_0001>
module attributes {stable_mosaic.version = 11 : i64} {
  func.func @_embed_kernel(%arg0: i32, %arg1: memref<2x10451xf32, #tpu.memory_space<vmem>>, %arg2: memref<103x22xf32, #tpu.memory_space<vmem>>, %arg3: memref<740x32xf32, #tpu.memory_space<vmem>>, %arg4: memref<728x104xf32, #tpu.memory_space<vmem>>, %arg5: memref<2x542xf32, #tpu.memory_space<vmem>>) attributes {dimension_semantics = [#tpu.dimension_semantics<parallel>], iteration_bounds = array<i64: 1>, scalar_prefetch = 0 : i64, scratch_operands = 0 : i64, tpu.core_type = #tpu.core_type<tc>, window_params = [{transform_indices = @transform_0, window_bounds = array<i64: 2, 10451>}, {pipeline_mode = #tpu.pipeline_mode<synchronous>, transform_indices = @transform_1, window_bounds = array<i64: 103, 22>}, {pipeline_mode = #tpu.pipeline_mode<synchronous>, transform_indices = @transform_2, window_bounds = array<i64: 740, 32>}, {pipeline_mode = #tpu.pipeline_mode<synchronous>, transform_indices = @transform_3, window_bounds = array<i64: 728, 104>}, {transform_indices = @transform_4, window_bounds = array<i64: 2, 542>}]} {
    %c0 = arith.constant 0 : index
    %c0_0 = arith.constant 0 : index
    %0 = vector.load %arg1[%c0, %c0_0] : memref<2x10451xf32, #tpu.memory_space<vmem>>, vector<2x103xf32>
    %c0_1 = arith.constant 0 : index
    %c0_2 = arith.constant 0 : index
    %1 = vector.load %arg2[%c0_1, %c0_2] : memref<103x22xf32, #tpu.memory_space<vmem>>, vector<103x22xf32>
    %cst = arith.constant dense<0.000000e+00> : vector<2x22xf32>
    %2 = tpu.matmul %0, %1, %cst {dimension_numbers = #tpu.dot_dimension_numbers<[1], [0], [0], [1], [0, 0, 1, 1], [], []>} : vector<2x103xf32>, vector<103x22xf32>, vector<2x22xf32> -> vector<2x22xf32>
    %c0_3 = arith.constant 0 : index
    %c0_4 = arith.constant 0 : index
    %3 = vector.load %arg5[%c0_3, %c0_4] : memref<2x542xf32, #tpu.memory_space<vmem>>, vector<2x22xf32>
    tpu.vector_store %arg5[%c0_3, %c0_4], %2 {strides = array<i32>} : memref<2x542xf32, #tpu.memory_space<vmem>>, vector<2x22xf32>,
    %c0_5 = arith.constant 0 : index
    %c0_6 = arith.constant 0 : index
    %4 = vector.load %arg3[%c0_5, %c0_6] : memref<740x32xf32, #tpu.memory_space<vmem>>, vector<740x32xf32>
    %c0_7 = arith.constant 0 : index
    %c103 = arith.constant 103 : index
    %5 = vector.load %arg1[%c0_7, %c103] : memref<2x10451xf32, #tpu.memory_space<vmem>>, vector<2x740xf32>
    %cst_8 = arith.constant dense<0.000000e+00> : vector<2x32xf32>
    %6 = tpu.matmul %5, %4, %cst_8 {dimension_numbers = #tpu.dot_dimension_numbers<[1], [0], [0], [1], [0, 0, 1, 1], [], []>} : vector<2x740xf32>, vector<740x32xf32>, vector<2x32xf32> -> vector<2x32xf32>
    %c0_9 = arith.constant 0 : index
    %c22 = arith.constant 22 : index
    %7 = vector.load %arg5[%c0_9, %c22] : memref<2x542xf32, #tpu.memory_space<vmem>>, vector<2x32xf32>
    tpu.vector_store %arg5[%c0_9, %c22], %6 {strides = array<i32>} : memref<2x542xf32, #tpu.memory_space<vmem>>, vector<2x32xf32>,
    %c0_10 = arith.constant 0 : index
    %c843 = arith.constant 843 : index
    %8 = vector.load %arg1[%c0_10, %c843] : memref<2x10451xf32, #tpu.memory_space<vmem>>, vector<2x740xf32>
    %cst_11 = arith.constant dense<0.000000e+00> : vector<2x32xf32>
    %9 = tpu.matmul %8, %4, %cst_11 {dimension_numbers = #tpu.dot_dimension_numbers<[1], [0], [0], [1], [0, 0, 1, 1], [], []>} : vector<2x740xf32>, vector<740x32xf32>, vector<2x32xf32> -> vector<2x32xf32>
    %c0_12 = arith.constant 0 : index
    %c54 = arith.constant 54 : index
    %10 = vector.load %arg5[%c0_12, %c54] : memref<2x542xf32, #tpu.memory_space<vmem>>, vector<2x32xf32>
    tpu.vector_store %arg5[%c0_12, %c54], %9 {strides = array<i32>} : memref<2x542xf32, #tpu.memory_space<vmem>>, vector<2x32xf32>,
    %c0_13 = arith.constant 0 : index
    %c1583 = arith.constant 1583 : index
    %11 = vector.load %arg1[%c0_13, %c1583] : memref<2x10451xf32, #tpu.memory_space<vmem>>, vector<2x740xf32>
    %cst_14 = arith.constant dense<0.000000e+00> : vector<2x32xf32>
    %12 = tpu.matmul %11, %4, %cst_14 {dimension_numbers = #tpu.dot_dimension_numbers<[1], [0], [0], [1], [0, 0, 1, 1], [], []>} : vector<2x740xf32>, vector<740x32xf32>, vector<2x32xf32> -> vector<2x32xf32>
    %c0_15 = arith.constant 0 : index
    %c86 = arith.constant 86 : index
    %13 = vector.load %arg5[%c0_15, %c86] : memref<2x542xf32, #tpu.memory_space<vmem>>, vector<2x32xf32>
    tpu.vector_store %arg5[%c0_15, %c86], %12 {strides = array<i32>} : memref<2x542xf32, #tpu.memory_space<vmem>>, vector<2x32xf32>,
    %c0_16 = arith.constant 0 : index
    %c2323 = arith.constant 2323 : index
    %14 = vector.load %arg1[%c0_16, %c2323] : memref<2x10451xf32, #tpu.memory_space<vmem>>, vector<2x740xf32>
    %cst_17 = arith.constant dense<0.000000e+00> : vector<2x32xf32>
    %15 = tpu.matmul %14, %4, %cst_17 {dimension_numbers = #tpu.dot_dimension_numbers<[1], [0], [0], [1], [0, 0, 1, 1], [], []>} : vector<2x740xf32>, vector<740x32xf32>, vector<2x32xf32> -> vector<2x32xf32>
    %c0_18 = arith.constant 0 : index
    %c118 = arith.constant 118 : index
    %16 = vector.load %arg5[%c0_18, %c118] : memref<2x542xf32, #tpu.memory_space<vmem>>, vector<2x32xf32>
    tpu.vector_store %arg5[%c0_18, %c118], %15 {strides = array<i32>} : memref<2x542xf32, #tpu.memory_space<vmem>>, vector<2x32xf32>,
    %c0_19 = arith.constant 0 : index
    %c3063 = arith.constant 3063 : index
    %17 = vector.load %arg1[%c0_19, %c3063] : memref<2x10451xf32, #tpu.memory_space<vmem>>, vector<2x740xf32>
    %cst_20 = arith.constant dense<0.000000e+00> : vector<2x32xf32>
    %18 = tpu.matmul %17, %4, %cst_20 {dimension_numbers = #tpu.dot_dimension_numbers<[1], [0], [0], [1], [0, 0, 1, 1], [], []>} : vector<2x740xf32>, vector<740x32xf32>, vector<2x32xf32> -> vector<2x32xf32>
    %c0_21 = arith.constant 0 : index
    %c150 = arith.constant 150 : index
    %19 = vector.load %arg5[%c0_21, %c150] : memref<2x542xf32, #tpu.memory_space<vmem>>, vector<2x32xf32>
    tpu.vector_store %arg5[%c0_21, %c150], %18 {strides = array<i32>} : memref<2x542xf32, #tpu.memory_space<vmem>>, vector<2x32xf32>,
    %c0_22 = arith.constant 0 : index
    %c3803 = arith.constant 3803 : index
    %20 = vector.load %arg1[%c0_22, %c3803] : memref<2x10451xf32, #tpu.memory_space<vmem>>, vector<2x740xf32>
    %cst_23 = arith.constant dense<0.000000e+00> : vector<2x32xf32>
    %21 = tpu.matmul %20, %4, %cst_23 {dimension_numbers = #tpu.dot_dimension_numbers<[1], [0], [0], [1], [0, 0, 1, 1], [], []>} : vector<2x740xf32>, vector<740x32xf32>, vector<2x32xf32> -> vector<2x32xf32>
    %c0_24 = arith.constant 0 : index
    %c182 = arith.constant 182 : index
    %22 = vector.load %arg5[%c0_24, %c182] : memref<2x542xf32, #tpu.memory_space<vmem>>, vector<2x32xf32>
    tpu.vector_store %arg5[%c0_24, %c182], %21 {strides = array<i32>} : memref<2x542xf32, #tpu.memory_space<vmem>>, vector<2x32xf32>,
    %c0_25 = arith.constant 0 : index
    %c4543 = arith.constant 4543 : index
    %23 = vector.load %arg1[%c0_25, %c4543] : memref<2x10451xf32, #tpu.memory_space<vmem>>, vector<2x740xf32>
    %cst_26 = arith.constant dense<0.000000e+00> : vector<2x32xf32>
    %24 = tpu.matmul %23, %4, %cst_26 {dimension_numbers = #tpu.dot_dimension_numbers<[1], [0], [0], [1], [0, 0, 1, 1], [], []>} : vector<2x740xf32>, vector<740x32xf32>, vector<2x32xf32> -> vector<2x32xf32>
    %c0_27 = arith.constant 0 : index
    %c214 = arith.constant 214 : index
    %25 = vector.load %arg5[%c0_27, %c214] : memref<2x542xf32, #tpu.memory_space<vmem>>, vector<2x32xf32>
    tpu.vector_store %arg5[%c0_27, %c214], %24 {strides = array<i32>} : memref<2x542xf32, #tpu.memory_space<vmem>>, vector<2x32xf32>,
    %c0_28 = arith.constant 0 : index
    %c5283 = arith.constant 5283 : index
    %26 = vector.load %arg1[%c0_28, %c5283] : memref<2x10451xf32, #tpu.memory_space<vmem>>, vector<2x740xf32>
    %cst_29 = arith.constant dense<0.000000e+00> : vector<2x32xf32>
    %27 = tpu.matmul %26, %4, %cst_29 {dimension_numbers = #tpu.dot_dimension_numbers<[1], [0], [0], [1], [0, 0, 1, 1], [], []>} : vector<2x740xf32>, vector<740x32xf32>, vector<2x32xf32> -> vector<2x32xf32>
    %c0_30 = arith.constant 0 : index
    %c246 = arith.constant 246 : index
    %28 = vector.load %arg5[%c0_30, %c246] : memref<2x542xf32, #tpu.memory_space<vmem>>, vector<2x32xf32>
    tpu.vector_store %arg5[%c0_30, %c246], %27 {strides = array<i32>} : memref<2x542xf32, #tpu.memory_space<vmem>>, vector<2x32xf32>,
    %c0_31 = arith.constant 0 : index
    %c6023 = arith.constant 6023 : index
    %29 = vector.load %arg1[%c0_31, %c6023] : memref<2x10451xf32, #tpu.memory_space<vmem>>, vector<2x740xf32>
    %cst_32 = arith.constant dense<0.000000e+00> : vector<2x32xf32>
    %30 = tpu.matmul %29, %4, %cst_32 {dimension_numbers = #tpu.dot_dimension_numbers<[1], [0], [0], [1], [0, 0, 1, 1], [], []>} : vector<2x740xf32>, vector<740x32xf32>, vector<2x32xf32> -> vector<2x32xf32>
    %c0_33 = arith.constant 0 : index
    %c278 = arith.constant 278 : index
    %31 = vector.load %arg5[%c0_33, %c278] : memref<2x542xf32, #tpu.memory_space<vmem>>, vector<2x32xf32>
    tpu.vector_store %arg5[%c0_33, %c278], %30 {strides = array<i32>} : memref<2x542xf32, #tpu.memory_space<vmem>>, vector<2x32xf32>,
    %c0_34 = arith.constant 0 : index
    %c6763 = arith.constant 6763 : index
    %32 = vector.load %arg1[%c0_34, %c6763] : memref<2x10451xf32, #tpu.memory_space<vmem>>, vector<2x740xf32>
    %cst_35 = arith.constant dense<0.000000e+00> : vector<2x32xf32>
    %33 = tpu.matmul %32, %4, %cst_35 {dimension_numbers = #tpu.dot_dimension_numbers<[1], [0], [0], [1], [0, 0, 1, 1], [], []>} : vector<2x740xf32>, vector<740x32xf32>, vector<2x32xf32> -> vector<2x32xf32>
    %c0_36 = arith.constant 0 : index
    %c310 = arith.constant 310 : index
    %34 = vector.load %arg5[%c0_36, %c310] : memref<2x542xf32, #tpu.memory_space<vmem>>, vector<2x32xf32>
    tpu.vector_store %arg5[%c0_36, %c310], %33 {strides = array<i32>} : memref<2x542xf32, #tpu.memory_space<vmem>>, vector<2x32xf32>,
    %c0_37 = arith.constant 0 : index
    %c7503 = arith.constant 7503 : index
    %35 = vector.load %arg1[%c0_37, %c7503] : memref<2x10451xf32, #tpu.memory_space<vmem>>, vector<2x740xf32>
    %cst_38 = arith.constant dense<0.000000e+00> : vector<2x32xf32>
    %36 = tpu.matmul %35, %4, %cst_38 {dimension_numbers = #tpu.dot_dimension_numbers<[1], [0], [0], [1], [0, 0, 1, 1], [], []>} : vector<2x740xf32>, vector<740x32xf32>, vector<2x32xf32> -> vector<2x32xf32>
    %c0_39 = arith.constant 0 : index
    %c342 = arith.constant 342 : index
    %37 = vector.load %arg5[%c0_39, %c342] : memref<2x542xf32, #tpu.memory_space<vmem>>, vector<2x32xf32>
    tpu.vector_store %arg5[%c0_39, %c342], %36 {strides = array<i32>} : memref<2x542xf32, #tpu.memory_space<vmem>>, vector<2x32xf32>,
    %c0_40 = arith.constant 0 : index
    %c8243 = arith.constant 8243 : index
    %38 = vector.load %arg1[%c0_40, %c8243] : memref<2x10451xf32, #tpu.memory_space<vmem>>, vector<2x740xf32>
    %cst_41 = arith.constant dense<0.000000e+00> : vector<2x32xf32>
    %39 = tpu.matmul %38, %4, %cst_41 {dimension_numbers = #tpu.dot_dimension_numbers<[1], [0], [0], [1], [0, 0, 1, 1], [], []>} : vector<2x740xf32>, vector<740x32xf32>, vector<2x32xf32> -> vector<2x32xf32>
    %c0_42 = arith.constant 0 : index
    %c374 = arith.constant 374 : index
    %40 = vector.load %arg5[%c0_42, %c374] : memref<2x542xf32, #tpu.memory_space<vmem>>, vector<2x32xf32>
    tpu.vector_store %arg5[%c0_42, %c374], %39 {strides = array<i32>} : memref<2x542xf32, #tpu.memory_space<vmem>>, vector<2x32xf32>,
    %c0_43 = arith.constant 0 : index
    %c8983 = arith.constant 8983 : index
    %41 = vector.load %arg1[%c0_43, %c8983] : memref<2x10451xf32, #tpu.memory_space<vmem>>, vector<2x740xf32>
    %cst_44 = arith.constant dense<0.000000e+00> : vector<2x32xf32>
    %42 = tpu.matmul %41, %4, %cst_44 {dimension_numbers = #tpu.dot_dimension_numbers<[1], [0], [0], [1], [0, 0, 1, 1], [], []>} : vector<2x740xf32>, vector<740x32xf32>, vector<2x32xf32> -> vector<2x32xf32>
    %c0_45 = arith.constant 0 : index
    %c406 = arith.constant 406 : index
    %43 = vector.load %arg5[%c0_45, %c406] : memref<2x542xf32, #tpu.memory_space<vmem>>, vector<2x32xf32>
    tpu.vector_store %arg5[%c0_45, %c406], %42 {strides = array<i32>} : memref<2x542xf32, #tpu.memory_space<vmem>>, vector<2x32xf32>,
    %c0_46 = arith.constant 0 : index
    %c9723 = arith.constant 9723 : index
    %44 = vector.load %arg1[%c0_46, %c9723] : memref<2x10451xf32, #tpu.memory_space<vmem>>, vector<2x728xf32>
    %c0_47 = arith.constant 0 : index
    %c0_48 = arith.constant 0 : index
    %45 = vector.load %arg4[%c0_47, %c0_48] : memref<728x104xf32, #tpu.memory_space<vmem>>, vector<728x104xf32>
    %cst_49 = arith.constant dense<0.000000e+00> : vector<2x104xf32>
    %46 = tpu.matmul %44, %45, %cst_49 {dimension_numbers = #tpu.dot_dimension_numbers<[1], [0], [0], [1], [0, 0, 1, 1], [], []>} : vector<2x728xf32>, vector<728x104xf32>, vector<2x104xf32> -> vector<2x104xf32>
    %c0_50 = arith.constant 0 : index
    %c438 = arith.constant 438 : index
    %47 = vector.load %arg5[%c0_50, %c438] : memref<2x542xf32, #tpu.memory_space<vmem>>, vector<2x104xf32>
    tpu.vector_store %arg5[%c0_50, %c438], %46 {strides = array<i32>} : memref<2x542xf32, #tpu.memory_space<vmem>>, vector<2x104xf32>,
    return
  }
  func.func @transform_0(%arg0: i32) -> (i32, i32) {
    %c0_i32 = arith.constant 0 : i32
    %c0_i32_0 = arith.constant 0 : i32
    return %arg0, %c0_i32 : i32, i32
  }
  func.func @transform_1(%arg0: i32) -> (i32, i32) {
    %c0_i32 = arith.constant 0 : i32
    %c0_i32_0 = arith.constant 0 : i32
    %c0_i32_1 = arith.constant 0 : i32
    return %c0_i32, %c0_i32_0 : i32, i32
  }
  func.func @transform_2(%arg0: i32) -> (i32, i32) {
    %c0_i32 = arith.constant 0 : i32
    %c0_i32_0 = arith.constant 0 : i32
    %c0_i32_1 = arith.constant 0 : i32
    return %c0_i32, %c0_i32_0 : i32, i32
  }
  func.func @transform_3(%arg0: i32) -> (i32, i32) {
    %c0_i32 = arith.constant 0 : i32
    %c0_i32_0 = arith.constant 0 : i32
    %c0_i32_1 = arith.constant 0 : i32
    return %c0_i32, %c0_i32_0 : i32, i32
  }
  func.func @transform_4(%arg0: i32) -> (i32, i32) {
    %c0_i32 = arith.constant 0 : i32
    %c0_i32_0 = arith.constant 0 : i32
    return %arg0, %c0_i32 : i32, i32
  }
}

</mosaic_0001>

<bundles_post_ra>
// kernel: _forward_impl.1
= control target key start
LH: loop header
LB: loop body
LE: loop exit
PB: predicated region body
PF: predicated region fallthrough
CT: control target
= control target key end

     0   :  { %v213_v1 = vlaneseq  ;;  %v5861_v2 = vmov 1983009808   ;;  %v10615_v6 = vmov 0.0   ;;  %vm36_vm0 = vcmask 1046528   ;;  %s5864_s21 = smov 25   ;;  %s5865_s18 = smov 53   ;;  %s10610_s0 = inlined_call_operand.vmem [shape: f32[2,10451], index: 0, kind: input, shape index: {}]   ;;  %s10611_s1 = inlined_call_operand.vmem [shape: f32[103,22], index: 1, kind: input, shape index: {}]   ;;  %s10612_s2 = inlined_call_operand.vmem [shape: f32[740,32], index: 2, kind: input, shape index: {}]   ;;  %s10613_s3 = inlined_call_operand.vmem [shape: f32[728,104], index: 3, kind: input, shape index: {}]   ;;  %s10614_s4 = inlined_call_operand.hbm [shape: f32[2,542], index: 4, kind: output, shape index: {}]  }
   0x1   :  { %v205_v0 = vld [vmem:[%s10610_s0] sm:$0xff]  ;;  %v211_v3 = vunpack.c.l.s4 %v5861_v2  ;;  %5346 = vmatprep.subr.mxu0 %v10615_v6  ;;  %v30_v7 = vld [vmem:[%s10611_s1 + $0x58] sm:$0xff]  ;;  %v206_v10 = vld [vmem:[%s10610_s0 + $0x8] sm:$0x3f]  ;;  %vm5863_vm1 = vmmov 0   ;;  %vm32_vm2 = vcmask 842752  }
   0x2   :  { %v31_v4 = vld [vmem:[%s10611_s1 + $0x60] sm:$0x7f]  ;;  %v214_v5 = vshrl.u32 %v213_v1, 7  ;;  %v209_v8 = vcombine.high %v205_v0, %v205_v0  ;;  %v29_v11 = vld [vmem:[%s10611_s1 + $0x50] sm:$0xff]  ;;  %5372 = vmatprep.mubr.msk.f32.mxu0 %vm5863_vm1, %v10615_v6  ;;  %v28_v14 = vld [vmem:[%s10611_s1 + $0x48] sm:$0xff]  ;;  %v226_v32 = vcombine.high %v206_v10, %v206_v10  ;;  %s5866_s24 = smov 81  }
   0x3   :  { %v212_v9 = vunpack.c.0.s8 %v211_v3  ;;  %5347 = vmatpush3.msk.msra.mxu0 %vm36_vm0, %v31_v4  ;;  %v498_v13 = vld [vmem:[%s10610_s0 + $0xc] sm:$0xff]  ;;  %v5938_v15 = vld [vmem:[%s10612_s2 + $0xf8] sm:$0xff]  ;;  %v27_v21 = vld [vmem:[%s10611_s1 + $0x40] sm:$0xff] }
   0x4   :  { %5348 = vmatprep.subr.mxu0 %v10615_v6  ;;  %10990 = vst [vmem:[#allocation6_spill] sm:$0xff] %v5938_v15  ;;  %v5946_v19 = vld [vmem:[%s10612_s2 + $0x78] sm:$0xff]  ;;  %v502_v20 = vcombine.high %v498_v13, %v498_v13  ;;  %4366 = vmatprep.subr.mxu1 %v5938_v15  ;;  %v5956_v22 = vld [vmem:[%s10612_s2 + $0xf0] sm:$0xff]  ;;  %v5970_v27 = vld [vmem:[%s10612_s2 + $0xe8] sm:$0xff] }
   0x5   :  { %v5926_v12 = vsub.s32 %v212_v9, %v214_v5  ;;  %5349 = vmatpush3.msra.mxu0 %v30_v7  ;;  %v5961_v23 = vld [vmem:[%s10612_s2 + $0x70] sm:$0xff]  ;;  %4367 = vmatpush3.msra.mxu1 %v5946_v19  ;;  %v26_v30 = vld [vmem:[%s10611_s1 + $0x38] sm:$0xff]  ;;  %v5981_v31 = vld [vmem:[%s10612_s2 + $0x68] sm:$0xff] }
   0x6   :  { %5350 = vmatprep.subr.mxu0 %v10615_v6  ;;  %4368 = vmatprep.subr.mxu1 %v5956_v22  ;;  %v5988_v33 = vld [vmem:[%s10612_s2 + $0xe0] sm:$0xff]  ;;  %v25_v37 = vld [vmem:[%s10611_s1 + $0x30] sm:$0xff]  ;;  %v6012_v40 = vld [vmem:[%s10612_s2 + $0xd8] sm:$0xff] }
   0x7   :  { %10989 = vst [vmem:[#allocation5_spill] sm:$0xff] %v5926_v12  ;;  %v216_v16 = vrot.slane %v205_v0, %v5926_v12  ;;  %v223_v17 = vrot.slane %v209_v8, %v5926_v12  ;;  %v233_v18 = vrot.slane %v206_v10, %v5926_v12  ;;  %5351 = vmatpush3.msra.mxu0 %v29_v11  ;;  %v6001_v38 = vld [vmem:[%s10612_s2 + $0x60] sm:$0xff]  ;;  %v499_v39 = vld [vmem:[%s10610_s0 + $0x14] sm:$0x3f]  ;;  %v24_v42 = vld [vmem:[%s10611_s1 + $0x28] sm:$0xff] }
   0x8   :  { %5352 = vmatprep.subr.mxu0 %v10615_v6  ;;  %v5964_v26 = vrot.slane %v498_v13, %v5926_v12  ;;  %4369 = vmatpush3.msra.mxu1 %v5961_v23  ;;  %v516_v35 = vrot.slane %v502_v20, %v5926_v12  ;;  %v240_v41 = vrot.slane %v226_v32, %v5926_v12  ;;  %v6022_v43 = vld [vmem:[%s10612_s2 + $0x58] sm:$0xff]  ;;  %v6030_v47 = vld [vmem:[%s10612_s2 + $0xd0] sm:$0xff]  ;;  %v23_v49 = vld [vmem:[%s10611_s1 + $0x20] sm:$0xff] }
   0x9   :  { %v224_v24 = vcombine.high %v216_v16, %v216_v16  ;;  %v225_v25 = vcombine.high %v223_v17, %v223_v17  ;;  %5353 = vmatpush3.msra.mxu0 %v28_v14  ;;  %4370 = vmatprep.subr.mxu1 %v5970_v27  ;;  %v241_v34 = vcombine.high %v233_v18, %v233_v18  ;;  %v786_v48 = vld [vmem:[%s10610_s0 + $0x18] sm:$0xff]  ;;  %v6044_v50 = vld [vmem:[%s10612_s2 + $0x50] sm:$0xff]  ;;  %v6051_v51 = vld [vmem:[%s10612_s2 + $0xc8] sm:$0xff] }
   0xa   :  { %5354 = vmatprep.subr.mxu0 %v10615_v6  ;;  %v517_v36 = vcombine.high %v5964_v26, %v5964_v26  ;;  %4371 = vmatpush3.msra.mxu1 %v5981_v31  ;;  %v518_v45 = vcombine.high %v516_v35, %v516_v35  ;;  %v526_v46 = vrot.slane %v499_v39, %v5926_v12  ;;  %v22_v53 = vld [vmem:[%s10611_s1 + $0x18] sm:$0xff]  ;;  %v6062_v56 = vld [vmem:[%s10612_s2 + $0x48] sm:$0xff]  ;;  %v6070_v58 = vld [vmem:[%s10612_s2 + $0xc0] sm:$0xff] }
   0xb   :  { %v5397_v28 = vpack.i.bf16 %v223_v17, %v224_v24  ;;  %v5402_v29 = vpack.i.bf16 %v233_v18, %v225_v25  ;;  %5355 = vmatpush3.msra.mxu0 %v27_v21  ;;  %4372 = vmatprep.subr.mxu1 %v5988_v33  ;;  %v790_v54 = vcombine.high %v786_v48, %v786_v48  ;;  %v21_v59 = vld [vmem:[%s10611_s1 + $0x10] sm:$0xff]  ;;  %v6079_v60 = vld [vmem:[%s10612_s2 + $0x40] sm:$0xff]  ;;  %v6090_v0 = vld [vmem:[%s10612_s2 + $0xb8] sm:$0xff] }
   0xc   :  { %5356 = vmatprep.subr.mxu0 %v10615_v6  ;;  %4373 = vmatpush3.msra.mxu1 %v6001_v38  ;;  %v5407_v44 = vpack.i.bf16 %v516_v35, %v517_v36  ;;  %v5412_v52 = vpack.i.bf16 %v526_v46, %v518_v45  ;;  %v797_v55 = vrot.slane %v786_v48, %v5926_v12  ;;  %v20_v1 = vld [vmem:[%s10611_s1 + $0x8] sm:$0xff]  ;;  %v19_v3 = vld [vmem:[%s10611_s1] sm:$0xff]  ;;  %v6107_v4 = vld [vmem:[%s10612_s2 + $0x38] sm:$0xff] }
   0xd   :  { %5398 = vrot.lane.b32.xlu0 %v5397_v28, %s5864_s21  ;;  %5403 = vrot.lane.b32.xlu1 %v5402_v29, %s5864_s21  ;;  %v519_v57 = vcombine.high %v499_v39, %v499_v39  ;;  %10991 = vst [vmem:[#allocation7_spill] sm:$0xff] %v6070_v58  ;;  %v534_v61 = vcombine.high %v526_v46, %v526_v46  ;;  %10992 = vst [vmem:[#allocation8_spill] sm:$0xff] %v6090_v0  ;;  %v6112_v5 = vld [vmem:[%s10612_s2 + $0x1f8] sm:$0xff]  ;;  %v18_v7 = vld [vmem:[%s10610_s0] sm:$0x3] }
   0xe   :  { %5357 = vmatpush3.msra.mxu0 %v26_v30  ;;  %4374 = vmatprep.subr.mxu1 %v6012_v40  ;;  %v6085_v62 = vrot.slane %v790_v54, %v5926_v12  ;;  %v805_v63 = vcombine.high %v797_v55, %v797_v55  ;;  %10993 = vst [vmem:[#allocation9_spill] sm:$0xff] %v6107_v4  ;;  %v6123_v9 = vld [vmem:[%s10612_s2 + $0x178] sm:$0xff]  ;;  %v6129_v10 = vld [vmem:[%s10612_s2 + $0x1f0] sm:$0xff]  ;;  %v6147_v14 = vld [vmem:[%s10612_s2 + $0x1e8] sm:$0xff] }
   0xf   :  { %5358 = vmatprep.subr.mxu0 %v10615_v6  ;;  %4375 = vmatpush3.msra.mxu1 %v6022_v43  ;;  %v533_v2 = vrot.slane %v519_v57, %v5926_v12  ;;  %v6136_v11 = vld [vmem:[%s10612_s2 + $0x170] sm:$0xff]  ;;  %v6159_v17 = vld [vmem:[%s10612_s2 + $0x168] sm:$0xff]  ;;  %v6171_v20 = vld [vmem:[%s10612_s2 + $0x1e0] sm:$0xff] }
  0x10   :  { %5359 = vmatpush3.msra.mxu0 %v25_v37  ;;  %4376 = vmatprep.subr.mxu1 %v6030_v47  ;;  %v5417_v8 = vpack.i.bf16 %v6085_v62, %v805_v63  ;;  %v6141_v13 = vld [vmem:[%s10612_s2 + $0xb0] sm:$0xff]  ;;  %10996 = vst [vmem:[#allocation12_spill] sm:$0xff] %v6159_v17  ;;  %v6165_v18 = vld [vmem:[%s10612_s2 + $0xa8] sm:$0xff]  ;;  %10998 = vst [vmem:[#allocation14_spill] sm:$0xff] %v6171_v20 }
  0x11   :  { %242 = vrot.lane.b32.xlu0 %v216_v16, %s5864_s21  ;;  %252 = vrot.lane.b32.xlu1 %v241_v34, %s5864_s21  ;;  %10994 = vst [vmem:[#allocation10_spill] sm:$0xff] %v6141_v13  ;;  %v6153_v16 = vld [vmem:[%s10612_s2 + $0x30] sm:$0xff]  ;;  %10997 = vst [vmem:[#allocation13_spill] sm:$0xff] %v6165_v18  ;;  %v6177_v21 = vld [vmem:[%s10612_s2 + $0x28] sm:$0xff] }
  0x12   :  { %5360 = vmatprep.subr.mxu0 %v10615_v6  ;;  %4377 = vmatpush3.msra.mxu1 %v6044_v50  ;;  %10995 = vst [vmem:[#allocation11_spill] sm:$0xff] %v6153_v16  ;;  %10999 = vst [vmem:[#allocation15_spill] sm:$0xff] %v6177_v21 }
  0x13   :  { %5361 = vmatpush3.msra.mxu0 %v24_v42  ;;  %4378 = vmatprep.subr.mxu1 %v6051_v51 }
  0x14   :  { %5362 = vmatprep.subr.mxu0 %v10615_v6  ;;  %4379 = vmatpush3.msra.mxu1 %v6062_v56 }
  0x15   :  { %254 = vrot.lane.b32.xlu0 %v240_v41, %s5864_s21  ;;  %5408 = vrot.lane.b32.xlu1 %v5407_v44, %s5865_s18 }
  0x16   :  { %5363 = vmatpush3.msra.mxu0 %v23_v49  ;;  %4380 = vmatprep.subr.mxu1 %v6070_v58 }
  0x17   :  { %5364 = vmatprep.subr.mxu0 %v10615_v6  ;;  %4381 = vmatpush3.msra.mxu1 %v6079_v60 }
  0x18   :  { %5365 = vmatpush3.msra.mxu0 %v22_v53  ;;  %4382 = vmatprep.subr.mxu1 %v6090_v0 }
  0x19   :  { %535 = vrot.lane.b32.xlu0 %v5964_v26, %s5865_s18  ;;  %5413 = vrot.lane.b32.xlu1 %v5412_v52, %s5865_s18 }
  0x1a   :  { %5366 = vmatprep.subr.mxu0 %v10615_v6  ;;  %4383 = vmatpush3.msra.mxu1 %v6107_v4 }
  0x1b   :  { %5367 = vmatpush3.msra.mxu0 %v21_v59  ;;  %4384 = vmatprep.subr.mxu1 %v6141_v13 }
  0x1c   :  { %5368 = vmatprep.subr.mxu0 %v10615_v6 }
  0x1d   :  { %5369 = vmatpush3.msra.mxu0 %v20_v1  ;;  %545 = vrot.lane.b32.xlu0 %v534_v61, %s5865_s18 }
  0x1e   :  { %5370 = vmatprep.subr.mxu0 %v10615_v6  ;;  %547 = vrot.lane.b32.xlu1 %v533_v2, %s5865_s18 }
  0x1f   :  { %5371 = vmatpush3.msra.mxu0 %v19_v3 }
  0x20   :  { %4401 = vmatprep.subr.mxu0 %v6112_v5  ;;  %5373 = vmatmul.mubr.msk.f32.vlgmr.msra.gmra.mxu0 %vm32_vm2, %v18_v7 }
  0x21   :  { %4402 = vmatpush3.msra.mxu0 %v6123_v9  ;;  %5418 = vrot.lane.b32.xlu0 %v5417_v8, %s5866_s24 }
  0x22   :  { %4403 = vmatprep.subr.mxu0 %v6129_v10  ;;  %823 = vrot.lane.b32.xlu1 %v797_v55, %s5866_s24 }
  0x23   :  { %4404 = vmatpush3.msra.mxu0 %v6136_v11 }
  0x24   :  { %9 = vsyncpa [#allocation3], 0  ;;  %4405 = vmatprep.subr.mxu0 %v6147_v14  ;;  %v6183_v24 = vld [vmem:[%s10612_s2 + $0x160] sm:$0xff]  ;;  %4385 = vmatpush3.msra.mxu1 %v6153_v16  ;;  %v6198_v28 = vld [vmem:[%s10612_s2 + $0x1d8] sm:$0xff]  ;;  %v806_v49 = vcombine.high %v6085_v62, %v6085_v62  ;;  %s5867_s13 = smov 109   ;;  %s5868_s9 = smov 9  }
  0x25   :  { %11000 = vst [vmem:[#allocation16_spill] sm:$0xff] %v6183_v24  ;;  %v6189_v25 = vld [vmem:[%s10612_s2 + $0xa0] sm:$0xff]  ;;  %4406 = vmatpush3.msra.mxu0 %v6159_v17  ;;  %11002 = vst [vmem:[#allocation18_spill] sm:$0xff] %v6198_v28  ;;  %4386 = vmatprep.subr.mxu1 %v6165_v18  ;;  %v6210_v30 = vld [vmem:[%s10612_s2 + $0x158] sm:$0xff]  ;;  %vm256_vm3 = vcmask 203776   ;;  %vm549_vm4 = vcmask 433152  }
  0x26   :  { %11001 = vst [vmem:[#allocation17_spill] sm:$0xff] %v6189_v25  ;;  %v1074_v26 = vld [vmem:[%s10610_s0 + $0x24] sm:$0xff]  ;;  %4407 = vmatprep.subr.mxu0 %v6171_v20  ;;  %11004 = vst [vmem:[#allocation20_spill] sm:$0xff] %v6210_v30  ;;  %4387 = vmatpush3.msra.mxu1 %v6177_v21  ;;  %v6216_v32 = vld [vmem:[%s10612_s2 + $0x98] sm:$0xff]  ;;  %vm271_vm5 = vcmask 1043456   ;;  %vm268_vm6 = vcmask 818176  }
  0x27   :  { %v6204_v29 = vld [vmem:[%s10612_s2 + $0x20] sm:$0xff]  ;;  %11005 = vst [vmem:[#allocation21_spill] sm:$0xff] %v6216_v32  ;;  %4408 = vmatpush3.msra.mxu0 %v6183_v24  ;;  %v6222_v34 = vld [vmem:[%s10612_s2 + $0x1d0] sm:$0xff]  ;;  %4388 = vmatprep.subr.mxu1 %v6189_v25  ;;  %v6228_v35 = vld [vmem:[%s10612_s2 + $0x18] sm:$0xff]  ;;  %v1078_v37 = vcombine.high %v1074_v26, %v1074_v26  ;;  %v1085_v39 = vrot.slane %v1074_v26, %v5926_v12  ;;  %vm110_vm7 = vcmask 173056   ;;  %vm837_vm8 = vcmask 662528  }
  0x28   :  { %11003 = vst [vmem:[#allocation19_spill] sm:$0xff] %v6204_v29  ;;  %11006 = vst [vmem:[#allocation22_spill] sm:$0xff] %v6222_v34  ;;  %v787_v36 = vld [vmem:[%s10610_s0 + $0x20] sm:$0x3f]  ;;  %4409 = vmatprep.subr.mxu0 %v6198_v28  ;;  %v6238_v41 = vld [vmem:[%s10612_s2 + $0x150] sm:$0xff]  ;;  %4389 = vmatpush3.msra.mxu1 %v6204_v29  ;;  %s5869_s21 = smov 37  }
  0x29   :  { %11007 = vst [vmem:[#allocation23_spill] sm:$0xff] %v6228_v35  ;;  %11008 = vst [vmem:[#allocation24_spill] sm:$0xff] %v6238_v41  ;;  %v6244_v42 = vld [vmem:[%s10612_s2 + $0x90] sm:$0xff]  ;;  %4410 = vmatpush3.msra.mxu0 %v6210_v30  ;;  %v6250_v44 = vld [vmem:[%s10612_s2 + $0x1c8] sm:$0xff]  ;;  %4390 = vmatprep.subr.mxu1 %v6216_v32  ;;  %v814_v52 = vrot.slane %v787_v36, %v5926_v12  ;;  %v1092_v55 = vrot.slane %v1078_v37, %v5926_v12  ;;  %vm1115_vm9 = vcmask 891904   ;;  %s5872_s27 = smov 121  }
  0x2a   :  { %11009 = vst [vmem:[#allocation25_spill] sm:$0xff] %v6244_v42  ;;  %11010 = vst [vmem:[#allocation26_spill] sm:$0xff] %v6250_v44  ;;  %v6256_v45 = vld [vmem:[%s10612_s2 + $0x10] sm:$0xff]  ;;  %4411 = vmatprep.subr.mxu0 %v6222_v34  ;;  %v6262_v46 = vld [vmem:[%s10612_s2 + $0x148] sm:$0xff]  ;;  %4391 = vmatpush3.msra.mxu1 %v6228_v35  ;;  %v1093_v57 = vcombine.high %v1085_v39, %v1085_v39  ;;  %s5873_s12 = smov 21   ;;  %vm1407_vm10 = vcmask 72704  }
  0x2b   :  { %11011 = vst [vmem:[#allocation27_spill] sm:$0xff] %v6256_v45  ;;  %11012 = vst [vmem:[#allocation28_spill] sm:$0xff] %v6262_v46  ;;  %v6268_v48 = vld [vmem:[%s10612_s2 + $0x88] sm:$0xff]  ;;  %4412 = vmatpush3.msra.mxu0 %v6238_v41  ;;  %v6277_v53 = vld [vmem:[%s10612_s2 + $0x1c0] sm:$0xff]  ;;  %4392 = vmatprep.subr.mxu1 %v6244_v42  ;;  %v5422_v2 = vpack.i.bf16 %v814_v52, %v806_v49  ;;  %v807_v49 = vcombine.high %v787_v36, %v787_v36  ;;  %s5874_s10 = smov 49   ;;  %s5875_s23 = smov 77  }
  0x2c   :  { %11013 = vst [vmem:[#allocation29_spill] sm:$0xff] %v6268_v48  ;;  %11014 = vst [vmem:[#allocation30_spill] sm:$0xff] %v6277_v53  ;;  %v6283_v54 = vld [vmem:[%s10612_s2 + $0x8] sm:$0xff]  ;;  %4413 = vmatprep.subr.mxu0 %v6250_v44  ;;  %v6290_v59 = vld [vmem:[%s10612_s2 + $0x140] sm:$0xff]  ;;  %4393 = vmatpush3.msra.mxu1 %v6256_v45  ;;  %v5427_v7 = vpack.i.bf16 %v1092_v55, %v1093_v57  ;;  %s5876_s19 = smov 105   ;;  %s5877_s26 = smov 5  }
  0x2d   :  { %11015 = vst [vmem:[#allocation31_spill] sm:$0xff] %v6283_v54  ;;  %11016 = vst [vmem:[#allocation32_spill] sm:$0xff] %v6290_v59  ;;  %v6296_v61 = vld [vmem:[%s10612_s2 + $0x80] sm:$0xff]  ;;  %4414 = vmatpush3.msra.mxu0 %v6262_v46  ;;  %v6302_v62 = vld [vmem:[%s10612_s2 + $0x1b8] sm:$0xff]  ;;  %4394 = vmatprep.subr.mxu1 %v6268_v48  ;;  %vm1694_vm11 = vcmask 302080   ;;  %s5879_s1 = smov 54  }
  0x2e   :  { %11017 = vst [vmem:[#allocation33_spill] sm:$0xff] %v6302_v62  ;;  %v6308_v63 = vld [vmem:[%s10612_s2] sm:$0xff]  ;;  %4415 = vmatprep.subr.mxu0 %v6277_v53  ;;  %v6314_v1 = vld [vmem:[%s10612_s2 + $0x138] sm:$0xff]  ;;  %4395 = vmatpush3.msra.mxu1 %v6283_v54  ;;  %v6321_v3 = vld [vmem:[%s10612_s2 + $0x1b0] sm:$0xff]  ;;  %vm1981_vm12 = vcmask 531456   ;;  %vm496_vm13 = vcmask 435376  }
  0x2f   :  { %11018 = vst [vmem:[#allocation34_spill] sm:$0xff] %v6314_v1  ;;  %4416 = vmatpush3.msra.mxu0 %v6290_v59  ;;  %11019 = vst [vmem:[#allocation35_spill] sm:$0xff] %v6321_v3  ;;  %4396 = vmatprep.subr.mxu1 %v6296_v61  ;;  %v6328_v8 = vld [vmem:[%s10612_s2 + $0x130] sm:$0xff]  ;;  %v6335_v26 = vld [vmem:[%s10612_s2 + $0x1a8] sm:$0xff]  ;;  %vm2547_vm14 = vcmask 990208   ;;  %vm2833_vm15 = vcmask 171008  }
  0x30   :  { %4417 = vmatprep.subr.mxu0 %v6302_v62  ;;  %11020 = vst [vmem:[#allocation36_spill] sm:$0xff] %v6328_v8  ;;  %4397 = vmatpush3.msra.mxu1 %v6308_v63  ;;  %11021 = vst [vmem:[#allocation37_spill] sm:$0xff] %v6335_v26  ;;  %v6342_v37 = vld [vmem:[%s10612_s2 + $0x128] sm:$0xff]  ;;  %v6349_v57 = vld [vmem:[%s10612_s2 + $0x1a0] sm:$0xff]  ;;  %vm784_vm0 = vcmask 697776   ;;  %vm2268_vm1 = vcmask 760832  }
  0x31   :  { %4418 = vmatpush3.msra.mxu0 %v6314_v1  ;;  %415 = vmatprep.subr.mxu1 %v10615_v6  ;;  %11022 = vst [vmem:[#allocation38_spill] sm:$0xff] %v6342_v37  ;;  %11023 = vst [vmem:[#allocation39_spill] sm:$0xff] %v6349_v57  ;;  %v822_v6 = vcombine.high %v814_v52, %v814_v52  ;;  %v6362_v36 = vld [vmem:[%s10612_s2 + $0x198] sm:$0xff]  ;;  %vm3407_vm2 = vcmask 629760   ;;  %s5881_s17 = smov 118  }
  0x32   :  { %4419 = vmatprep.subr.mxu0 %v6321_v3  ;;  %5423 = vrot.lane.b32.xlu0 %v5422_v2, %s5866_s24  ;;  %v6356_v3 = vld [vmem:[%s10612_s2 + $0x120] sm:$0xff]  ;;  %11025 = vst [vmem:[#allocation41_spill] sm:$0xff] %v6362_v36  ;;  %v6368_v52 = vld [vmem:[%s10612_s2 + $0x118] sm:$0xff]  ;;  %v821_v2 = vrot.slane %v807_v49, %v5926_v12 }
  0x33   :  { %4420 = vmatpush3.msra.mxu0 %v6328_v8  ;;  %5428 = vrot.lane.b32.xlu1 %v5427_v7, %s5867_s13  ;;  %11024 = vst [vmem:[#allocation40_spill] sm:$0xff] %v6356_v3  ;;  %11026 = vst [vmem:[#allocation42_spill] sm:$0xff] %v6368_v52  ;;  %v6376_v7 = vld [vmem:[%s10612_s2 + $0x190] sm:$0xff]  ;;  %v6402_v49 = vld [vmem:[%s10612_s2 + $0x180] sm:$0xff] }
  0x34   :  { %4421 = vmatprep.subr.mxu0 %v6335_v26  ;;  %11027 = vst [vmem:[#allocation43_spill] sm:$0xff] %v6376_v7  ;;  %11031 = vst [vmem:[#allocation47_spill] sm:$0xff] %v6402_v49 }
  0x35   :  { %4422 = vmatpush3.msra.mxu0 %v6342_v37 }
  0x36   :  { %4423 = vmatprep.subr.mxu0 %v6349_v57  ;;  %1103 = vrot.lane.b32.xlu0 %v1085_v39, %s5867_s13  ;;  %v6383_v57 = vld [vmem:[%s10612_s2 + $0x110] sm:$0xff]  ;;  %v6389_v39 = vld [vmem:[%s10612_s2 + $0x188] sm:$0xff] }
  0x37   :  { %4424 = vmatpush3.msra.mxu0 %v6356_v3  ;;  %833 = vrot.lane.b32.xlu1 %v822_v6, %s5866_s24  ;;  %11028 = vst [vmem:[#allocation44_spill] sm:$0xff] %v6383_v57  ;;  %11029 = vst [vmem:[#allocation45_spill] sm:$0xff] %v6389_v39  ;;  %v6395_v6 = vld [vmem:[%s10612_s2 + $0x108] sm:$0xff] }
  0x38   :  { %4425 = vmatprep.subr.mxu0 %v6362_v36  ;;  %11030 = vst [vmem:[#allocation46_spill] sm:$0xff] %v6395_v6 }
  0x39   :  { %4426 = vmatpush3.msra.mxu0 %v6368_v52 }
  0x3a   :  { %4427 = vmatprep.subr.mxu0 %v6376_v7  ;;  %835 = vrot.lane.b32.xlu0 %v821_v2, %s5866_s24  ;;  %v6408_v7 = vld [vmem:[%s10612_s2 + $0x100] sm:$0xff]  ;;  %v1094_v2 = vcombine.high %v1092_v55, %v1092_v55  ;;  %s5871_s24 = smov 93  }
  0x3b   :  { %4428 = vmatpush3.msra.mxu0 %v6383_v57  ;;  %11032 = vst [vmem:[#allocation48_spill] sm:$0xff] %v6408_v7  ;;  %v4328_v57 = vld.sshfl [vmem:[%s10610_s0 + $0x2c] sm:$0x33 pattern:$0x76325410] }
  0x3c   :  { %4429 = vmatprep.subr.mxu0 %v6389_v39  ;;  %v5432_v52 = vpack.i.bf16 %v4328_v57, %v1094_v2  ;;  %v1356_v39 = vld [vmem:[%s10610_s0 + $0x2e] sm:$0xff] }
  0x3d   :  { %4430 = vmatpush3.msra.mxu0 %v6395_v6  ;;  %v1360_v36 = vcombine.high %v1356_v39, %v1356_v39  ;;  %v1367_v6 = vrot.slane %v1356_v39, %v5926_v12 }
  0x3e   :  { %4431 = vmatprep.subr.mxu0 %v6402_v49  ;;  %5433 = vrot.lane.b32.xlu1 %v5432_v52, %s5867_s13 }
  0x3f   :  { %4432 = vmatpush3.msra.mxu0 %v6408_v7  ;;  %v6423_v49 = vrot.slane %v1360_v36, %v5926_v12  ;;  %v1375_v7 = vcombine.high %v1367_v6, %v1367_v6 }
  0x40   :  { %4436 = vmatprep.subr.mxu0 %v5938_v15  ;;  %v1102_v15 = vcombine.high %v4328_v57, %v4328_v57 }
  0x41   :  { %11033 = vst [vmem:[#allocation49_spill] sm:$0xff] %v6423_v49  ;;  %v5437_v55 = vpack.i.bf16 %v6423_v49, %v1375_v7 }
  0x42   :  { %1113 = vrot.lane.b32.xlu0 %v1102_v15, %s5867_s13  ;;  %s5870_s13 = smov 65  }
  0x43   :  { %5438 = vrot.lane.b32.xlu1 %v5437_v55, %s5868_s9 }
  0x46   :  { %1393 = vrot.lane.b32.xlu0 %v1367_v6, %s5868_s9  ;;  %v6441_v6 = vld [vmem:[%s10612_s2 + $0x278] sm:$0xff] }
  0x7f   :  { %v5399_v52 = vpop.permute.xlu0 %5398  ;;  %v6429_v2 = vpop.permute.xlu1 %5403 }
  0x80   :  { %v5401_v3 = vunpack.i.h.bf16 %v5399_v52  ;;  %v5400_v39 = vunpack.i.l.bf16 %v5399_v52  ;;  %v10642_v36 = vunpack.i.h.bf16 %v6429_v2  ;;  %v5405_v12 = vunpack.i.l.bf16 %v6429_v2 }
  0x82   :  { %v258_v57 = vsel %vm256_vm3, %v5400_v39, %v5401_v3  ;;  %v260_v15 = vsel %vm256_vm3, %v5405_v12, %v10642_v36  ;;  %v259_v7 = vsel %vm256_vm3, %v5401_v3, %v5405_v12  ;;  %v6448_v36 = vld [vmem:[%s10612_s2 + $0x270] sm:$0xff]  ;;  %v11034_v12 = vmov 0.0   ;;  %v6457_v3 = vld [vmem:[%s10612_s2 + $0x268] sm:$0xff] }
  0x83   :  { %v243_v55 = vpop.permute.xlu0 %242  ;;  %339 = vmatprep.mubr.f32.mxu1 %v258_v57  ;;  %409 = vmatprep.mubr.f32.mxu0 %v260_v15  ;;  %v6475_v57 = vld [vmem:[%s10612_s2 + $0x258] sm:$0xff]  ;;  %v6484_v15 = vld [vmem:[%s10612_s2 + $0x250] sm:$0xff]  ;;  %v6515_v49 = vpop.permute.xlu1 %252 }
  0x84   :  { %410 = vmatmul.mubr.f32.vlgmr.msra.gmra.mxu0 %v259_v7  ;;  %v257_v52 = vsel %vm256_vm3, %v243_v55, %v5400_v39  ;;  %v6466_v39 = vld [vmem:[%s10612_s2 + $0x260] sm:$0xff]  ;;  %v6493_v7 = vld [vmem:[%s10612_s2 + $0x248] sm:$0xff] }
  0x85   :  { %4437 = vmatpush3.msra.mxu0 %v5946_v19  ;;  %340 = vmatmul.mubr.f32.vlgmr.msra.gmra.mxu1 %v257_v52  ;;  %v6502_v55 = vld [vmem:[%s10612_s2 + $0x240] sm:$0xff]  ;;  %v6511_v52 = vld [vmem:[%s10612_s2 + $0x238] sm:$0xff] }
  0x86   :  { %416 = vmatpush1.msra.mxu1 %v6441_v6  ;;  %4438 = vmatprep.subr.mxu0 %v5956_v22 }
  0x87   :  { %417 = vmatprep.subr.mxu1 %v11034_v12  ;;  %4439 = vmatpush3.msra.mxu0 %v5961_v23 }
  0x88   :  { %418 = vmatpush1.msra.mxu1 %v6448_v36  ;;  %4440 = vmatprep.subr.mxu0 %v5970_v27 }
  0x89   :  { %419 = vmatprep.subr.mxu1 %v11034_v12  ;;  %4441 = vmatpush3.msra.mxu0 %v5981_v31 }
  0x8a   :  { %420 = vmatpush1.msra.mxu1 %v6457_v3  ;;  %4442 = vmatprep.subr.mxu0 %v5988_v33 }
  0x8b   :  { %421 = vmatprep.subr.mxu1 %v11034_v12  ;;  %4443 = vmatpush3.msra.mxu0 %v6001_v38 }
  0x8c   :  { %422 = vmatpush1.msra.mxu1 %v6466_v39  ;;  %4444 = vmatprep.subr.mxu0 %v6012_v40 }
  0x8d   :  { %423 = vmatprep.subr.mxu1 %v11034_v12  ;;  %4445 = vmatpush3.msra.mxu0 %v6022_v43 }
  0x8e   :  { %424 = vmatpush1.msra.mxu1 %v6475_v57  ;;  %4446 = vmatprep.subr.mxu0 %v6030_v47 }
  0x8f   :  { %425 = vmatprep.subr.mxu1 %v11034_v12  ;;  %4447 = vmatpush3.msra.mxu0 %v6044_v50 }
  0x90   :  { %426 = vmatpush1.msra.mxu1 %v6484_v15  ;;  %4448 = vmatprep.subr.mxu0 %v6051_v51 }
  0x91   :  { %427 = vmatprep.subr.mxu1 %v11034_v12  ;;  %4449 = vmatpush3.msra.mxu0 %v6062_v56 }
  0x92   :  { %428 = vmatpush1.msra.mxu1 %v6493_v7  ;;  %4450 = vmatprep.subr.mxu0 %v6070_v58  ;;  %v6522_v58 = vld [vmem:[%s10612_s2 + $0x230] sm:$0xff] }
  0x93   :  { %429 = vmatprep.subr.mxu1 %v11034_v12  ;;  %4451 = vmatpush3.msra.mxu0 %v6079_v60 }
  0x94   :  { %430 = vmatpush1.msra.mxu1 %v6502_v55  ;;  %4452 = vmatprep.subr.mxu0 %v6090_v0  ;;  %v6531_v0 = vld [vmem:[%s10612_s2 + $0x228] sm:$0xff] }
  0x95   :  { %431 = vmatprep.subr.mxu1 %v11034_v12  ;;  %4453 = vmatpush3.msra.mxu0 %v6107_v4  ;;  %v6546_v4 = vpop.permute.xlu1 %5408 }
  0x96   :  { %432 = vmatpush1.msra.mxu1 %v6511_v52  ;;  %4454 = vmatprep.subr.mxu0 %v6141_v13  ;;  %v6540_v13 = vld [vmem:[%s10612_s2 + $0x220] sm:$0xff] }
  0x97   :  { %433 = vmatprep.subr.mxu1 %v11034_v12  ;;  %4455 = vmatpush3.msra.mxu0 %v6153_v16  ;;  %v6544_v16 = vpop.permute.xlu0 %254 }
  0x98   :  { %434 = vmatpush1.msra.mxu1 %v6522_v58  ;;  %4456 = vmatprep.subr.mxu0 %v6165_v18  ;;  %v5410_v18 = vunpack.i.l.bf16 %v6546_v4 }
  0x99   :  { %435 = vmatprep.subr.mxu1 %v11034_v12  ;;  %4457 = vmatpush3.msra.mxu0 %v6177_v21  ;;  %v6553_v21 = vld [vmem:[%s10612_s2 + $0x218] sm:$0xff] }
  0x9a   :  { %436 = vmatpush1.msra.mxu1 %v6531_v0  ;;  %4458 = vmatprep.subr.mxu0 %v6189_v25  ;;  %v6573_v25 = vld [vmem:[%s10612_s2 + $0x208] sm:$0xff] }
  0x9b   :  { %437 = vmatprep.subr.mxu1 %v11034_v12  ;;  %4459 = vmatpush3.msra.mxu0 %v6204_v29  ;;  %v6564_v29 = vld [vmem:[%s10612_s2 + $0x210] sm:$0xff] }
  0x9c   :  { %438 = vmatpush1.msra.mxu1 %v6540_v13  ;;  %4460 = vmatprep.subr.mxu0 %v6216_v32 }
  0x9d   :  { %439 = vmatprep.subr.mxu1 %v11034_v12  ;;  %4461 = vmatpush3.msra.mxu0 %v6228_v35  ;;  %v536_v35 = vpop.permute.xlu0 %535 }
  0x9e   :  { %440 = vmatpush1.msra.mxu1 %v6553_v21  ;;  %4462 = vmatprep.subr.mxu0 %v6244_v42  ;;  %v6582_v42 = vld [vmem:[%s10612_s2 + $0x200] sm:$0xff] }
  0x9f   :  { %441 = vmatprep.subr.mxu1 %v11034_v12  ;;  %4463 = vmatpush3.msra.mxu0 %v6256_v45  ;;  %v11035_v45 = vunpack.i.h.bf16 %v6546_v4 }
  0xa0   :  { %442 = vmatpush1.msra.mxu1 %v6564_v29  ;;  %4464 = vmatprep.subr.mxu0 %v6268_v48  ;;  %v550_v48 = vsel %vm549_vm4, %v536_v35, %v5410_v18  ;;  %v6621_v35 = vld [vmem:[%s10612_s2 + $0x2c8] sm:$0xff] }
  0xa1   :  { %443 = vmatprep.subr.mxu1 %v11034_v12  ;;  %4465 = vmatpush3.msra.mxu0 %v6283_v54  ;;  %v551_v32 = vsel %vm549_vm4, %v5410_v18, %v11035_v45  ;;  %v6595_v54 = vld [vmem:[%s10612_s2 + $0x2e0] sm:$0xf]  ;;  %v6603_v18 = vld [vmem:[%s10612_s2 + $0x2d8] sm:$0xff] }
  0xa2   :  { %444 = vmatpush1.msra.mxu1 %v6573_v25  ;;  %4466 = vmatprep.subr.mxu0 %v6296_v61  ;;  %v6630_v45 = vld [vmem:[%s10612_s2 + $0x2c0] sm:$0xff] }
  0xa3   :  { %445 = vmatprep.subr.mxu1 %v11034_v12  ;;  %4467 = vmatpush3.msra.mxu0 %v6308_v63 }
  0xa4   :  { %446 = vmatpush1.msra.mxu1 %v6582_v42  ;;  %627 = vmatprep.mubr.f32.mxu0 %v551_v32  ;;  %v6612_v32 = vld [vmem:[%s10612_s2 + $0x2d0] sm:$0xff] }
  0xa5   :  { %4471 = vmatprep.subr.mxu0 %v6112_v5  ;;  %453 = vmatprep.subr.mxu1 %v11034_v12 }
  0xa6   :  { %628 = vmatmul.mubr.f32.vlgmr.msra.gmra.mxu0 %v550_v48  ;;  %4322 = vmatpush2.msk.msra.mxu1 %vm271_vm5, %v6595_v54  ;;  %v6639_v48 = vld [vmem:[%s10612_s2 + $0x2b8] sm:$0xff] }
  0xa7   :  { %4472 = vmatpush3.msra.mxu0 %v6123_v9  ;;  %455 = vmatprep.subr.mxu1 %v11034_v12 }
  0xa8   :  { %4473 = vmatprep.subr.mxu0 %v6129_v10  ;;  %456 = vmatpush2.msra.mxu1 %v6603_v18 }
  0xa9   :  { %4474 = vmatpush3.msra.mxu0 %v6136_v11  ;;  %457 = vmatprep.subr.mxu1 %v11034_v12 }
  0xaa   :  { %4475 = vmatprep.subr.mxu0 %v6147_v14  ;;  %458 = vmatpush2.msra.mxu1 %v6612_v32 }
  0xab   :  { %4476 = vmatpush3.msra.mxu0 %v6159_v17  ;;  %459 = vmatprep.subr.mxu1 %v11034_v12  ;;  %v11043_v17 = vld [vmem:[#allocation44_spill] sm:$0xff] }
  0xac   :  { %4477 = vmatprep.subr.mxu0 %v6171_v20  ;;  %460 = vmatpush2.msra.mxu1 %v6621_v35  ;;  %v6648_v20 = vld [vmem:[%s10612_s2 + $0x2b0] sm:$0xff] }
  0xad   :  { %4478 = vmatpush3.msra.mxu0 %v6183_v24  ;;  %461 = vmatprep.subr.mxu1 %v11034_v12 }
  0xae   :  { %4479 = vmatprep.subr.mxu0 %v6198_v28  ;;  %462 = vmatpush2.msra.mxu1 %v6630_v45  ;;  %v6657_v28 = vld [vmem:[%s10612_s2 + $0x2a8] sm:$0xff] }
  0xaf   :  { %4480 = vmatpush3.msra.mxu0 %v6210_v30  ;;  %463 = vmatprep.subr.mxu1 %v11034_v12  ;;  %v11041_v30 = vld [vmem:[#allocation42_spill] sm:$0xff] }
  0xb0   :  { %4481 = vmatprep.subr.mxu0 %v6222_v34  ;;  %464 = vmatpush2.msra.mxu1 %v6639_v48  ;;  %v6666_v34 = vld [vmem:[%s10612_s2 + $0x2a0] sm:$0xff] }
  0xb1   :  { %4482 = vmatpush3.msra.mxu0 %v6238_v41  ;;  %465 = vmatprep.subr.mxu1 %v11034_v12  ;;  %v11040_v41 = vunpack.i.h.bf16 %v6429_v2  ;;  %v11047_v2 = vunpack.i.h.bf16 %v6546_v4 }
  0xb2   :  { %4483 = vmatprep.subr.mxu0 %v6250_v44  ;;  %466 = vmatpush2.msra.mxu1 %v6648_v20  ;;  %v6675_v44 = vld [vmem:[%s10612_s2 + $0x298] sm:$0xff] }
  0xb3   :  { %4484 = vmatpush3.msra.mxu0 %v6262_v46  ;;  %467 = vmatprep.subr.mxu1 %v11034_v12  ;;  %v11038_v46 = vld [vmem:[#allocation40_spill] sm:$0xff] }
  0xb4   :  { %4485 = vmatprep.subr.mxu0 %v6277_v53  ;;  %468 = vmatpush2.msra.mxu1 %v6657_v28  ;;  %v6684_v53 = vld [vmem:[%s10612_s2 + $0x290] sm:$0xff] }
  0xb5   :  { %4486 = vmatpush3.msra.mxu0 %v6290_v59  ;;  %469 = vmatprep.subr.mxu1 %v11034_v12  ;;  %v11036_v59 = vld [vmem:[#allocation35_spill] sm:$0xff] }
  0xb6   :  { %4487 = vmatprep.subr.mxu0 %v6302_v62  ;;  %470 = vmatpush2.msra.mxu1 %v6666_v34  ;;  %v6693_v62 = vld [vmem:[%s10612_s2 + $0x288] sm:$0xff] }
  0xb7   :  { %4488 = vmatpush3.msra.mxu0 %v6314_v1  ;;  %471 = vmatprep.subr.mxu1 %v11034_v12  ;;  %v11037_v1 = vld [vmem:[#allocation39_spill] sm:$0xff] }
  0xb8   :  { %4489 = vmatprep.subr.mxu0 %v11036_v59  ;;  %472 = vmatpush2.msra.mxu1 %v6675_v44  ;;  %v6702_v59 = vld [vmem:[%s10612_s2 + $0x280] sm:$0xff] }
  0xb9   :  { %4490 = vmatpush3.msra.mxu0 %v6328_v8  ;;  %473 = vmatprep.subr.mxu1 %v11034_v12  ;;  %v262_v8 = vsel %vm256_vm3, %v6515_v49, %v6544_v16  ;;  %v261_v16 = vsel %vm256_vm3, %v11040_v41, %v6515_v49  ;;  %v11045_v41 = vld [vmem:[#allocation46_spill] sm:$0xff]  ;;  %v11046_v49 = vld [vmem:[#allocation47_spill] sm:$0xff]  ;;  %vm4063_vm3 = vcmask 39936  }
  0xba   :  { %4491 = vmatprep.subr.mxu0 %v6335_v26  ;;  %474 = vmatpush2.msra.mxu1 %v6684_v53  ;;  %v6709_v26 = vpop.permute.xlu1 %5413 }
  0xbb   :  { %4492 = vmatpush3.msra.mxu0 %v6342_v37  ;;  %475 = vmatprep.subr.mxu1 %v11034_v12  ;;  %v11039_v37 = vld [vmem:[#allocation41_spill] sm:$0xff]  ;;  %v5415_v24 = vunpack.i.l.bf16 %v6709_v26 }
  0xbc   :  { %4493 = vmatprep.subr.mxu0 %v11037_v1  ;;  %476 = vmatpush2.msra.mxu1 %v6693_v62  ;;  %v5416_v1 = vunpack.i.h.bf16 %v6709_v26  ;;  %v11078_v26 = vld [vmem:[#allocation35_spill] sm:$0xff] }
  0xbd   :  { %4494 = vmatpush3.msra.mxu0 %v11038_v46  ;;  %477 = vmatprep.subr.mxu1 %v11034_v12  ;;  %v11042_v46 = vld [vmem:[#allocation43_spill] sm:$0xff] }
  0xbe   :  { %4495 = vmatprep.subr.mxu0 %v11039_v37  ;;  %478 = vmatpush2.msra.mxu1 %v6702_v59  ;;  %v11044_v37 = vld [vmem:[#allocation45_spill] sm:$0xff] }
  0xbf   :  { %4496 = vmatpush3.msra.mxu0 %v11041_v30  ;;  %4323 = vmatprep.mubr.msk.f32.mxu1 %vm268_vm6, %v262_v8  ;;  %v553_v8 = vsel %vm549_vm4, %v5415_v24, %v5416_v1 }
  0xc0   :  { %4497 = vmatprep.subr.mxu0 %v11042_v46  ;;  %480 = vmatmul.mubr.f32.vlgmr.msra.gmra.mxu1 %v261_v16  ;;  %v552_v16 = vsel %vm549_vm4, %v11047_v2, %v5415_v24  ;;  %v11062_v2 = vld [vmem:[#allocation27_spill] sm:$0xff] }
  0xc1   :  { %4498 = vmatpush3.msra.mxu0 %v11043_v17  ;;  %703 = vmatprep.subr.mxu1 %v11034_v12  ;;  %v11048_v17 = vld [vmem:[#allocation48_spill] sm:$0xff] }
  0xc2   :  { %4499 = vmatprep.subr.mxu0 %v11044_v37  ;;  %704 = vmatpush1.msra.mxu1 %v6441_v6 }
  0xc3   :  { %4500 = vmatpush3.msra.mxu0 %v11045_v41  ;;  %705 = vmatprep.subr.mxu1 %v11034_v12  ;;  %v11049_v41 = vld [vmem:[#allocation6_spill] sm:$0xff] }
  0xc4   :  { %4501 = vmatprep.subr.mxu0 %v11046_v49  ;;  %706 = vmatpush1.msra.mxu1 %v6448_v36 }
  0xc5   :  { %4502 = vmatpush3.msra.mxu0 %v11048_v17  ;;  %707 = vmatprep.subr.mxu1 %v11034_v12 }
  0xc6   :  { %697 = vmatprep.mubr.f32.mxu0 %v553_v8  ;;  %708 = vmatpush1.msra.mxu1 %v6457_v3  ;;  %v11061_v8 = vld [vmem:[#allocation25_spill] sm:$0xff] }
  0xc7   :  { %4506 = vmatprep.subr.mxu0 %v11049_v41  ;;  %698 = vmatmul.mubr.f32.vlgmr.msra.gmra.mxu0 %v552_v16 }
  0xc8   :  { %709 = vmatprep.subr.mxu1 %v11034_v12  ;;  %4507 = vmatpush3.msra.mxu0 %v5946_v19  ;;  %v11050_v19 = vld [vmem:[#allocation7_spill] sm:$0xff] }
  0xc9   :  { %710 = vmatpush1.msra.mxu1 %v6466_v39  ;;  %4508 = vmatprep.subr.mxu0 %v5956_v22  ;;  %v11051_v22 = vld [vmem:[#allocation8_spill] sm:$0xff] }
  0xca   :  { %711 = vmatprep.subr.mxu1 %v11034_v12  ;;  %4509 = vmatpush3.msra.mxu0 %v5961_v23  ;;  %v6774_v23 = vpop.permute.xlu0 %545 }
  0xcb   :  { %712 = vmatpush1.msra.mxu1 %v6475_v57  ;;  %4510 = vmatprep.subr.mxu0 %v5970_v27  ;;  %v11052_v27 = vld [vmem:[#allocation9_spill] sm:$0xff] }
  0xcc   :  { %713 = vmatprep.subr.mxu1 %v11034_v12  ;;  %4511 = vmatpush3.msra.mxu0 %v5981_v31  ;;  %v11053_v31 = vld [vmem:[#allocation10_spill] sm:$0xff] }
  0xcd   :  { %714 = vmatpush1.msra.mxu1 %v6484_v15  ;;  %4512 = vmatprep.subr.mxu0 %v5988_v33  ;;  %v11054_v33 = vld [vmem:[#allocation11_spill] sm:$0xff] }
  0xce   :  { %715 = vmatprep.subr.mxu1 %v11034_v12  ;;  %4513 = vmatpush3.msra.mxu0 %v6001_v38  ;;  %v11055_v38 = vld [vmem:[#allocation13_spill] sm:$0xff] }
  0xcf   :  { %716 = vmatpush1.msra.mxu1 %v6493_v7  ;;  %4514 = vmatprep.subr.mxu0 %v6012_v40  ;;  %v11056_v40 = vld [vmem:[#allocation15_spill] sm:$0xff] }
  0xd0   :  { %717 = vmatprep.subr.mxu1 %v11034_v12  ;;  %4515 = vmatpush3.msra.mxu0 %v6022_v43  ;;  %v11057_v43 = vld [vmem:[#allocation17_spill] sm:$0xff] }
  0xd1   :  { %718 = vmatpush1.msra.mxu1 %v6502_v55  ;;  %4516 = vmatprep.subr.mxu0 %v6030_v47  ;;  %v6788_v47 = vpop.permute.xlu1 %547 }
  0xd2   :  { %719 = vmatprep.subr.mxu1 %v11034_v12  ;;  %4517 = vmatpush3.msra.mxu0 %v6044_v50  ;;  %v6790_v50 = vpop.permute.xlu0 %5418 }
  0xd3   :  { %720 = vmatpush1.msra.mxu1 %v6511_v52  ;;  %4518 = vmatprep.subr.mxu0 %v6051_v51  ;;  %v11058_v51 = vld [vmem:[#allocation19_spill] sm:$0xff]  ;;  %v5421_v4 = vunpack.i.h.bf16 %v6790_v50  ;;  %v5420_v24 = vunpack.i.l.bf16 %v6790_v50  ;;  %v6988_v50 = vld [vmem:[%s10612_s2 + $0x70] sm:$0xff] }
  0xd4   :  { %721 = vmatprep.subr.mxu1 %v11034_v12  ;;  %4519 = vmatpush3.msra.mxu0 %v6062_v56  ;;  %v11059_v56 = vld [vmem:[#allocation21_spill] sm:$0xff] }
  0xd5   :  { %722 = vmatpush1.msra.mxu1 %v6522_v58  ;;  %4520 = vmatprep.subr.mxu0 %v11050_v19  ;;  %v11063_v19 = vld [vmem:[#allocation29_spill] sm:$0xff] }
  0xd6   :  { %723 = vmatprep.subr.mxu1 %v11034_v12  ;;  %4521 = vmatpush3.msra.mxu0 %v6079_v60  ;;  %v11060_v60 = vld [vmem:[#allocation23_spill] sm:$0xff] }
  0xd7   :  { %724 = vmatpush1.msra.mxu1 %v6531_v0  ;;  %4522 = vmatprep.subr.mxu0 %v11051_v22  ;;  %v824_v22 = vpop.permute.xlu1 %823 }
  0xd8   :  { %725 = vmatprep.subr.mxu1 %v11034_v12  ;;  %4523 = vmatpush3.msra.mxu0 %v11052_v27  ;;  %v11064_v27 = vld [vmem:[#allocation31_spill] sm:$0xff] }
  0xd9   :  { %726 = vmatpush1.msra.mxu1 %v6540_v13  ;;  %4524 = vmatprep.subr.mxu0 %v11053_v31  ;;  %v839_v31 = vsel %vm837_vm8, %v5420_v24, %v5421_v4 }
  0xda   :  { %727 = vmatprep.subr.mxu1 %v11034_v12  ;;  %4525 = vmatpush3.msra.mxu0 %v11054_v33  ;;  %v838_v33 = vsel %vm837_vm8, %v824_v22, %v5420_v24  ;;  %v2217_v22 = vld [vmem:[%s10610_s0 + $0x52] sm:$0xff] }
  0xdb   :  { %728 = vmatpush1.msra.mxu1 %v6553_v21  ;;  %4526 = vmatprep.subr.mxu0 %v11055_v38 }
  0xdc   :  { %729 = vmatprep.subr.mxu1 %v11034_v12  ;;  %4527 = vmatpush3.msra.mxu0 %v11056_v40  ;;  %v11085_v40 = vld [vmem:[#allocation40_spill] sm:$0xff] }
  0xdd   :  { %730 = vmatpush1.msra.mxu1 %v6564_v29  ;;  %4528 = vmatprep.subr.mxu0 %v11057_v43 }
  0xde   :  { %731 = vmatprep.subr.mxu1 %v11034_v12  ;;  %4529 = vmatpush3.msra.mxu0 %v11058_v51 }
  0xdf   :  { %732 = vmatpush1.msra.mxu1 %v6573_v25  ;;  %4530 = vmatprep.subr.mxu0 %v11059_v56 }
  0xe0   :  { %733 = vmatprep.subr.mxu1 %v11034_v12  ;;  %4531 = vmatpush3.msra.mxu0 %v11060_v60  ;;  %v106_v41 = vpop.f32.mrf.mxu0  ;;  %v11087_v60 = vld [vmem:[#allocation44_spill] sm:$0xff] }
  0xe1   :  { %734 = vmatpush1.msra.mxu1 %v6582_v42  ;;  %4532 = vmatprep.subr.mxu0 %v11061_v8  ;;  %111 = vst.msk [vmem:[#allocation2] sm:$0x3] %vm110_vm7, %v106_v41  ;;  %v6945_v41 = vpop.permute.xlu1 %5428  ;;  %vm3120_vm7 = vcmask 400384  }
  0xe2   :  { %741 = vmatprep.subr.mxu1 %v11034_v12  ;;  %4533 = vmatpush3.msra.mxu0 %v11062_v2  ;;  %v5374_v16 = vpop.f32.mrf.mxu0 }
  0xe3   :  { %4324 = vmatpush2.msk.msra.mxu1 %vm271_vm5, %v6595_v54  ;;  %4534 = vmatprep.subr.mxu0 %v11063_v19  ;;  %v7001_v16 = vld [vmem:[%s10612_s2 + $0xe8] sm:$0xff] }
  0xe4   :  { %743 = vmatprep.subr.mxu1 %v11034_v12  ;;  %4535 = vmatpush3.msra.mxu0 %v11064_v27  ;;  %v7007_v19 = vld [vmem:[%s10612_s2 + $0x68] sm:$0xff]  ;;  %v7024_v27 = vld [vmem:[%s10612_s2 + $0xe0] sm:$0xff] }
  0xe5   :  { %744 = vmatpush2.msra.mxu1 %v6603_v18  ;;  %4536 = vmatprep.subr.mxu0 %v6296_v61  ;;  %v555_v61 = vsel %vm549_vm4, %v6774_v23, %v6788_v47  ;;  %v11086_v47 = vld [vmem:[#allocation41_spill] sm:$0xff]  ;;  %v834_v8 = vpop.permute.xlu1 %833  ;;  %11089 = vst [vmem:[#allocation42_spill] sm:$0xff] %v7007_v19  ;;  %11090 = vst [vmem:[#allocation43_spill] sm:$0xff] %v7024_v27 }
  0xe6   :  { %745 = vmatprep.subr.mxu1 %v11034_v12  ;;  %4537 = vmatpush3.msra.mxu0 %v6308_v63  ;;  %v554_v63 = vsel %vm549_vm4, %v5416_v1, %v6774_v23  ;;  %v11076_v1 = vld [vmem:[#allocation33_spill] sm:$0xff]  ;;  %v11084_v23 = vld [vmem:[#allocation39_spill] sm:$0xff]  ;;  %vm1072_vm4 = vcmask 960176  }
  0xe7   :  { %746 = vmatpush2.msra.mxu1 %v6612_v32  ;;  %915 = vmatprep.mubr.f32.mxu0 %v839_v31  ;;  %v7030_v31 = vld [vmem:[%s10612_s2 + $0x178] sm:$0xff] }
  0xe8   :  { %991 = vmatprep.subr.mxu0 %v11034_v12  ;;  %747 = vmatprep.subr.mxu1 %v11034_v12 }
  0xe9   :  { %916 = vmatmul.mubr.f32.vlgmr.msra.gmra.mxu0 %v838_v33  ;;  %748 = vmatpush2.msra.mxu1 %v6621_v35 }
  0xea   :  { %992 = vmatpush1.msra.mxu0 %v6441_v6  ;;  %749 = vmatprep.subr.mxu1 %v11034_v12 }
  0xeb   :  { %993 = vmatprep.subr.mxu0 %v11034_v12  ;;  %750 = vmatpush2.msra.mxu1 %v6630_v45 }
  0xec   :  { %994 = vmatpush1.msra.mxu0 %v6448_v36  ;;  %751 = vmatprep.subr.mxu1 %v11034_v12 }
  0xed   :  { %995 = vmatprep.subr.mxu0 %v11034_v12  ;;  %752 = vmatpush2.msra.mxu1 %v6639_v48 }
  0xee   :  { %996 = vmatpush1.msra.mxu0 %v6457_v3  ;;  %753 = vmatprep.subr.mxu1 %v11034_v12 }
  0xef   :  { %997 = vmatprep.subr.mxu0 %v11034_v12  ;;  %754 = vmatpush2.msra.mxu1 %v6648_v20 }
  0xf0   :  { %998 = vmatpush1.msra.mxu0 %v6466_v39  ;;  %755 = vmatprep.subr.mxu1 %v11034_v12  ;;  %v11079_v39 = vld [vmem:[#allocation49_spill] sm:$0xff] }
  0xf1   :  { %999 = vmatprep.subr.mxu0 %v11034_v12  ;;  %756 = vmatpush2.msra.mxu1 %v6657_v28 }
  0xf2   :  { %1000 = vmatpush1.msra.mxu0 %v6475_v57  ;;  %757 = vmatprep.subr.mxu1 %v11034_v12  ;;  %v1376_v57 = vcombine.high %v11079_v39, %v11079_v39  ;;  %v7121_v39 = vld [vmem:[%s10612_s2 + $0x48] sm:$0xff] }
  0xf3   :  { %1001 = vmatprep.subr.mxu0 %v11034_v12  ;;  %758 = vmatpush2.msra.mxu1 %v6666_v34  ;;  %11097 = vst [vmem:[#allocation9_spill] sm:$0xff] %v7121_v39 }
  0xf4   :  { %1002 = vmatpush1.msra.mxu0 %v6484_v15  ;;  %759 = vmatprep.subr.mxu1 %v11034_v12  ;;  %v11080_v15 = vld [vmem:[#allocation5_spill] sm:$0xff] }
  0xf5   :  { %1003 = vmatprep.subr.mxu0 %v11034_v12  ;;  %760 = vmatpush2.msra.mxu1 %v6675_v44 }
  0xf6   :  { %1004 = vmatpush1.msra.mxu0 %v6493_v7  ;;  %761 = vmatprep.subr.mxu1 %v11034_v12 }
  0xf7   :  { %1005 = vmatprep.subr.mxu0 %v11034_v12  ;;  %762 = vmatpush2.msra.mxu1 %v6684_v53 }
  0xf8   :  { %1006 = vmatpush1.msra.mxu0 %v6502_v55  ;;  %763 = vmatprep.subr.mxu1 %v11034_v12  ;;  %v11081_v55 = vld [vmem:[#allocation36_spill] sm:$0xff] }
  0xf9   :  { %1007 = vmatprep.subr.mxu0 %v11034_v12  ;;  %764 = vmatpush2.msra.mxu1 %v6693_v62 }
  0xfa   :  { %1008 = vmatpush1.msra.mxu0 %v6511_v52  ;;  %765 = vmatprep.subr.mxu1 %v11034_v12  ;;  %v11082_v52 = vld [vmem:[#allocation37_spill] sm:$0xff] }
  0xfb   :  { %1009 = vmatprep.subr.mxu0 %v11034_v12  ;;  %766 = vmatpush2.msra.mxu1 %v6702_v59 }
  0xfc   :  { %1010 = vmatpush1.msra.mxu0 %v6522_v58  ;;  %4325 = vmatprep.mubr.msk.f32.mxu1 %vm268_vm6, %v555_v61  ;;  %v11065_v58 = vld [vmem:[#allocation12_spill] sm:$0xff]  ;;  %v2221_v61 = vcombine.high %v2217_v22, %v2217_v22 }
  0xfd   :  { %1011 = vmatprep.subr.mxu0 %v11034_v12  ;;  %768 = vmatmul.mubr.f32.vlgmr.msra.gmra.mxu1 %v554_v63  ;;  %v7037_v63 = vld [vmem:[%s10612_s2 + $0x60] sm:$0xff] }
  0xfe   :  { %4541 = vmatprep.subr.mxu1 %v6112_v5  ;;  %1012 = vmatpush1.msra.mxu0 %v6531_v0  ;;  %v11066_v0 = vld [vmem:[#allocation14_spill] sm:$0xff]  ;;  %v11067_v5 = vld [vmem:[#allocation16_spill] sm:$0xff]  ;;  %11091 = vst [vmem:[#allocation45_spill] sm:$0xff] %v7037_v63 }
  0xff   :  { %4542 = vmatpush3.msra.mxu1 %v6123_v9  ;;  %1013 = vmatprep.subr.mxu0 %v11034_v12  ;;  %v11068_v9 = vld [vmem:[#allocation18_spill] sm:$0xff] }
 0x100   :  { %4543 = vmatprep.subr.mxu1 %v6129_v10  ;;  %1014 = vmatpush1.msra.mxu0 %v6540_v13  ;;  %v11069_v10 = vld [vmem:[#allocation20_spill] sm:$0xff] }
 0x101   :  { %4544 = vmatpush3.msra.mxu1 %v6136_v11  ;;  %1015 = vmatprep.subr.mxu0 %v11034_v12  ;;  %v11070_v11 = vld [vmem:[#allocation22_spill] sm:$0xff]  ;;  %v11071_v13 = vld [vmem:[#allocation24_spill] sm:$0xff] }
 0x102   :  { %4545 = vmatprep.subr.mxu1 %v6147_v14  ;;  %1016 = vmatpush1.msra.mxu0 %v6553_v21  ;;  %v11072_v14 = vld [vmem:[#allocation26_spill] sm:$0xff]  ;;  %v11073_v21 = vld [vmem:[#allocation28_spill] sm:$0xff] }
 0x103   :  { %4546 = vmatpush3.msra.mxu1 %v11065_v58  ;;  %1017 = vmatprep.subr.mxu0 %v11034_v12  ;;  %v7043_v58 = vld [vmem:[%s10612_s2 + $0x1f0] sm:$0xff] }
 0x104   :  { %4547 = vmatprep.subr.mxu1 %v11066_v0  ;;  %1018 = vmatpush1.msra.mxu0 %v6564_v29  ;;  %v11075_v29 = vld [vmem:[#allocation32_spill] sm:$0xff]  ;;  %v7049_v0 = vld [vmem:[%s10612_s2 + $0xd8] sm:$0xff] }
 0x105   :  { %4548 = vmatpush3.msra.mxu1 %v11067_v5  ;;  %1019 = vmatprep.subr.mxu0 %v11034_v12  ;;  %11092 = vst [vmem:[#allocation47_spill] sm:$0xff] %v7049_v0  ;;  %v7055_v5 = vld [vmem:[%s10612_s2 + $0x170] sm:$0xff] }
 0x106   :  { %4549 = vmatprep.subr.mxu1 %v11068_v9  ;;  %1020 = vmatpush1.msra.mxu0 %v6573_v25  ;;  %v11074_v25 = vld [vmem:[#allocation30_spill] sm:$0xff]  ;;  %v7059_v9 = vrot.slane %v2217_v22, %v11080_v15 }
 0x107   :  { %4550 = vmatpush3.msra.mxu1 %v11069_v10  ;;  %1021 = vmatprep.subr.mxu0 %v11034_v12  ;;  %v7064_v10 = vld [vmem:[%s10612_s2 + $0x58] sm:$0xff] }
 0x108   :  { %4551 = vmatprep.subr.mxu1 %v11070_v11  ;;  %1022 = vmatpush1.msra.mxu0 %v6582_v42  ;;  %v6903_v42 = vld [vmem:[%s10610_s0 + $0x36] sm:$0x3f]  ;;  %11093 = vst [vmem:[#allocation48_spill] sm:$0xff] %v7064_v10  ;;  %v7070_v11 = vld [vmem:[%s10612_s2 + $0x1e8] sm:$0xff] }
 0x109   :  { %4552 = vmatpush3.msra.mxu1 %v11071_v13  ;;  %1029 = vmatprep.subr.mxu0 %v11034_v12  ;;  %v6915_v7 = vrot.slane %v6903_v42, %v11080_v15  ;;  %v1377_v2 = vcombine.high %v6903_v42, %v6903_v42  ;;  %v7077_v13 = vld [vmem:[%s10612_s2 + $0xd0] sm:$0xff]  ;;  %v7100_v42 = vld [vmem:[%s10612_s2 + $0x1e0] sm:$0xff]  ;;  %v7270_v22 = vld [vmem:[%s10612_s2 + $0x98] sm:$0xff] }
 0x10a   :  { %4553 = vmatprep.subr.mxu1 %v11072_v14  ;;  %4326 = vmatpush2.msk.msra.mxu0 %vm271_vm5, %v6595_v54  ;;  %v11077_v54 = vld [vmem:[#allocation34_spill] sm:$0xff]  ;;  %v7081_v14 = vrot.slane %v2221_v61, %v11080_v15  ;;  %11111 = vst [vmem:[#allocation14_spill] sm:$0xff] %v7270_v22 }
 0x10b   :  { %4554 = vmatpush3.msra.mxu1 %v11073_v21  ;;  %1031 = vmatprep.subr.mxu0 %v11034_v12  ;;  %v5442_v38 = vpack.i.bf16 %v6915_v7, %v1376_v57  ;;  %v1391_v33 = vrot.slane %v1377_v2, %v11080_v15  ;;  %v2236_v21 = vcombine.high %v7059_v9, %v7059_v9  ;;  %v7127_v57 = vld [vmem:[%s10612_s2 + $0x1d8] sm:$0xff]  ;;  %v7264_v2 = vld [vmem:[%s10612_s2 + $0x1b0] sm:$0xff] }
 0x10c   :  { %4555 = vmatprep.subr.mxu1 %v11074_v25  ;;  %1032 = vmatpush2.msra.mxu0 %v6603_v18  ;;  %v1643_v18 = vld [vmem:[%s10610_s0 + $0x3a] sm:$0xff]  ;;  %11094 = vst [vmem:[#allocation6_spill] sm:$0xff] %v7081_v14  ;;  %v7088_v25 = vld [vmem:[%s10612_s2 + $0x168] sm:$0xff]  ;;  %11110 = vst [vmem:[#allocation12_spill] sm:$0xff] %v7264_v2 }
 0x10d   :  { %4556 = vmatpush3.msra.mxu1 %v11075_v29  ;;  %1033 = vmatprep.subr.mxu0 %v11034_v12  ;;  %v1654_v43 = vrot.slane %v1643_v18, %v11080_v15  ;;  %v7094_v29 = vld [vmem:[%s10612_s2 + $0x50] sm:$0xff] }
 0x10e   :  { %4557 = vmatprep.subr.mxu1 %v11076_v1  ;;  %1034 = vmatpush2.msra.mxu0 %v6612_v32  ;;  %v11083_v32 = vld [vmem:[#allocation38_spill] sm:$0xff]  ;;  %v7106_v1 = vld [vmem:[%s10612_s2 + $0xc8] sm:$0xff] }
 0x10f   :  { %4558 = vmatpush3.msra.mxu1 %v11077_v54  ;;  %1035 = vmatprep.subr.mxu0 %v11034_v12  ;;  %11095 = vst [vmem:[#allocation7_spill] sm:$0xff] %v7106_v1  ;;  %v7110_v54 = vpack.i.bf16 %v7081_v14, %v2236_v21  ;;  %v7279_v21 = vld [vmem:[%s10612_s2 + $0x130] sm:$0xff] }
 0x110   :  { %4559 = vmatprep.subr.mxu1 %v11078_v26  ;;  %1036 = vmatpush2.msra.mxu0 %v6621_v35  ;;  %v5424_v35 = vpop.permute.xlu0 %5423  ;;  %v7115_v26 = vld [vmem:[%s10612_s2 + $0x160] sm:$0xff]  ;;  %11112 = vst [vmem:[#allocation16_spill] sm:$0xff] %v7279_v21  ;;  %v7305_v14 = vld [vmem:[%s10610_s0 + $0x4e] sm:$0x3f] }
 0x111   :  { %4560 = vmatpush3.msra.mxu1 %v11081_v55  ;;  %1037 = vmatprep.subr.mxu0 %v11034_v12  ;;  %v5426_v51 = vunpack.i.h.bf16 %v5424_v35  ;;  %v5425_v56 = vunpack.i.l.bf16 %v5424_v35  ;;  %11096 = vst [vmem:[#allocation8_spill] sm:$0xff] %v7110_v54  ;;  %v7139_v55 = vld [vmem:[%s10612_s2 + $0x158] sm:$0xff]  ;;  %v7163_v35 = vld [vmem:[%s10610_s0 + $0x42] sm:$0x3f]  ;;  %v7293_v54 = vld [vmem:[%s10612_s2 + $0x1a8] sm:$0xff] }
 0x112   :  { %4561 = vmatprep.subr.mxu1 %v11082_v52  ;;  %1038 = vmatpush2.msra.mxu0 %v6630_v45  ;;  %v1647_v45 = vcombine.high %v1643_v18, %v1643_v18  ;;  %v7145_v52 = vld [vmem:[%s10612_s2 + $0x40] sm:$0xff]  ;;  %v7151_v18 = vld [vmem:[%s10612_s2 + $0x1d0] sm:$0xff]  ;;  %11114 = vst [vmem:[#allocation20_spill] sm:$0xff] %v7293_v54 }
 0x113   :  { %4562 = vmatpush3.msra.mxu1 %v11083_v32  ;;  %1039 = vmatprep.subr.mxu0 %v11034_v12  ;;  %v7157_v32 = vld [vmem:[%s10612_s2 + $0xb8] sm:$0xff] }
 0x114   :  { %4563 = vmatprep.subr.mxu1 %v11084_v23  ;;  %1040 = vmatpush2.msra.mxu0 %v6639_v48  ;;  %v6938_v48 = vpop.permute.xlu0 %1103  ;;  %v6943_v24 = vrot.slane %v1647_v45, %v11080_v15  ;;  %v7168_v23 = vld [vmem:[%s10612_s2 + $0x150] sm:$0xff]  ;;  %v7183_v45 = vld [vmem:[%s10612_s2 + $0x1c8] sm:$0xff] }
 0x115   :  { %4564 = vmatpush3.msra.mxu1 %v11085_v40  ;;  %1041 = vmatprep.subr.mxu0 %v11034_v12  ;;  %11098 = vst [vmem:[#allocation10_spill] sm:$0xff] %v7168_v23  ;;  %v1930_v40 = vld [vmem:[%s10610_s0 + $0x46] sm:$0xff]  ;;  %11099 = vst [vmem:[#allocation11_spill] sm:$0xff] %v7183_v45 }
 0x116   :  { %4565 = vmatprep.subr.mxu1 %v11086_v47  ;;  %1042 = vmatpush2.msra.mxu0 %v6648_v20  ;;  %v1662_v20 = vcombine.high %v1654_v43, %v1654_v43  ;;  %v7195_v47 = vld [vmem:[%s10612_s2 + $0x148] sm:$0xff] }
 0x117   :  { %4566 = vmatpush3.msra.mxu1 %v11041_v30  ;;  %1043 = vmatprep.subr.mxu0 %v11034_v12  ;;  %v11088_v30 = vld [vmem:[#allocation46_spill] sm:$0xff]  ;;  %11100 = vst [vmem:[#allocation13_spill] sm:$0xff] %v7195_v47 }
 0x118   :  { %5443 = vrot.lane.b32.xlu1 %v5442_v38, %s5868_s9  ;;  %4567 = vmatprep.subr.mxu1 %v11042_v46  ;;  %v841_v46 = vsel %vm837_vm8, %v5425_v56, %v5426_v51  ;;  %v7174_v38 = vld [vmem:[%s10612_s2 + $0x38] sm:$0xff] }
 0x119   :  { %1044 = vmatpush2.msra.mxu0 %v6657_v28  ;;  %4568 = vmatpush3.msra.mxu1 %v11087_v60  ;;  %v5447_v28 = vpack.i.bf16 %v6943_v24, %v1662_v20  ;;  %v7211_v60 = vld [vmem:[%s10612_s2 + $0x1c0] sm:$0xff]  ;;  %v7217_v20 = vld [vmem:[%s10612_s2 + $0xa8] sm:$0xff] }
 0x11a   :  { %1045 = vmatprep.subr.mxu0 %v11034_v12  ;;  %4569 = vmatprep.subr.mxu1 %v11044_v37  ;;  %v836_v37 = vpop.permute.xlu0 %835  ;;  %11102 = vst [vmem:[#allocation17_spill] sm:$0xff] %v7211_v60  ;;  %11103 = vst [vmem:[#allocation19_spill] sm:$0xff] %v7217_v20 }
 0x11b   :  { %1046 = vmatpush2.msra.mxu0 %v6666_v34  ;;  %4570 = vmatpush3.msra.mxu1 %v11088_v30  ;;  %v840_v34 = vsel %vm837_vm8, %v5421_v4, %v5425_v56  ;;  %v1392_v4 = vcombine.high %v6915_v7, %v6915_v7  ;;  %v7133_v7 = vld [vmem:[%s10612_s2 + $0xc0] sm:$0xff]  ;;  %v7206_v56 = vrot.slane %v7163_v35, %v11080_v15 }
 0x11c   :  { %1047 = vmatprep.subr.mxu0 %v11034_v12  ;;  %4571 = vmatprep.subr.mxu1 %v11046_v49  ;;  %v6981_v49 = vld [vmem:[%s10612_s2 + $0xf0] sm:$0xff]  ;;  %v1934_v30 = vcombine.high %v1930_v40, %v1930_v40 }
 0x11d   :  { %1048 = vmatpush2.msra.mxu0 %v6675_v44  ;;  %4572 = vmatpush3.msra.mxu1 %v11048_v17  ;;  %v6965_v44 = vld [vmem:[%s10612_s2 + $0xf8] sm:$0xff] }
 0x11e   :  { %985 = vmatprep.mubr.f32.mxu1 %v841_v46  ;;  %1049 = vmatprep.subr.mxu0 %v11034_v12  ;;  %v6972_v17 = vld [vmem:[%s10612_s2 + $0x78] sm:$0xff]  ;;  %v7221_v46 = vrot.slane %v1930_v40, %v11080_v15 }
 0x11f   :  { %986 = vmatmul.mubr.f32.vlgmr.msra.gmra.mxu1 %v840_v34  ;;  %1050 = vmatpush2.msra.mxu0 %v6684_v53  ;;  %v843_v53 = vsel %vm837_vm8, %v834_v8, %v836_v37  ;;  %v7232_v34 = vld [vmem:[%s10612_s2 + $0x28] sm:$0xff]  ;;  %v7238_v37 = vld [vmem:[%s10612_s2 + $0x1b8] sm:$0xff] }
 0x120   :  { %4576 = vmatprep.subr.mxu1 %v6965_v44  ;;  %1051 = vmatprep.subr.mxu0 %v11034_v12  ;;  %11105 = vst [vmem:[#allocation23_spill] sm:$0xff] %v7232_v34  ;;  %11106 = vst [vmem:[#allocation25_spill] sm:$0xff] %v7238_v37  ;;  %v1949_v61 = vcombine.high %v7221_v46, %v7221_v46  ;;  %v7285_v40 = vld [vmem:[%s10612_s2 + $0x18] sm:$0xff] }
 0x121   :  { %4577 = vmatpush3.msra.mxu1 %v6972_v17  ;;  %5448 = vrot.lane.b32.xlu0 %v5447_v28, %s5869_s21  ;;  %v7226_v28 = vld [vmem:[%s10612_s2 + $0x140] sm:$0xff]  ;;  %11113 = vst [vmem:[#allocation18_spill] sm:$0xff] %v7285_v40 }
 0x122   :  { %1052 = vmatpush2.msra.mxu0 %v6693_v62  ;;  %4578 = vmatprep.subr.mxu1 %v6981_v49  ;;  %v842_v62 = vsel %vm837_vm8, %v5426_v51, %v834_v8  ;;  %v7201_v51 = vld [vmem:[%s10612_s2 + $0x30] sm:$0xff]  ;;  %11104 = vst [vmem:[#allocation21_spill] sm:$0xff] %v7226_v28  ;;  %v7244_v8 = vld [vmem:[%s10612_s2 + $0xa0] sm:$0xff]  ;;  %vm1352_vm8 = vcmask 1042352  }
 0x123   :  { %1053 = vmatprep.subr.mxu0 %v11034_v12  ;;  %4579 = vmatpush3.msra.mxu1 %v6988_v50  ;;  %11101 = vst [vmem:[#allocation15_spill] sm:$0xff] %v7201_v51  ;;  %11107 = vst [vmem:[#allocation27_spill] sm:$0xff] %v7244_v8 }
 0x124   :  { %1054 = vmatpush2.msra.mxu0 %v6702_v59  ;;  %4327 = vmatprep.mubr.msk.f32.mxu0 %vm268_vm6, %v843_v53  ;;  %v7013_v59 = vld [vmem:[%s10612_s2 + $0x1f8] sm:$0xff] }
 0x125   :  { %4580 = vmatprep.subr.mxu1 %v7001_v16  ;;  %1056 = vmatmul.mubr.f32.vlgmr.msra.gmra.mxu0 %v842_v62  ;;  %v7250_v53 = vld [vmem:[%s10612_s2 + $0x138] sm:$0xff]  ;;  %v1679_v62 = vcombine.high %v7206_v56, %v7206_v56 }
 0x126   :  { %4581 = vmatpush3.msra.mxu1 %v7007_v19  ;;  %4611 = vmatprep.subr.mxu0 %v7013_v59  ;;  %11108 = vst [vmem:[#allocation29_spill] sm:$0xff] %v7250_v53 }
 0x127   :  { %1403 = vrot.lane.b32.xlu0 %v1392_v4, %s5868_s9  ;;  %1680 = vrot.lane.b32.xlu1 %v1654_v43, %s5869_s21  ;;  %v7189_v43 = vld [vmem:[%s10612_s2 + $0xb0] sm:$0xff]  ;;  %v7256_v4 = vld [vmem:[%s10612_s2 + $0x20] sm:$0xff] }
 0x128   :  { %4582 = vmatprep.subr.mxu1 %v7024_v27  ;;  %4612 = vmatpush3.msra.mxu0 %v7030_v31  ;;  %11109 = vst [vmem:[#allocation31_spill] sm:$0xff] %v7256_v4 }
 0x129   :  { %4583 = vmatpush3.msra.mxu1 %v7037_v63  ;;  %4613 = vmatprep.subr.mxu0 %v7043_v58 }
 0x12a   :  { %4584 = vmatprep.subr.mxu1 %v7049_v0  ;;  %4614 = vmatpush3.msra.mxu0 %v7055_v5 }
 0x12b   :  { %4585 = vmatpush3.msra.mxu1 %v7064_v10  ;;  %4615 = vmatprep.subr.mxu0 %v7070_v11 }
 0x12c   :  { %1405 = vrot.lane.b32.xlu1 %v1391_v33, %s5868_s9  ;;  %4586 = vmatprep.subr.mxu1 %v7077_v13  ;;  %v1948_v33 = vrot.slane %v1934_v30, %v11080_v15  ;;  %v5430_v30 = vunpack.i.l.bf16 %v6945_v41 }
 0x12d   :  { %4616 = vmatpush3.msra.mxu0 %v7088_v25  ;;  %4587 = vmatpush3.msra.mxu1 %v7094_v29 }
 0x12e   :  { %4617 = vmatprep.subr.mxu0 %v7100_v42  ;;  %4588 = vmatprep.subr.mxu1 %v7106_v1 }
 0x12f   :  { %4618 = vmatpush3.msra.mxu0 %v7115_v26  ;;  %4589 = vmatpush3.msra.mxu1 %v7121_v39 }
 0x130   :  { %4619 = vmatprep.subr.mxu0 %v7127_v57  ;;  %4590 = vmatprep.subr.mxu1 %v7133_v7 }
 0x131   :  { %4620 = vmatpush3.msra.mxu0 %v7139_v55  ;;  %4591 = vmatpush3.msra.mxu1 %v7145_v52 }
 0x132   :  { %4621 = vmatprep.subr.mxu0 %v7151_v18  ;;  %4592 = vmatprep.subr.mxu1 %v7157_v32 }
 0x133   :  { %4622 = vmatpush3.msra.mxu0 %v7168_v23  ;;  %4593 = vmatpush3.msra.mxu1 %v7174_v38  ;;  %v7368_v23 = vld [vmem:[%s10612_s2 + $0x118] sm:$0xff] }
 0x134   :  { %4623 = vmatprep.subr.mxu0 %v7183_v45  ;;  %4594 = vmatprep.subr.mxu1 %v7189_v43  ;;  %v7362_v45 = vld [vmem:[%s10612_s2 + $0x80] sm:$0xff]  ;;  %11126 = vst [vmem:[#allocation36_spill] sm:$0xff] %v7368_v23 }
 0x135   :  { %4624 = vmatpush3.msra.mxu0 %v7195_v47  ;;  %4595 = vmatpush3.msra.mxu1 %v7201_v51  ;;  %v1116_v47 = vsel %vm1115_vm9, %v6938_v48, %v5430_v30  ;;  %11125 = vst [vmem:[#allocation49_spill] sm:$0xff] %v7362_v45  ;;  %v7379_v48 = vld [vmem:[%s10612_s2] sm:$0xff] }
 0x136   :  { %4625 = vmatprep.subr.mxu0 %v7211_v60  ;;  %4596 = vmatprep.subr.mxu1 %v7217_v20  ;;  %v7340_v60 = vrot.slane %v7305_v14, %v11080_v15 }
 0x137   :  { %4626 = vmatpush3.msra.mxu0 %v7226_v28  ;;  %4597 = vmatpush3.msra.mxu1 %v7232_v34  ;;  %v1950_v28 = vcombine.high %v1948_v33, %v1948_v33 }
 0x138   :  { %4627 = vmatprep.subr.mxu0 %v7238_v37  ;;  %4598 = vmatprep.subr.mxu1 %v7244_v8  ;;  %v5457_v37 = vpack.i.bf16 %v1948_v33, %v1949_v61  ;;  %11121 = vst [vmem:[#allocation33_spill] sm:$0xff] %v7340_v60  ;;  %v7345_v61 = vld [vmem:[%s10612_s2 + $0x8] sm:$0xff]  ;;  %v11124_v33 = vunpack.i.h.bf16 %v6945_v41 }
 0x139   :  { %4628 = vmatpush3.msra.mxu0 %v7250_v53  ;;  %4599 = vmatpush3.msra.mxu1 %v7256_v4  ;;  %v7323_v53 = vld [vmem:[%s10612_s2 + $0x1a0] sm:$0xff]  ;;  %11122 = vst [vmem:[#allocation34_spill] sm:$0xff] %v7345_v61 }
 0x13a   :  { %4629 = vmatprep.subr.mxu0 %v7264_v2  ;;  %4600 = vmatprep.subr.mxu1 %v7270_v22  ;;  %v7310_v2 = vld [vmem:[%s10612_s2 + $0x128] sm:$0xff]  ;;  %11118 = vst [vmem:[#allocation28_spill] sm:$0xff] %v7323_v53 }
 0x13b   :  { %4630 = vmatpush3.msra.mxu0 %v7279_v21  ;;  %4601 = vmatpush3.msra.mxu1 %v7285_v40  ;;  %v7299_v21 = vld [vmem:[%s10612_s2 + $0x90] sm:$0xff]  ;;  %11116 = vst [vmem:[#allocation24_spill] sm:$0xff] %v7310_v2 }
 0x13c   :  { %4631 = vmatprep.subr.mxu0 %v7293_v54  ;;  %11115 = vst [vmem:[#allocation22_spill] sm:$0xff] %v7299_v21  ;;  %4602 = vmatprep.subr.mxu1 %v7299_v21  ;;  %v7317_v54 = vld [vmem:[%s10612_s2 + $0x10] sm:$0xff] }
 0x13d   :  { %4632 = vmatpush3.msra.mxu0 %v7310_v2  ;;  %1690 = vrot.lane.b32.xlu1 %v1679_v62, %s5869_s21  ;;  %11117 = vst [vmem:[#allocation26_spill] sm:$0xff] %v7317_v54  ;;  %v7329_v2 = vld [vmem:[%s10612_s2 + $0x88] sm:$0xff]  ;;  %v7335_v62 = vld [vmem:[%s10612_s2 + $0x120] sm:$0xff] }
 0x13e   :  { %4603 = vmatpush3.msra.mxu1 %v7317_v54  ;;  %4633 = vmatprep.subr.mxu0 %v7323_v53  ;;  %11119 = vst [vmem:[#allocation30_spill] sm:$0xff] %v7329_v2  ;;  %11120 = vst [vmem:[#allocation32_spill] sm:$0xff] %v7335_v62  ;;  %v7351_v53 = vld [vmem:[%s10612_s2 + $0x198] sm:$0xff] }
 0x13f   :  { %4604 = vmatprep.subr.mxu1 %v7329_v2  ;;  %4634 = vmatpush3.msra.mxu0 %v7335_v62  ;;  %11123 = vst [vmem:[#allocation35_spill] sm:$0xff] %v7351_v53  ;;  %v1117_v62 = vsel %vm1115_vm9, %v5430_v30, %v11124_v33  ;;  %v1663_v33 = vcombine.high %v6943_v24, %v6943_v24 }
 0x140   :  { %4605 = vmatpush3.msra.mxu1 %v7345_v61  ;;  %4635 = vmatprep.subr.mxu0 %v7351_v53  ;;  %v7373_v53 = vpop.permute.xlu1 %5433  ;;  %v5462_v24 = vpack.i.bf16 %v7340_v60, %v1950_v28  ;;  %v7409_v28 = vld [vmem:[%s10612_s2 + $0x108] sm:$0xff] }
 0x141   :  { %4606 = vmatprep.subr.mxu1 %v7362_v45  ;;  %4636 = vmatpush3.msra.mxu0 %v7368_v23  ;;  %v7386_v23 = vld [vmem:[%s10612_s2 + $0x190] sm:$0xff]  ;;  %v5435_v30 = vunpack.i.l.bf16 %v7373_v53  ;;  %v11128_v60 = vunpack.i.h.bf16 %v7373_v53 }
 0x142   :  { %5458 = vrot.lane.b32.xlu1 %v5457_v37, %s5870_s13  ;;  %4607 = vmatpush3.msra.mxu1 %v7379_v48  ;;  %v7393_v37 = vld [vmem:[%s10612_s2 + $0x110] sm:$0xff] }
 0x143   :  { %1192 = vmatprep.mubr.f32.mxu1 %v1117_v62  ;;  %4637 = vmatprep.subr.mxu0 %v7386_v23  ;;  %11127 = vst [vmem:[#allocation37_spill] sm:$0xff] %v7393_v37  ;;  %v7401_v62 = vld [vmem:[%s10612_s2 + $0x188] sm:$0xff] }
 0x144   :  { %1193 = vmatmul.mubr.f32.vlgmr.msra.gmra.mxu1 %v1116_v47  ;;  %4638 = vmatpush3.msra.mxu0 %v7393_v37  ;;  %v5452_v47 = vpack.i.bf16 %v7206_v56, %v1663_v33  ;;  %v1119_v37 = vsel %vm1115_vm9, %v5435_v30, %v11128_v60  ;;  %v7420_v56 = vld [vmem:[%s10612_s2 + $0x180] sm:$0xff]  ;;  %v11129_v60 = vunpack.i.h.bf16 %v6945_v41 }
 0x145   :  { %1268 = vmatprep.subr.mxu1 %v11034_v12  ;;  %4639 = vmatprep.subr.mxu0 %v7401_v62  ;;  %v2506_v41 = vld [vmem:[%s10610_s0 + $0x5e] sm:$0xff] }
 0x146   :  { %1269 = vmatpush1.msra.mxu1 %v6441_v6  ;;  %4640 = vmatpush3.msra.mxu0 %v7409_v28  ;;  %v7428_v6 = vld [vmem:[%s10612_s2 + $0x100] sm:$0xff]  ;;  %v1118_v33 = vsel %vm1115_vm9, %v11129_v60, %v5435_v30  ;;  %v7481_v60 = vld [vmem:[%s10612_s2 + $0x250] sm:$0xff] }
 0x147   :  { %1270 = vmatprep.subr.mxu1 %v11034_v12  ;;  %5463 = vrot.lane.b32.xlu1 %v5462_v24, %s5870_s13  ;;  %v1951_v24 = vcombine.high %v7305_v14, %v7305_v14  ;;  %11135 = vst [vmem:[#allocation46_spill] sm:$0xff] %v7481_v60 }
 0x148   :  { %4641 = vmatprep.subr.mxu0 %v7420_v56  ;;  %1271 = vmatpush1.msra.mxu1 %v6448_v36  ;;  %v7441_v36 = vld [vmem:[%s10610_s0 + $0x5a] sm:$0x3f] }
 0x149   :  { %5453 = vrot.lane.b32.xlu0 %v5452_v47, %s5869_s21  ;;  %4642 = vmatpush3.msra.mxu0 %v7428_v6  ;;  %11130 = vst [vmem:[#allocation38_spill] sm:$0xff] %v7441_v36  ;;  %v1965_v14 = vrot.slane %v1951_v24, %v11080_v15  ;;  %v7461_v30 = vrot.slane %v7441_v36, %v11080_v15  ;;  %v7471_v47 = vld [vmem:[%s10612_s2 + $0x258] sm:$0xff] }
 0x14a   :  { %1262 = vmatprep.mubr.f32.mxu0 %v1119_v37  ;;  %1272 = vmatprep.subr.mxu1 %v11034_v12  ;;  %v7466_v37 = vrot.slane %v2506_v41, %v11080_v15  ;;  %11134 = vst [vmem:[#allocation44_spill] sm:$0xff] %v7471_v47 }
 0x14b   :  { %1263 = vmatmul.mubr.f32.vlgmr.msra.gmra.mxu0 %v1118_v33  ;;  %1273 = vmatpush1.msra.mxu1 %v6457_v3  ;;  %v7454_v3 = vld [vmem:[%s10612_s2 + $0x260] sm:$0xff]  ;;  %11132 = vst [vmem:[#allocation40_spill] sm:$0xff] %v7461_v30  ;;  %v2253_v33 = vcombine.high %v7461_v30, %v7461_v30 }
 0x14c   :  { %4646 = vmatprep.subr.mxu0 %v6965_v44  ;;  %1274 = vmatprep.subr.mxu1 %v11034_v12  ;;  %11131 = vst [vmem:[#allocation39_spill] sm:$0xff] %v7454_v3  ;;  %11133 = vst [vmem:[#allocation41_spill] sm:$0xff] %v7466_v37  ;;  %v7511_v30 = vld [vmem:[%s10612_s2 + $0x240] sm:$0xff] }
 0x14d   :  { %4647 = vmatpush3.msra.mxu0 %v6972_v17  ;;  %2254 = vrot.lane.b32.xlu1 %v7059_v9, %s5871_s24  ;;  %v2510_v9 = vcombine.high %v2506_v41, %v2506_v41  ;;  %v2525_v41 = vcombine.high %v7466_v37, %v7466_v37  ;;  %v3069_v37 = vld [vmem:[%s10610_s0 + $0x74] sm:$0xff]  ;;  %11137 = vst [vmem:[#allocation51_spill] sm:$0xff] %v7511_v30 }
 0x14e   :  { %1275 = vmatpush1.msra.mxu1 %v7454_v3  ;;  %4648 = vmatprep.subr.mxu0 %v6981_v49  ;;  %v3073_v36 = vcombine.high %v3069_v37, %v3069_v37 }
 0x14f   :  { %1276 = vmatprep.subr.mxu1 %v11034_v12  ;;  %4649 = vmatpush3.msra.mxu0 %v6988_v50  ;;  %v2524_v24 = vrot.slane %v2510_v9, %v11080_v15  ;;  %v2782_v9 = vld [vmem:[%s10610_s0 + $0x68] sm:$0xff] }
 0x150   :  { %1277 = vmatpush1.msra.mxu1 %v7471_v47  ;;  %4650 = vmatprep.subr.mxu0 %v7001_v16 }
 0x151   :  { %1278 = vmatprep.subr.mxu1 %v11034_v12  ;;  %4651 = vmatpush3.msra.mxu0 %v7007_v19  ;;  %v7528_v19 = vld [vmem:[%s10612_s2 + $0x238] sm:$0xff] }
 0x152   :  { %1979 = vrot.lane.b32.xlu1 %v1965_v14, %s5870_s13  ;;  %1279 = vmatpush1.msra.mxu1 %v7481_v60  ;;  %v7495_v14 = vld [vmem:[%s10612_s2 + $0x248] sm:$0xff]  ;;  %11139 = vst [vmem:[#allocation53_spill] sm:$0xff] %v7528_v19 }
 0x153   :  { %4652 = vmatprep.subr.mxu0 %v7024_v27  ;;  %1280 = vmatprep.subr.mxu1 %v11034_v12  ;;  %11136 = vst [vmem:[#allocation50_spill] sm:$0xff] %v7495_v14  ;;  %v7523_v27 = vrot.slane %v3069_v37, %v11080_v15 }
 0x154   :  { %4653 = vmatpush3.msra.mxu0 %v7037_v63  ;;  %1281 = vmatpush1.msra.mxu1 %v7495_v14  ;;  %v2526_v63 = vcombine.high %v2524_v24, %v2524_v24 }
 0x155   :  { %4654 = vmatprep.subr.mxu0 %v7049_v0  ;;  %1282 = vmatprep.subr.mxu1 %v11034_v12  ;;  %v5477_v0 = vpack.i.bf16 %v2524_v24, %v2525_v41  ;;  %v7535_v24 = vrot.slane %v3073_v36, %v11080_v15  ;;  %v3088_v37 = vcombine.high %v7523_v27, %v7523_v27  ;;  %v7543_v41 = vld [vmem:[%s10612_s2 + $0x230] sm:$0xff] }
 0x156   :  { %4655 = vmatpush3.msra.mxu0 %v7064_v10  ;;  %2264 = vrot.lane.b32.xlu1 %v2253_v33, %s5871_s24  ;;  %v7520_v33 = vld.sshfl [vmem:[%s10610_s0 + $0x66] sm:$0x33 pattern:$0x76325410]  ;;  %v2786_v10 = vcombine.high %v2782_v9, %v2782_v9 }
 0x157   :  { %1283 = vmatpush1.msra.mxu1 %v7511_v30  ;;  %4656 = vmatprep.subr.mxu0 %v7077_v13  ;;  %11138 = vst [vmem:[#allocation52_spill] sm:$0xff] %v7520_v33  ;;  %11140 = vst [vmem:[#allocation54_spill] sm:$0xff] %v7535_v24 }
 0x158   :  { %1284 = vmatprep.subr.mxu1 %v11034_v12  ;;  %4657 = vmatpush3.msra.mxu0 %v7094_v29  ;;  %v7550_v36 = vrot.slane %v2786_v10, %v11080_v15  ;;  %v7572_v10 = vld [vmem:[%s10612_s2 + $0x220] sm:$0xff] }
 0x159   :  { %1285 = vmatpush1.msra.mxu1 %v7528_v19  ;;  %4658 = vmatprep.subr.mxu0 %v7106_v1  ;;  %v5482_v1 = vpack.i.bf16 %v7520_v33, %v2526_v63  ;;  %v2783_v63 = vld [vmem:[%s10610_s0 + $0x70] sm:$0x3f]  ;;  %11143 = vst [vmem:[#allocation57_spill] sm:$0xff] %v7572_v10 }
 0x15a   :  { %1286 = vmatprep.subr.mxu1 %v11034_v12  ;;  %4659 = vmatpush3.msra.mxu0 %v7121_v39  ;;  %11141 = vst [vmem:[#allocation55_spill] sm:$0xff] %v7550_v36  ;;  %v7553_v39 = vpack.i.bf16 %v7535_v24, %v3088_v37  ;;  %v7577_v37 = vrot.slane %v2782_v9, %v11080_v15  ;;  %v7600_v9 = vld [vmem:[%s10612_s2 + $0x210] sm:$0xff] }
 0x15b   :  { %5478 = vrot.lane.b32.xlu1 %v5477_v0, %s5872_s27  ;;  %1287 = vmatpush1.msra.mxu1 %v7543_v41  ;;  %v7559_v0 = vld [vmem:[%s10612_s2 + $0x228] sm:$0xff]  ;;  %v7582_v24 = vrot.slane %v2783_v63, %v11080_v15  ;;  %11147 = vst [vmem:[#allocation61_spill] sm:$0xff] %v7600_v9 }
 0x15c   :  { %4660 = vmatprep.subr.mxu0 %v7133_v7  ;;  %1288 = vmatprep.subr.mxu1 %v11034_v12  ;;  %11142 = vst [vmem:[#allocation56_spill] sm:$0xff] %v7553_v39  ;;  %11144 = vst [vmem:[#allocation58_spill] sm:$0xff] %v7577_v37  ;;  %v2802_v39 = vcombine.high %v7550_v36, %v7550_v36  ;;  %v7606_v36 = vpop.permute.xlu0 %1113 }
 0x15d   :  { %4661 = vmatpush3.msra.mxu0 %v7145_v52  ;;  %1289 = vmatpush1.msra.mxu1 %v7559_v0  ;;  %11145 = vst [vmem:[#allocation59_spill] sm:$0xff] %v7582_v24 }
 0x15e   :  { %4662 = vmatprep.subr.mxu0 %v7157_v32  ;;  %1290 = vmatprep.subr.mxu1 %v11034_v12  ;;  %v5492_v33 = vpack.i.bf16 %v7582_v24, %v2802_v39  ;;  %v3356_v39 = vld [vmem:[%s10610_s0 + $0x80] sm:$0xff] }
 0x15f   :  { %4663 = vmatpush3.msra.mxu0 %v7174_v38  ;;  %5483 = vrot.lane.b32.xlu1 %v5482_v1, %s5872_s27  ;;  %v7589_v1 = vld [vmem:[%s10612_s2 + $0x218] sm:$0xff] }
 0x160   :  { %1291 = vmatpush1.msra.mxu1 %v7572_v10  ;;  %4664 = vmatprep.subr.mxu0 %v7189_v43  ;;  %11146 = vst [vmem:[#allocation60_spill] sm:$0xff] %v7589_v1  ;;  %v1394_v24 = vpop.permute.xlu0 %1393 }
 0x161   :  { %1292 = vmatprep.subr.mxu1 %v11034_v12  ;;  %4665 = vmatpush3.msra.mxu0 %v7201_v51 }
 0x162   :  { %1293 = vmatpush1.msra.mxu1 %v7589_v1  ;;  %4666 = vmatprep.subr.mxu0 %v7217_v20  ;;  %v7615_v20 = vpop.permute.xlu1 %5438 }
 0x163   :  { %1294 = vmatprep.subr.mxu1 %v11034_v12  ;;  %4667 = vmatpush3.msra.mxu0 %v7232_v34  ;;  %v2803_v34 = vcombine.high %v2783_v63, %v2783_v63  ;;  %v7627_v63 = vld [vmem:[%s10612_s2 + $0x200] sm:$0xff] }
 0x164   :  { %2819 = vrot.lane.b32.xlu1 %v7577_v37, %s5873_s12  ;;  %1295 = vmatpush1.msra.mxu1 %v7600_v9  ;;  %v7612_v37 = vld [vmem:[%s10612_s2 + $0x208] sm:$0xff]  ;;  %11149 = vst [vmem:[#allocation63_spill] sm:$0xff] %v7627_v63 }
 0x165   :  { %4668 = vmatprep.subr.mxu0 %v7244_v8  ;;  %1296 = vmatprep.subr.mxu1 %v11034_v12  ;;  %11148 = vst [vmem:[#allocation62_spill] sm:$0xff] %v7612_v37 }
 0x166   :  { %4669 = vmatpush3.msra.mxu0 %v7256_v4  ;;  %1297 = vmatpush1.msra.mxu1 %v7612_v37  ;;  %v7645_v4 = vrot.slane %v3356_v39, %v11080_v15 }
 0x167   :  { %4670 = vmatprep.subr.mxu0 %v7270_v22  ;;  %1298 = vmatprep.subr.mxu1 %v11034_v12  ;;  %v5440_v22 = vunpack.i.l.bf16 %v7615_v20 }
 0x168   :  { %4671 = vmatpush3.msra.mxu0 %v7285_v40  ;;  %5493 = vrot.lane.b32.xlu1 %v5492_v33, %s5873_s12  ;;  %v2817_v40 = vrot.slane %v2803_v34, %v11080_v15  ;;  %v7639_v33 = vld [vmem:[%s10612_s2 + $0x2e0] sm:$0xf]  ;;  %11151 = vst [vmem:[#allocation65_spill] sm:$0xff] %v7645_v4  ;;  %v1664_v34 = vcombine.high %v7163_v35, %v7163_v35 }
 0x169   :  { %1299 = vmatpush1.msra.mxu1 %v7627_v63  ;;  %4672 = vmatprep.subr.mxu0 %v7299_v21  ;;  %11150 = vst [vmem:[#allocation64_spill] sm:$0xff] %v7639_v33  ;;  %v3360_v21 = vcombine.high %v3356_v39, %v3356_v39  ;;  %v11153_v39 = vunpack.i.h.bf16 %v7615_v20  ;;  %v1408_v35 = vsel %vm1407_vm10, %v1394_v24, %v5440_v22  ;;  %v7686_v24 = vld [vmem:[%s10610_s0 + $0x7c] sm:$0x3f] }
 0x16a   :  { %1306 = vmatprep.subr.mxu1 %v11034_v12  ;;  %4673 = vmatpush3.msra.mxu0 %v7317_v54  ;;  %v3645_v54 = vld [vmem:[%s10610_s0 + $0x8c] sm:$0xff]  ;;  %11155 = vst [vmem:[#allocation68_spill] sm:$0xff] %v7686_v24 }
 0x16b   :  { %4329 = vmatpush2.msk.msra.mxu1 %vm271_vm5, %v7639_v33  ;;  %4674 = vmatprep.subr.mxu0 %v7329_v2  ;;  %v7658_v2 = vld [vmem:[%s10612_s2 + $0x2d8] sm:$0xff]  ;;  %v3649_v8 = vcombine.high %v3645_v54, %v3645_v54  ;;  %v3374_v51 = vrot.slane %v3360_v21, %v11080_v15 }
 0x16c   :  { %1308 = vmatprep.subr.mxu1 %v11034_v12  ;;  %4675 = vmatpush3.msra.mxu0 %v7345_v61  ;;  %11152 = vst [vmem:[#allocation66_spill] sm:$0xff] %v7658_v2  ;;  %v1409_v61 = vsel %vm1407_vm10, %v5440_v22, %v11153_v39  ;;  %v3375_v39 = vcombine.high %v7645_v4, %v7645_v4  ;;  %v7720_v4 = vld [vmem:[%s10612_s2 + $0x270] sm:$0xff] }
 0x16d   :  { %2831 = vrot.lane.b32.xlu1 %v2817_v40, %s5873_s12  ;;  %1309 = vmatpush2.msra.mxu1 %v7658_v2  ;;  %v7671_v40 = vld [vmem:[%s10612_s2 + $0x2d0] sm:$0xff]  ;;  %v1678_v22 = vrot.slane %v1664_v34, %v11080_v15  ;;  %v7689_v21 = vrot.slane %v3649_v8, %v11080_v15  ;;  %v7704_v34 = vld [vmem:[%s10612_s2 + $0x2c8] sm:$0xff]  ;;  %11161 = vst [vmem:[#allocation74_spill] sm:$0xff] %v7720_v4 }
 0x16e   :  { %4676 = vmatprep.subr.mxu0 %v7362_v45  ;;  %1310 = vmatprep.subr.mxu1 %v11034_v12  ;;  %11154 = vst [vmem:[#allocation67_spill] sm:$0xff] %v7671_v40  ;;  %v7678_v45 = vrot.slane %v3645_v54, %v11080_v15  ;;  %11158 = vst [vmem:[#allocation71_spill] sm:$0xff] %v7704_v34  ;;  %v5507_v8 = vpack.i.bf16 %v3374_v51, %v3375_v39  ;;  %v7726_v39 = vld [vmem:[%s10612_s2 + $0x2c0] sm:$0xff] }
 0x16f   :  { %4677 = vmatpush3.msra.mxu0 %v7379_v48  ;;  %1311 = vmatpush2.msra.mxu1 %v7671_v40  ;;  %11156 = vst [vmem:[#allocation69_spill] sm:$0xff] %v7689_v21  ;;  %11162 = vst [vmem:[#allocation75_spill] sm:$0xff] %v7726_v39 }
 0x170   :  { %1485 = vmatprep.mubr.f32.mxu0 %v1409_v61  ;;  %1561 = vmatprep.subr.mxu0 %v11034_v12  ;;  %v3664_v54 = vcombine.high %v7678_v45, %v7678_v45  ;;  %v7696_v61 = vld [vmem:[%s10612_s2 + $0x278] sm:$0xff] }
 0x171   :  { %1312 = vmatprep.subr.mxu1 %v11034_v12  ;;  %1486 = vmatmul.mubr.f32.vlgmr.msra.gmra.mxu0 %v1408_v35  ;;  %11157 = vst [vmem:[#allocation70_spill] sm:$0xff] %v7696_v61 }
 0x172   :  { %1562 = vmatpush1.msra.mxu0 %v7696_v61  ;;  %3106 = vrot.lane.b32.xlu1 %v7523_v27, %s5874_s10  ;;  %v7709_v35 = vpack.i.bf16 %v7689_v21, %v3664_v54  ;;  %v7715_v27 = vrot.slane %v7686_v24, %v11080_v15  ;;  %v7737_v54 = vld [vmem:[%s10612_s2 + $0x268] sm:$0xff]  ;;  %v3376_v24 = vcombine.high %v3374_v51, %v3374_v51 }
 0x173   :  { %1313 = vmatpush2.msra.mxu1 %v7704_v34  ;;  %1563 = vmatprep.subr.mxu0 %v11034_v12  ;;  %11163 = vst [vmem:[#allocation76_spill] sm:$0xff] %v7737_v54  ;;  %v7772_v51 = vld [vmem:[%s10612_s2 + $0x2a8] sm:$0xff] }
 0x174   :  { %11159 = vst [vmem:[#allocation72_spill] sm:$0xff] %v7709_v35  ;;  %1692 = vrot.lane.b32.xlu0 %v1678_v22, %s5869_s21  ;;  %1314 = vmatprep.subr.mxu1 %v11034_v12  ;;  %11160 = vst [vmem:[#allocation73_spill] sm:$0xff] %v7715_v27  ;;  %v3357_v22 = vld [vmem:[%s10610_s0 + $0x88] sm:$0x3f]  ;;  %v7744_v35 = vld [vmem:[%s10612_s2 + $0x2b8] sm:$0xff]  ;;  %v3105_v21 = vcombine.high %v7715_v27, %v7715_v27 }
 0x175   :  { %1564 = vmatpush1.msra.mxu0 %v7720_v4  ;;  %1315 = vmatpush2.msra.mxu1 %v7726_v39  ;;  %11164 = vst [vmem:[#allocation77_spill] sm:$0xff] %v7744_v35  ;;  %v7762_v4 = vld [vmem:[%s10612_s2 + $0x2b0] sm:$0xff]  ;;  %11167 = vst [vmem:[#allocation80_spill] sm:$0xff] %v7772_v51  ;;  %v3377_v27 = vcombine.high %v3357_v22, %v3357_v22 }
 0x176   :  { %1565 = vmatprep.subr.mxu0 %v11034_v12  ;;  %1316 = vmatprep.subr.mxu1 %v11034_v12  ;;  %11166 = vst [vmem:[#allocation79_spill] sm:$0xff] %v7762_v4 }
 0x177   :  { %1566 = vmatpush1.msra.mxu0 %v7737_v54  ;;  %5508 = vrot.lane.b32.xlu1 %v5507_v8, %s5875_s23  ;;  %v7754_v8 = vrot.slane %v3357_v22, %v11080_v15  ;;  %v7756_v54 = vpop.f32.mrf.mxu1 }
 0x178   :  { %1317 = vmatpush2.msra.mxu1 %v7744_v35  ;;  %1567 = vmatprep.subr.mxu0 %v11034_v12 }
 0x179   :  { %1967 = vrot.lane.b32.xlu0 %v7221_v46, %s5870_s13  ;;  %1318 = vmatprep.subr.mxu1 %v11034_v12  ;;  %11165 = vst [vmem:[#allocation78_spill] sm:$0xff] %v7754_v8  ;;  %v5512_v46 = vpack.i.bf16 %v7754_v8, %v3376_v24  ;;  %v3921_v24 = vld [vmem:[%s10610_s0 + $0x96] sm:$0xff] }
 0x17a   :  { %1568 = vmatpush1.msra.mxu0 %v7454_v3  ;;  %1319 = vmatpush2.msra.mxu1 %v7762_v4  ;;  %v4399_v3 = vpop.f32.mrf.mxu1  ;;  %v7797_v8 = vld [vmem:[%s10612_s2 + $0x298] sm:$0xff]  ;;  %v7811_v61 = vrot.slane %v3921_v24, %v11080_v15 }
 0x17b   :  { %1569 = vmatprep.subr.mxu0 %v11034_v12  ;;  %1320 = vmatprep.subr.mxu1 %v11034_v12  ;;  %11169 = vst [vmem:[#allocation82_spill] sm:$0xff] %v7797_v8 }
 0x17c   :  { %1570 = vmatpush1.msra.mxu0 %v7471_v47  ;;  %3116 = vrot.lane.b32.xlu1 %v3105_v21, %s5874_s10  ;;  %v7782_v21 = vld [vmem:[%s10612_s2 + $0x2a0] sm:$0xff]  ;;  %v4016_v47 = vcombine.high %v3921_v24, %v3921_v24  ;;  %11170 = vst [vmem:[#allocation83_spill] sm:$0xff] %v7811_v61  ;;  %v4031_v24 = vcombine.high %v7811_v61, %v7811_v61 }
 0x17d   :  { %1321 = vmatpush2.msra.mxu1 %v7772_v51  ;;  %1571 = vmatprep.subr.mxu0 %v11034_v12  ;;  %11168 = vst [vmem:[#allocation81_spill] sm:$0xff] %v7782_v21  ;;  %v4400_v61 = vadd.f32 %v4399_v3, %v7756_v54 }
 0x17e   :  { %1322 = vmatprep.subr.mxu1 %v11034_v12  ;;  %1572 = vmatpush1.msra.mxu0 %v7481_v60  ;;  %v3391_v60 = vrot.slane %v3377_v27, %v11080_v15  ;;  %v7827_v27 = vrot.slane %v4016_v47, %v11080_v15  ;;  %v4433_v47 = vpop.f32.mrf.mxu0 }
 0x17f   :  { %1323 = vmatpush2.msra.mxu1 %v7782_v21  ;;  %1573 = vmatprep.subr.mxu0 %v11034_v12 }
 0x180   :  { %1324 = vmatprep.subr.mxu1 %v11034_v12  ;;  %1574 = vmatpush1.msra.mxu0 %v7495_v14  ;;  %v7791_v22 = vpop.f32.mrf.mxu1  ;;  %11171 = vst [vmem:[#allocation84_spill] sm:$0xff] %v7827_v27 }
 0x181   :  { %5513 = vrot.lane.b32.xlu1 %v5512_v46, %s5875_s23  ;;  %1325 = vmatpush2.msra.mxu1 %v7797_v8  ;;  %v7807_v46 = vld [vmem:[%s10612_s2 + $0x290] sm:$0xff] }
 0x182   :  { %1575 = vmatprep.subr.mxu0 %v11034_v12  ;;  %1326 = vmatprep.subr.mxu1 %v11034_v12  ;;  %v483_v14 = vpop.f32.mrf.mxu1 }
 0x183   :  { %1576 = vmatpush1.msra.mxu0 %v7511_v30  ;;  %1327 = vmatpush2.msra.mxu1 %v7807_v46  ;;  %v7820_v14 = vld [vmem:[%s10612_s2 + $0x288] sm:$0xff]  ;;  %v7838_v30 = vld [vmem:[%s10612_s2 + $0x280] sm:$0xff] }
 0x184   :  { %1577 = vmatprep.subr.mxu0 %v11034_v12  ;;  %1328 = vmatprep.subr.mxu1 %v11034_v12 }
 0x185   :  { %1578 = vmatpush1.msra.mxu0 %v7528_v19  ;;  %3405 = vrot.lane.b32.xlu1 %v3391_v60, %s5875_s23  ;;  %v11172_v60 = vunpack.i.h.bf16 %v7373_v53  ;;  %v5527_v53 = vpack.i.bf16 %v7827_v27, %v4031_v24 }
 0x186   :  { %1329 = vmatpush2.msra.mxu1 %v7820_v14  ;;  %1579 = vmatprep.subr.mxu0 %v11034_v12 }
 0x187   :  { %1330 = vmatprep.subr.mxu1 %v11034_v12  ;;  %1580 = vmatpush1.msra.mxu0 %v7543_v41  ;;  %v1120_v19 = vsel %vm1115_vm9, %v11172_v60, %v7606_v36  ;;  %vm1353_vm9 = vcmask 175106  }
 0x188   :  { %1331 = vmatpush2.msra.mxu1 %v7838_v30  ;;  %4330 = vmatprep.mubr.msk.f32.mxu1 %vm268_vm6, %v7606_v36  ;;  %v4434_v36 = vpop.f32.mrf.mxu0 }
 0x189   :  { %1581 = vmatprep.subr.mxu0 %v11034_v12  ;;  %1333 = vmatmul.mubr.f32.vlgmr.msra.gmra.mxu1 %v1120_v19  ;;  %v7855_v19 = vld.sshfl [vmem:[%s10610_s0 + $0x94] sm:$0x33 pattern:$0x76325410]  ;;  %v4435_v60 = vadd.f32 %v4434_v36, %v4433_v47  ;;  %v11177_v36 = vld [vmem:[#allocation11_spill] sm:$0xff] }
 0x18a   :  { %4681 = vmatprep.subr.mxu1 %v7013_v59  ;;  %1582 = vmatpush1.msra.mxu0 %v7559_v0  ;;  %11173 = vst [vmem:[#allocation85_spill] sm:$0xff] %v7855_v19  ;;  %v3673_v24 = vcombine.high %v7855_v19, %v7855_v19  ;;  %v11176_v47 = vld [vmem:[#allocation10_spill] sm:$0xff]  ;;  %v11190_v19 = vld [vmem:[#allocation36_spill] sm:$0xff] }
 0x18b   :  { %3674 = vrot.lane.b32.xlu1 %v7678_v45, %s5876_s19  ;;  %4682 = vmatpush3.msra.mxu1 %v7030_v31  ;;  %v7862_v45 = vld [vmem:[%s10610_s0 + $0x9e] sm:$0x3f]  ;;  %v412_v3 = vadd.f32 %v4435_v60, %v4400_v61  ;;  %v11178_v61 = vld [vmem:[#allocation13_spill] sm:$0xff]  ;;  %s5878_s0 = smov 22  }
 0x18c   :  { %1583 = vmatprep.subr.mxu0 %v11034_v12  ;;  %4683 = vmatprep.subr.mxu1 %v7043_v58  ;;  %11174 = vst [vmem:[#allocation86_spill] sm:$0xff] %v7862_v45  ;;  %v7875_v27 = vrot.slane %v7862_v45, %v11080_v15  ;;  %v11179_v60 = vld [vmem:[#allocation17_spill] sm:$0xff] }
 0x18d   :  { %1584 = vmatpush1.msra.mxu0 %v7572_v10  ;;  %4684 = vmatpush3.msra.mxu1 %v7055_v5  ;;  %v11182_v45 = vld [vmem:[#allocation29_spill] sm:$0xff] }
 0x18e   :  { %1585 = vmatprep.subr.mxu0 %v11034_v12  ;;  %4685 = vmatprep.subr.mxu1 %v7070_v11  ;;  %11175 = vst [vmem:[#allocation87_spill] sm:$0xff] %v7875_v27  ;;  %v4048_v54 = vcombine.high %v7875_v27, %v7875_v27  ;;  %v11185_v27 = vld [vmem:[#allocation20_spill] sm:$0xff] }
 0x18f   :  { %1586 = vmatpush1.msra.mxu0 %v7589_v1  ;;  %5528 = vrot.lane.b32.xlu1 %v5527_v53, %s5877_s26  ;;  %v482_v53 = vadd.f32 %v7791_v22, %v412_v3  ;;  %v11180_v22 = vld [vmem:[#allocation21_spill] sm:$0xff] }
 0x190   :  { %4686 = vmatpush3.msra.mxu1 %v7088_v25  ;;  %1587 = vmatprep.subr.mxu0 %v11034_v12  ;;  %v11181_v3 = vld [vmem:[#allocation25_spill] sm:$0xff] }
 0x191   :  { %4687 = vmatprep.subr.mxu1 %v7100_v42  ;;  %1588 = vmatpush1.msra.mxu0 %v7600_v9 }
 0x192   :  { %4688 = vmatpush3.msra.mxu1 %v7115_v26  ;;  %1589 = vmatprep.subr.mxu0 %v11034_v12 }
 0x193   :  { %4689 = vmatprep.subr.mxu1 %v7127_v57  ;;  %1590 = vmatpush1.msra.mxu0 %v7612_v37  ;;  %v7930_v9 = vpop.permute.xlu0 %5448 }
 0x194   :  { %3684 = vrot.lane.b32.xlu1 %v3673_v24, %s5876_s19  ;;  %4690 = vmatpush3.msra.mxu1 %v7139_v55  ;;  %v492_v24 = vrot.slane %v482_v53, %v11080_v15  ;;  %v11184_v53 = vld [vmem:[#allocation16_spill] sm:$0xff] }
 0x195   :  { %1591 = vmatprep.subr.mxu0 %v11034_v12  ;;  %4691 = vmatprep.subr.mxu1 %v7151_v18 }
 0x196   :  { %1592 = vmatpush1.msra.mxu0 %v7627_v63  ;;  %4692 = vmatpush3.msra.mxu1 %v11176_v47 }
 0x197   :  { %1599 = vmatprep.subr.mxu0 %v11034_v12  ;;  %4693 = vmatprep.subr.mxu1 %v11177_v36 }
 0x198   :  { %4331 = vmatpush2.msk.msra.mxu0 %vm271_vm5, %v7639_v33  ;;  %4059 = vrot.lane.b32.xlu1 %v4048_v54, %s5877_s26  ;;  %v11183_v54 = vld [vmem:[#allocation12_spill] sm:$0xff] }
 0x199   :  { %4694 = vmatpush3.msra.mxu1 %v11178_v61  ;;  %1601 = vmatprep.subr.mxu0 %v11034_v12  ;;  %v11187_v33 = vld [vmem:[#allocation28_spill] sm:$0xff]  ;;  %v1404_v1 = vpop.permute.xlu0 %1403 }
 0x19a   :  { %4695 = vmatprep.subr.mxu1 %v11179_v60  ;;  %1602 = vmatpush2.msra.mxu0 %v7658_v2  ;;  %v5444_v2 = vpop.permute.xlu1 %5443 }
 0x19b   :  { %4696 = vmatpush3.msra.mxu1 %v11180_v22  ;;  %1603 = vmatprep.subr.mxu0 %v11034_v12  ;;  %v5446_v63 = vunpack.i.h.bf16 %v5444_v2  ;;  %v5445_v37 = vunpack.i.l.bf16 %v5444_v2 }
 0x19c   :  { %4697 = vmatprep.subr.mxu1 %v11181_v3  ;;  %1604 = vmatpush2.msra.mxu0 %v7671_v40  ;;  %v11186_v40 = vld [vmem:[#allocation24_spill] sm:$0xff] }
 0x19d   :  { %4698 = vmatpush3.msra.mxu1 %v11182_v45  ;;  %1605 = vmatprep.subr.mxu0 %v11034_v12 }
 0x19e   :  { %493 = vrot.lane.b32.xlu1 %v492_v24, %s5878_s0  ;;  %4699 = vmatprep.subr.mxu1 %v11183_v54  ;;  %v11188_v24 = vld [vmem:[#allocation32_spill] sm:$0xff] }
 0x19f   :  { %1606 = vmatpush2.msra.mxu0 %v7704_v34  ;;  %4700 = vmatpush3.msra.mxu1 %v11184_v53  ;;  %v11189_v34 = vld [vmem:[#allocation35_spill] sm:$0xff] }
 0x1a0   :  { %1607 = vmatprep.subr.mxu0 %v11034_v12  ;;  %4701 = vmatprep.subr.mxu1 %v11185_v27 }
 0x1a1   :  { %1608 = vmatpush2.msra.mxu0 %v7726_v39  ;;  %4702 = vmatpush3.msra.mxu1 %v11186_v40  ;;  %v7924_v39 = vpop.permute.xlu1 %1680 }
 0x1a2   :  { %1609 = vmatprep.subr.mxu0 %v11034_v12  ;;  %4703 = vmatprep.subr.mxu1 %v11187_v33 }
 0x1a3   :  { %1610 = vmatpush2.msra.mxu0 %v7744_v35  ;;  %4704 = vmatpush3.msra.mxu1 %v11188_v24  ;;  %v11191_v35 = vld [vmem:[#allocation37_spill] sm:$0xff] }
 0x1a4   :  { %1611 = vmatprep.subr.mxu0 %v11034_v12  ;;  %4705 = vmatprep.subr.mxu1 %v11189_v34 }
 0x1a5   :  { %1612 = vmatpush2.msra.mxu0 %v7762_v4  ;;  %4706 = vmatpush3.msra.mxu1 %v11190_v19  ;;  %v1411_v4 = vsel %vm1407_vm10, %v5445_v37, %v5446_v63  ;;  %v1406_v2 = vpop.permute.xlu1 %1405 }
 0x1a6   :  { %1613 = vmatprep.subr.mxu0 %v11034_v12  ;;  %4707 = vmatprep.subr.mxu1 %v7386_v23 }
 0x1a7   :  { %1614 = vmatpush2.msra.mxu0 %v7772_v51  ;;  %4708 = vmatpush3.msra.mxu1 %v11191_v35  ;;  %v11192_v51 = vunpack.i.h.bf16 %v7615_v20 }
 0x1a8   :  { %1615 = vmatprep.subr.mxu0 %v11034_v12  ;;  %4709 = vmatprep.subr.mxu1 %v7401_v62 }
 0x1a9   :  { %1616 = vmatpush2.msra.mxu0 %v7782_v21  ;;  %4710 = vmatpush3.msra.mxu1 %v7409_v28  ;;  %v1410_v21 = vsel %vm1407_vm10, %v11192_v51, %v5445_v37  ;;  %v11195_v37 = vld [vmem:[#allocation42_spill] sm:$0xff] }
 0x1aa   :  { %1617 = vmatprep.subr.mxu0 %v11034_v12  ;;  %4711 = vmatprep.subr.mxu1 %v7420_v56 }
 0x1ab   :  { %1618 = vmatpush2.msra.mxu0 %v7797_v8  ;;  %4712 = vmatpush3.msra.mxu1 %v7428_v6  ;;  %v11193_v8 = vld [vmem:[#allocation8_spill] sm:$0xff] }
 0x1ac   :  { %1555 = vmatprep.mubr.f32.mxu1 %v1411_v4  ;;  %1619 = vmatprep.subr.mxu0 %v11034_v12  ;;  %v1413_v4 = vsel %vm1407_vm10, %v1404_v1, %v1406_v2 }
 0x1ad   :  { %1556 = vmatmul.mubr.f32.vlgmr.msra.gmra.mxu1 %v1410_v21  ;;  %1620 = vmatpush2.msra.mxu0 %v7807_v46 }
 0x1ae   :  { %4716 = vmatprep.subr.mxu1 %v6965_v44  ;;  %1621 = vmatprep.subr.mxu0 %v11034_v12  ;;  %v11194_v44 = vld [vmem:[#allocation33_spill] sm:$0xff] }
 0x1af   :  { %4717 = vmatpush3.msra.mxu1 %v6972_v17  ;;  %5468 = vrot.lane.b32.xlu0 %v11193_v8, %s5871_s24  ;;  %v7952_v10 = vpop.permute.xlu1 %1690  ;;  %v1966_v20 = vcombine.high %v11194_v44, %v11194_v44  ;;  %v1412_v17 = vsel %vm1407_vm10, %v5446_v63, %v1404_v1  ;;  %v11197_v1 = vld [vmem:[#allocation45_spill] sm:$0xff]  ;;  %v11198_v63 = vld [vmem:[#allocation47_spill] sm:$0xff]  ;;  %v11200_v8 = vld [vmem:[#allocation6_spill] sm:$0xff]  ;;  %v5451_v44 = vunpack.i.h.bf16 %v7930_v9  ;;  %vm1349_vm10 = vcmask 965632  }
 0x1b0   :  { %1622 = vmatpush2.msra.mxu0 %v7820_v14  ;;  %4718 = vmatprep.subr.mxu1 %v6981_v49 }
 0x1b1   :  { %1623 = vmatprep.subr.mxu0 %v11034_v12  ;;  %4719 = vmatpush3.msra.mxu1 %v6988_v50  ;;  %v11196_v50 = vld [vmem:[#allocation43_spill] sm:$0xff] }
 0x1b2   :  { %1624 = vmatpush2.msra.mxu0 %v7838_v30  ;;  %4332 = vmatprep.mubr.msk.f32.mxu0 %vm268_vm6, %v1413_v4 }
 0x1b3   :  { %4720 = vmatprep.subr.mxu1 %v7001_v16  ;;  %1626 = vmatmul.mubr.f32.vlgmr.msra.gmra.mxu0 %v1412_v17  ;;  %v11199_v16 = vld [vmem:[#allocation48_spill] sm:$0xff]  ;;  %v11215_v17 = vld [vmem:[#allocation18_spill] sm:$0xff] }
 0x1b4   :  { %4721 = vmatpush3.msra.mxu1 %v11195_v37  ;;  %4751 = vmatprep.subr.mxu0 %v7013_v59  ;;  %v7966_v49 = vpop.permute.xlu1 %5458  ;;  %v2237_v59 = vcombine.high %v11200_v8, %v11200_v8 }
 0x1b5   :  { %1977 = vrot.lane.b32.xlu0 %v1966_v20, %s5870_s13  ;;  %4722 = vmatprep.subr.mxu1 %v11196_v50  ;;  %v5450_v20 = vunpack.i.l.bf16 %v7930_v9 }
 0x1b6   :  { %4752 = vmatpush3.msra.mxu0 %v7030_v31  ;;  %4723 = vmatpush3.msra.mxu1 %v11197_v1  ;;  %v11201_v31 = vld [vmem:[#allocation7_spill] sm:$0xff]  ;;  %v11218_v1 = vld [vmem:[#allocation26_spill] sm:$0xff] }
 0x1b7   :  { %4753 = vmatprep.subr.mxu0 %v7043_v58  ;;  %4724 = vmatprep.subr.mxu1 %v11198_v63  ;;  %v11202_v58 = vld [vmem:[#allocation9_spill] sm:$0xff]  ;;  %v1696_v63 = vsel %vm1694_vm11, %v5450_v20, %v5451_v44 }
 0x1b8   :  { %4754 = vmatpush3.msra.mxu0 %v7055_v5  ;;  %4725 = vmatpush3.msra.mxu1 %v11199_v16  ;;  %v11203_v5 = vld [vmem:[#allocation40_spill] sm:$0xff]  ;;  %v11222_v16 = vld [vmem:[#allocation49_spill] sm:$0xff] }
 0x1b9   :  { %4755 = vmatprep.subr.mxu0 %v7070_v11  ;;  %4726 = vmatprep.subr.mxu1 %v7077_v13  ;;  %v7980_v51 = vpop.permute.xlu1 %5463  ;;  %v5472_v21 = vpack.i.bf16 %v11203_v5, %v2237_v59  ;;  %v11204_v11 = vld [vmem:[#allocation38_spill] sm:$0xff] }
 0x1ba   :  { %4756 = vmatpush3.msra.mxu0 %v7088_v25  ;;  %4727 = vmatpush3.msra.mxu1 %v7094_v29  ;;  %v2238_v13 = vcombine.high %v11204_v11, %v11204_v11 }
 0x1bb   :  { %4757 = vmatprep.subr.mxu0 %v7100_v42  ;;  %4728 = vmatprep.subr.mxu1 %v11201_v31  ;;  %v7989_v2 = vpop.permute.xlu0 %5453 }
 0x1bc   :  { %4758 = vmatpush3.msra.mxu0 %v7115_v26  ;;  %4729 = vmatpush3.msra.mxu1 %v11202_v58  ;;  %v5456_v25 = vunpack.i.h.bf16 %v7989_v2  ;;  %v5455_v31 = vunpack.i.l.bf16 %v7989_v2 }
 0x1bd   :  { %4759 = vmatprep.subr.mxu0 %v7127_v57  ;;  %4730 = vmatprep.subr.mxu1 %v7133_v7  ;;  %v7996_v29 = vpop.f32.mrf.mxu1  ;;  %v2252_v7 = vrot.slane %v2238_v13, %v11080_v15 }
 0x1be   :  { %4760 = vmatpush3.msra.mxu0 %v7139_v55  ;;  %4731 = vmatpush3.msra.mxu1 %v7145_v52  ;;  %v8008_v57 = vsel %vm1694_vm11, %v5456_v25, %v7952_v10  ;;  %v11206_v55 = vld [vmem:[#allocation15_spill] sm:$0xff]  ;;  %v4468_v52 = vpop.f32.mrf.mxu0 }
 0x1bf   :  { %4761 = vmatprep.subr.mxu0 %v7151_v18  ;;  %4732 = vmatprep.subr.mxu1 %v7157_v32  ;;  %v8002_v42 = vpop.permute.xlu1 %2254  ;;  %v771_v26 = vpop.f32.mrf.mxu1  ;;  %v11207_v18 = vld [vmem:[#allocation19_spill] sm:$0xff] }
 0x1c0   :  { %11205 = vst [vmem:[#allocation10_spill] sm:$0xff] %v8002_v42  ;;  %4762 = vmatpush3.msra.mxu0 %v11176_v47  ;;  %5473 = vrot.lane.b32.xlu0 %v5472_v21, %s5871_s24  ;;  %v11210_v47 = vld [vmem:[#allocation58_spill] sm:$0xff]  ;;  %v1697_v21 = vsel %vm1694_vm11, %v5451_v44, %v5455_v31  ;;  %v8153_v44 = vld [vmem:[%s10612_s2 + $0x60] sm:$0xff] }
 0x1c1   :  { %4733 = vmatpush3.msra.mxu1 %v7174_v38  ;;  %4763 = vmatprep.subr.mxu0 %v11177_v36  ;;  %v11208_v38 = vld [vmem:[#allocation23_spill] sm:$0xff]  ;;  %v2801_v36 = vcombine.high %v11210_v47, %v11210_v47  ;;  %v8109_v26 = vld [vmem:[%s10612_s2 + $0xf0] sm:$0xff] }
 0x1c2   :  { %4734 = vmatprep.subr.mxu1 %v7189_v43  ;;  %4764 = vmatpush3.msra.mxu0 %v11178_v61  ;;  %v11209_v43 = vld [vmem:[#allocation27_spill] sm:$0xff] }
 0x1c3   :  { %4735 = vmatpush3.msra.mxu1 %v11206_v55  ;;  %4765 = vmatprep.subr.mxu0 %v11179_v60  ;;  %v11211_v61 = vld [vmem:[#allocation31_spill] sm:$0xff]  ;;  %v4469_v60 = vpop.f32.mrf.mxu0  ;;  %v8117_v55 = vld [vmem:[%s10612_s2 + $0x70] sm:$0xff] }
 0x1c4   :  { %4736 = vmatprep.subr.mxu1 %v11207_v18  ;;  %4766 = vmatpush3.msra.mxu0 %v11180_v22  ;;  %v8021_v32 = vpop.permute.xlu1 %1979  ;;  %v11212_v22 = vld [vmem:[#allocation14_spill] sm:$0xff]  ;;  %v11233_v18 = vld [vmem:[#allocation44_spill] sm:$0xff]  ;;  %v11270_v42 = vld [vmem:[#allocation67_spill] sm:$0xff] }
 0x1c5   :  { %2266 = vrot.lane.b32.xlu0 %v2252_v7, %s5871_s24  ;;  %4737 = vmatpush3.msra.mxu1 %v11208_v38  ;;  %v4503_v50 = vpop.f32.mrf.mxu0  ;;  %v8126_v38 = vld [vmem:[%s10612_s2 + $0xe8] sm:$0xff] }
 0x1c6   :  { %4767 = vmatprep.subr.mxu0 %v11181_v3  ;;  %4738 = vmatprep.subr.mxu1 %v11209_v43  ;;  %v11214_v3 = vld [vmem:[#allocation41_spill] sm:$0xff] }
 0x1c7   :  { %4768 = vmatpush3.msra.mxu0 %v11182_v45  ;;  %4739 = vmatpush3.msra.mxu1 %v11211_v61  ;;  %v11216_v45 = vld [vmem:[#allocation55_spill] sm:$0xff]  ;;  %v4504_v59 = vpop.f32.mrf.mxu0  ;;  %v11234_v43 = vld [vmem:[#allocation73_spill] sm:$0xff] }
 0x1c8   :  { %4769 = vmatprep.subr.mxu0 %v11183_v54  ;;  %4740 = vmatprep.subr.mxu1 %v11212_v22  ;;  %v8033_v4 = vpop.permute.xlu1 %2264  ;;  %v5487_v37 = vpack.i.bf16 %v11216_v45, %v2801_v36  ;;  %v11217_v54 = vld [vmem:[#allocation22_spill] sm:$0xff]  ;;  %v8134_v36 = vld [vmem:[%s10612_s2 + $0x68] sm:$0xff] }
 0x1c9   :  { %11213 = vst [vmem:[#allocation11_spill] sm:$0xff] %v8033_v4  ;;  %4770 = vmatpush3.msra.mxu0 %v11184_v53  ;;  %2535 = vrot.lane.b32.xlu0 %v11214_v3, %s5872_s27  ;;  %v11219_v53 = vld [vmem:[#allocation30_spill] sm:$0xff]  ;;  %v8137_v61 = vpop.f32.mrf.mxu0  ;;  %v8145_v3 = vld [vmem:[%s10612_s2 + $0xe0] sm:$0xff] }
 0x1ca   :  { %4741 = vmatpush3.msra.mxu1 %v11215_v17  ;;  %4771 = vmatprep.subr.mxu0 %v11185_v27  ;;  %v11221_v27 = vld [vmem:[#allocation34_spill] sm:$0xff]  ;;  %v11238_v45 = vld [vmem:[#allocation68_spill] sm:$0xff] }
 0x1cb   :  { %4742 = vmatprep.subr.mxu1 %v11217_v54  ;;  %4772 = vmatpush3.msra.mxu0 %v11186_v40  ;;  %v1695_v40 = vsel %vm1694_vm11, %v7924_v39, %v5450_v20  ;;  %v4505_v39 = vadd.f32 %v4504_v59, %v4503_v50  ;;  %v11236_v22 = vld [vmem:[#allocation46_spill] sm:$0xff]  ;;  %v8166_v54 = vpop.f32.mrf.mxu0  ;;  %v8362_v4 = vld [vmem:[%s10612_s2] sm:$0xff] }
 0x1cc   :  { %4743 = vmatpush3.msra.mxu1 %v11218_v1  ;;  %4773 = vmatprep.subr.mxu0 %v11187_v33  ;;  %v11223_v33 = vld [vmem:[#allocation52_spill] sm:$0xff]  ;;  %v11237_v20 = vld [vmem:[#allocation50_spill] sm:$0xff]  ;;  %11267 = vst [vmem:[#allocation42_spill] sm:$0xff] %v8362_v4 }
 0x1cd   :  { %4744 = vmatprep.subr.mxu1 %v11219_v53  ;;  %4774 = vmatpush3.msra.mxu0 %v11188_v24  ;;  %v8049_v9 = vpop.permute.xlu1 %5478  ;;  %v2534_v8 = vcombine.high %v11223_v33, %v11223_v33  ;;  %v8161_v17 = vld [vmem:[%s10612_s2 + $0xd8] sm:$0xff]  ;;  %v11242_v33 = vld [vmem:[#allocation53_spill] sm:$0xff] }
 0x1ce   :  { %11220 = vst [vmem:[#allocation13_spill] sm:$0xff] %v8049_v9  ;;  %5488 = vrot.lane.b32.xlu0 %v5487_v37, %s5873_s12  ;;  %4745 = vmatpush3.msra.mxu1 %v11221_v27  ;;  %v3090_v37 = vcombine.high %v11238_v45, %v11238_v45  ;;  %v8172_v50 = vld [vmem:[%s10612_s2 + $0x58] sm:$0xff]  ;;  %v8181_v27 = vld [vmem:[%s10612_s2 + $0xd0] sm:$0xff]  ;;  %v8289_v45 = vld [vmem:[%s10612_s2 + $0x20] sm:$0xff] }
 0x1cf   :  { %4775 = vmatprep.subr.mxu0 %v11189_v34  ;;  %4746 = vmatprep.subr.mxu1 %v11222_v16  ;;  %v4470_v34 = vadd.f32 %v4469_v60, %v4468_v52  ;;  %v11232_v52 = vld [vmem:[#allocation56_spill] sm:$0xff]  ;;  %v11240_v53 = vld [vmem:[#allocation51_spill] sm:$0xff]  ;;  %v11241_v16 = vld [vmem:[#allocation65_spill] sm:$0xff] }
 0x1d0   :  { %4776 = vmatpush3.msra.mxu0 %v11190_v19  ;;  %4747 = vmatpush3.msra.mxu1 %v7379_v48  ;;  %v11225_v19 = vld [vmem:[#allocation70_spill] sm:$0xff]  ;;  %v11226_v48 = vld [vmem:[#allocation59_spill] sm:$0xff] }
 0x1d1   :  { %1772 = vmatprep.mubr.f32.mxu1 %v1696_v63  ;;  %4777 = vmatprep.subr.mxu0 %v7386_v23  ;;  %v8063_v24 = vpop.permute.xlu1 %5483  ;;  %v1698_v23 = vsel %vm1694_vm11, %v5455_v31, %v5456_v25  ;;  %v2818_v58 = vcombine.high %v11226_v48, %v11226_v48  ;;  %v8102_v25 = vld [vmem:[%s10612_s2 + $0x78] sm:$0xff]  ;;  %v8200_v31 = vld [vmem:[%s10612_s2 + $0xc8] sm:$0xff]  ;;  %v8223_v48 = vld [vmem:[%s10612_s2 + $0x40] sm:$0xff] }
 0x1d2   :  { %11224 = vst [vmem:[#allocation17_spill] sm:$0xff] %v8063_v24  ;;  %1773 = vmatmul.mubr.f32.vlgmr.msra.gmra.mxu1 %v1695_v40  ;;  %4778 = vmatpush3.msra.mxu0 %v11191_v35  ;;  %v11227_v35 = vld [vmem:[#allocation74_spill] sm:$0xff] }
 0x1d3   :  { %1848 = vmatprep.subr.mxu1 %v11034_v12  ;;  %2545 = vrot.lane.b32.xlu0 %v2534_v8, %s5872_s27  ;;  %v8190_v40 = vld [vmem:[%s10612_s2 + $0x50] sm:$0xff]  ;;  %v3104_v8 = vrot.slane %v3090_v37, %v11080_v15  ;;  %v11251_v37 = vld [vmem:[#allocation72_spill] sm:$0xff] }
 0x1d4   :  { %4779 = vmatprep.subr.mxu0 %v7401_v62  ;;  %1849 = vmatpush1.msra.mxu1 %v11225_v19  ;;  %v700_v62 = vadd.f32 %v4505_v39, %v4470_v34  ;;  %v8207_v34 = vld [vmem:[%s10612_s2 + $0x48] sm:$0xff] }
 0x1d5   :  { %4780 = vmatpush3.msra.mxu0 %v7409_v28  ;;  %1850 = vmatprep.subr.mxu1 %v11034_v12  ;;  %v11229_v28 = vld [vmem:[#allocation76_spill] sm:$0xff] }
 0x1d6   :  { %4781 = vmatprep.subr.mxu0 %v7420_v56  ;;  %1851 = vmatpush1.msra.mxu1 %v11227_v35  ;;  %v8080_v5 = vpop.permute.xlu1 %2819  ;;  %v770_v2 = vadd.f32 %v7996_v29, %v700_v62  ;;  %v8091_v56 = vld [vmem:[%s10612_s2 + $0xf8] sm:$0xff] }
 0x1d7   :  { %11228 = vst [vmem:[#allocation21_spill] sm:$0xff] %v8080_v5  ;;  %4782 = vmatpush3.msra.mxu0 %v7428_v6  ;;  %1842 = vmatprep.mubr.f32.mxu0 %v1698_v23  ;;  %v11230_v6 = vld [vmem:[#allocation54_spill] sm:$0xff]  ;;  %v11231_v29 = vld [vmem:[#allocation39_spill] sm:$0xff] }
 0x1d8   :  { %1852 = vmatprep.subr.mxu1 %v11034_v12  ;;  %2829 = vrot.lane.b32.xlu0 %v2818_v58, %s5873_s12  ;;  %v3089_v11 = vcombine.high %v11230_v6, %v11230_v6  ;;  %v780_v7 = vrot.slane %v770_v2, %v11080_v15  ;;  %v8216_v23 = vld [vmem:[%s10612_s2 + $0xc0] sm:$0xff]  ;;  %v11244_v58 = vld [vmem:[#allocation78_spill] sm:$0xff] }
 0x1d9   :  { %1843 = vmatmul.mubr.f32.vlgmr.msra.gmra.mxu0 %v1697_v21  ;;  %1853 = vmatpush1.msra.mxu1 %v11229_v28  ;;  %v3392_v62 = vcombine.high %v11244_v58, %v11244_v58  ;;  %v8240_v21 = vld [vmem:[%s10612_s2 + $0x38] sm:$0xff]  ;;  %v8247_v2 = vld [vmem:[%s10612_s2 + $0xb0] sm:$0xff]  ;;  %v8354_v5 = vld [vmem:[%s10612_s2 + $0x80] sm:$0xff] }
 0x1da   :  { %4786 = vmatprep.subr.mxu0 %v8091_v56  ;;  %1854 = vmatprep.subr.mxu1 %v11034_v12  ;;  %v8097_v13 = vpop.permute.xlu1 %5493  ;;  %v5502_v47 = vpack.i.bf16 %v11234_v43, %v3089_v11  ;;  %v8256_v11 = vld [vmem:[%s10612_s2 + $0x30] sm:$0xff]  ;;  %v8273_v43 = vld [vmem:[%s10612_s2 + $0x28] sm:$0xff]  ;;  %v8308_v58 = vld [vmem:[%s10612_s2 + $0x18] sm:$0xff]  ;;  %11266 = vst [vmem:[#allocation33_spill] sm:$0xff] %v8354_v5 }
 0x1db   :  { %4787 = vmatpush3.msra.mxu0 %v8102_v25  ;;  %1855 = vmatpush1.msra.mxu1 %v11231_v29  ;;  %v11247_v29 = vld [vmem:[#allocation60_spill] sm:$0xff]  ;;  %11255 = vst [vmem:[#allocation28_spill] sm:$0xff] %v8308_v58 }
 0x1dc   :  { %4788 = vmatprep.subr.mxu0 %v8109_v26  ;;  %1856 = vmatprep.subr.mxu1 %v11034_v12 }
 0x1dd   :  { %4789 = vmatpush3.msra.mxu0 %v8117_v55  ;;  %5498 = vrot.lane.b32.xlu0 %v11232_v52, %s5874_s10  ;;  %v11248_v52 = vld [vmem:[#allocation69_spill] sm:$0xff] }
 0x1de   :  { %1857 = vmatpush1.msra.mxu1 %v11233_v18  ;;  %4790 = vmatprep.subr.mxu0 %v8126_v38  ;;  %v3665_v18 = vcombine.high %v11248_v52, %v11248_v52  ;;  %v11256_v52 = vld [vmem:[#allocation63_spill] sm:$0xff] }
 0x1df   :  { %1858 = vmatprep.subr.mxu1 %v11034_v12  ;;  %4791 = vmatpush3.msra.mxu0 %v8134_v36  ;;  %v8139_v60 = vpop.permute.xlu1 %2831 }
 0x1e0   :  { %11235 = vst [vmem:[#allocation25_spill] sm:$0xff] %v8139_v60  ;;  %1859 = vmatpush1.msra.mxu1 %v11236_v22  ;;  %4792 = vmatprep.subr.mxu0 %v8145_v3  ;;  %v8280_v22 = vld [vmem:[%s10612_s2 + $0xa0] sm:$0xff]  ;;  %v11265_v60 = vunpack.i.h.bf16 %v7966_v49 }
 0x1e1   :  { %781 = vrot.lane.b32.xlu1 %v780_v7, %s5879_s1  ;;  %1860 = vmatprep.subr.mxu1 %v11034_v12  ;;  %v8264_v7 = vld [vmem:[%s10612_s2 + $0xa8] sm:$0xff] }
 0x1e2   :  { %4793 = vmatpush3.msra.mxu0 %v8153_v44  ;;  %5503 = vrot.lane.b32.xlu0 %v5502_v47, %s5874_s10  ;;  %v11249_v47 = vld [vmem:[#allocation61_spill] sm:$0xff] }
 0x1e3   :  { %1861 = vmatpush1.msra.mxu1 %v11237_v20  ;;  %4794 = vmatprep.subr.mxu0 %v8161_v17 }
 0x1e4   :  { %1862 = vmatprep.subr.mxu1 %v11034_v12  ;;  %4795 = vmatpush3.msra.mxu0 %v8172_v50  ;;  %v8175_v1 = vpop.permute.xlu1 %3106 }
 0x1e5   :  { %11239 = vst [vmem:[#allocation29_spill] sm:$0xff] %v8175_v1  ;;  %1863 = vmatpush1.msra.mxu1 %v11240_v53  ;;  %4796 = vmatprep.subr.mxu0 %v8181_v27  ;;  %v8184_v63 = vpop.f32.mrf.mxu0 }
 0x1e6   :  { %1864 = vmatprep.subr.mxu1 %v11034_v12  ;;  %4797 = vmatpush3.msra.mxu0 %v8190_v40  ;;  %v8294_v53 = vpop.permute.xlu0 %1692 }
 0x1e7   :  { %3393 = vrot.lane.b32.xlu0 %v11241_v16, %s5875_s23  ;;  %1865 = vmatpush1.msra.mxu1 %v11242_v33  ;;  %v1059_v59 = vpop.f32.mrf.mxu0  ;;  %v11252_v16 = vld [vmem:[#allocation62_spill] sm:$0xff] }
 0x1e8   :  { %4798 = vmatprep.subr.mxu0 %v8200_v31  ;;  %1866 = vmatprep.subr.mxu1 %v11034_v12  ;;  %v8300_v33 = vld [vmem:[%s10612_s2 + $0x98] sm:$0xff] }
 0x1e9   :  { %4799 = vmatpush3.msra.mxu0 %v8207_v34  ;;  %1867 = vmatpush1.msra.mxu1 %v7543_v41  ;;  %v8211_v39 = vpop.permute.xlu1 %5508  ;;  %v8231_v41 = vld [vmem:[%s10612_s2 + $0xb8] sm:$0xff]  ;;  %11253 = vst [vmem:[#allocation24_spill] sm:$0xff] %v8300_v33 }
 0x1ea   :  { %11243 = vst [vmem:[#allocation12_spill] sm:$0xff] %v8211_v39  ;;  %4800 = vmatprep.subr.mxu0 %v8216_v23  ;;  %1868 = vmatprep.subr.mxu1 %v11034_v12 }
 0x1eb   :  { %4801 = vmatpush3.msra.mxu0 %v8223_v48  ;;  %3118 = vrot.lane.b32.xlu0 %v3104_v8, %s5874_s10  ;;  %v11254_v8 = vld [vmem:[#allocation85_spill] sm:$0xff] }
 0x1ec   :  { %1869 = vmatpush1.msra.mxu1 %v7559_v0  ;;  %4802 = vmatprep.subr.mxu0 %v8231_v41  ;;  %v11245_v0 = vld [vmem:[#allocation57_spill] sm:$0xff]  ;;  %v5522_v59 = vpack.i.bf16 %v11254_v8, %v3665_v18 }
 0x1ed   :  { %1870 = vmatprep.subr.mxu1 %v11034_v12  ;;  %4803 = vmatpush3.msra.mxu0 %v8240_v21  ;;  %v8317_v18 = vld [vmem:[%s10612_s2 + $0x90] sm:$0xff]  ;;  %v8335_v8 = vld [vmem:[%s10612_s2 + $0x88] sm:$0xff] }
 0x1ee   :  { %1871 = vmatpush1.msra.mxu1 %v11245_v0  ;;  %4804 = vmatprep.subr.mxu0 %v8247_v2  ;;  %v8250_v6 = vpop.permute.xlu1 %3116  ;;  %11257 = vst [vmem:[#allocation32_spill] sm:$0xff] %v8317_v18  ;;  %11261 = vst [vmem:[#allocation37_spill] sm:$0xff] %v8335_v8 }
 0x1ef   :  { %11246 = vst [vmem:[#allocation16_spill] sm:$0xff] %v8250_v6  ;;  %1872 = vmatprep.subr.mxu1 %v11034_v12  ;;  %4805 = vmatpush3.msra.mxu0 %v8256_v11 }
 0x1f0   :  { %3403 = vrot.lane.b32.xlu0 %v3392_v62, %s5875_s23  ;;  %1873 = vmatpush1.msra.mxu1 %v11247_v29  ;;  %v4573_v62 = vpop.f32.mrf.mxu1  ;;  %v5460_v29 = vunpack.i.l.bf16 %v7966_v49  ;;  %s5880_s23 = smov 86  }
 0x1f1   :  { %4806 = vmatprep.subr.mxu0 %v8264_v7  ;;  %1874 = vmatprep.subr.mxu1 %v11034_v12 }
 0x1f2   :  { %4807 = vmatpush3.msra.mxu0 %v8273_v43  ;;  %1875 = vmatpush1.msra.mxu1 %v11249_v47  ;;  %v4574_v0 = vpop.f32.mrf.mxu1  ;;  %v1983_v1 = vsel %vm1981_vm12, %v5460_v29, %v11265_v60  ;;  %v11268_v60 = vld [vmem:[#allocation83_spill] sm:$0xff] }
 0x1f3   :  { %4808 = vmatprep.subr.mxu0 %v8280_v22  ;;  %1876 = vmatprep.subr.mxu1 %v11034_v12  ;;  %v8284_v20 = vpop.permute.xlu1 %5513 }
 0x1f4   :  { %11250 = vst [vmem:[#allocation20_spill] sm:$0xff] %v8284_v20  ;;  %4809 = vmatpush3.msra.mxu0 %v8289_v45  ;;  %5518 = vrot.lane.b32.xlu0 %v11251_v37, %s5876_s19  ;;  %v8326_v37 = vld [vmem:[%s10612_s2 + $0x10] sm:$0xff] }
 0x1f5   :  { %1877 = vmatpush1.msra.mxu1 %v11252_v16  ;;  %4810 = vmatprep.subr.mxu0 %v8300_v33  ;;  %11259 = vst [vmem:[#allocation36_spill] sm:$0xff] %v8326_v37  ;;  %v11260_v16 = vld [vmem:[#allocation64_spill] sm:$0xff] }
 0x1f6   :  { %1878 = vmatprep.subr.mxu1 %v11034_v12  ;;  %4811 = vmatpush3.msra.mxu0 %v8308_v58  ;;  %v8649_v58 = vld [vmem:[%s10612_s2 + $0x130] sm:$0xff]  ;;  %v8656_v33 = vld [vmem:[%s10612_s2 + $0x1a8] sm:$0xff] }
 0x1f7   :  { %1879 = vmatpush1.msra.mxu1 %v11256_v52  ;;  %4812 = vmatprep.subr.mxu0 %v8317_v18  ;;  %v8320_v47 = vpop.permute.xlu1 %3405  ;;  %v1968_v52 = vpop.permute.xlu0 %1967  ;;  %11312 = vst [vmem:[#allocation73_spill] sm:$0xff] %v8649_v58  ;;  %11313 = vst [vmem:[#allocation46_spill] sm:$0xff] %v8656_v33 }
 0x1f8   :  { %11258 = vst [vmem:[#allocation35_spill] sm:$0xff] %v8320_v47  ;;  %1886 = vmatprep.subr.mxu1 %v11034_v12  ;;  %4813 = vmatpush3.msra.mxu0 %v8326_v37  ;;  %v11262_v47 = vld [vmem:[#allocation84_spill] sm:$0xff]  ;;  %v8639_v37 = vld [vmem:[%s10612_s2 + $0x1b0] sm:$0xff] }
 0x1f9   :  { %5523 = vrot.lane.b32.xlu0 %v5522_v59, %s5876_s19  ;;  %4333 = vmatpush2.msk.msra.mxu1 %vm271_vm5, %v11260_v16  ;;  %v4032_v6 = vcombine.high %v11262_v47, %v11262_v47  ;;  %v8344_v59 = vld [vmem:[%s10612_s2 + $0x8] sm:$0xff]  ;;  %v11264_v16 = vld [vmem:[#allocation66_spill] sm:$0xff]  ;;  %v1982_v47 = vsel %vm1981_vm12, %v1968_v52, %v5460_v29  ;;  %v4540_v29 = vadd.f32 %v8166_v54, %v8137_v61 }
 0x1fa   :  { %4814 = vmatprep.subr.mxu0 %v8335_v8  ;;  %1888 = vmatprep.subr.mxu1 %v11034_v12  ;;  %11263 = vst [vmem:[#allocation8_spill] sm:$0xff] %v8344_v59  ;;  %v11272_v52 = vld [vmem:[#allocation86_spill] sm:$0xff]  ;;  %v11276_v54 = vld [vmem:[#allocation77_spill] sm:$0xff]  ;;  %11310 = vst [vmem:[#allocation56_spill] sm:$0xff] %v8639_v37 }
 0x1fb   :  { %4815 = vmatpush3.msra.mxu0 %v8344_v59  ;;  %1889 = vmatpush2.msra.mxu1 %v11264_v16  ;;  %v4575_v16 = vadd.f32 %v4574_v0, %v4573_v62  ;;  %v8618_v59 = vld [vmem:[%s10612_s2 + $0x140] sm:$0xff]  ;;  %v8625_v8 = vld [vmem:[%s10612_s2 + $0x1b8] sm:$0xff] }
 0x1fc   :  { %4816 = vmatprep.subr.mxu0 %v8354_v5  ;;  %1890 = vmatprep.subr.mxu1 %v11034_v12  ;;  %v11271_v5 = vld [vmem:[#allocation87_spill] sm:$0xff]  ;;  %11307 = vst [vmem:[#allocation76_spill] sm:$0xff] %v8618_v59  ;;  %11308 = vst [vmem:[#allocation54_spill] sm:$0xff] %v8625_v8 }
 0x1fd   :  { %4817 = vmatpush3.msra.mxu0 %v8362_v4  ;;  %4049 = vrot.lane.b32.xlu0 %v11268_v60, %s5877_s26  ;;  %v8367_v20 = vpop.permute.xlu1 %3674  ;;  %v5532_v39 = vpack.i.bf16 %v11271_v5, %v4032_v6  ;;  %v4033_v4 = vcombine.high %v11272_v52, %v11272_v52  ;;  %v11273_v60 = vld [vmem:[#allocation71_spill] sm:$0xff]  ;;  %v11281_v6 = vld [vmem:[#allocation80_spill] sm:$0xff]  ;;  %v11286_v52 = vld [vmem:[#allocation82_spill] sm:$0xff] }
 0x1fe   :  { %11269 = vst [vmem:[#allocation43_spill] sm:$0xff] %v8367_v20  ;;  %1891 = vmatpush2.msra.mxu1 %v11270_v42  ;;  %2059 = vmatprep.mubr.f32.mxu0 %v1983_v1  ;;  %v988_v1 = vadd.f32 %v4575_v16, %v4540_v29  ;;  %v11275_v5 = vld [vmem:[#allocation75_spill] sm:$0xff]  ;;  %v11284_v16 = vld [vmem:[#allocation81_spill] sm:$0xff] }
 0x1ff   :  { %2135 = vmatprep.subr.mxu0 %v11034_v12  ;;  %1892 = vmatprep.subr.mxu1 %v11034_v12  ;;  %v4047_v61 = vrot.slane %v4033_v4, %v11080_v15  ;;  %v8399_v4 = vld [vmem:[%s10612_s2 + $0x260] sm:$0xff]  ;;  %v8431_v29 = vld [vmem:[%s10612_s2 + $0x248] sm:$0xff] }
 0x200   :  { %2060 = vmatmul.mubr.f32.vlgmr.msra.gmra.mxu0 %v1982_v47  ;;  %1893 = vmatpush2.msra.mxu1 %v11273_v60  ;;  %11278 = vst [vmem:[#allocation48_spill] sm:$0xff] %v8399_v4  ;;  %v8421_v47 = vld [vmem:[%s10612_s2 + $0x250] sm:$0xff]  ;;  %11285 = vst [vmem:[#allocation40_spill] sm:$0xff] %v8431_v29  ;;  %v8510_v20 = vld [vmem:[%s10612_s2 + $0x1e8] sm:$0xff] }
 0x201   :  { %2136 = vmatpush1.msra.mxu0 %v11225_v19  ;;  %1894 = vmatprep.subr.mxu1 %v11034_v12  ;;  %v8380_v62 = vpop.permute.xlu1 %5528  ;;  %v1058_v19 = vadd.f32 %v8184_v63, %v988_v1  ;;  %v8410_v63 = vld [vmem:[%s10612_s2 + $0x258] sm:$0xff]  ;;  %11283 = vst [vmem:[#allocation9_spill] sm:$0xff] %v8421_v47  ;;  %v8440_v1 = vld [vmem:[%s10612_s2 + $0x240] sm:$0xff] }
 0x202   :  { %11274 = vst [vmem:[#allocation45_spill] sm:$0xff] %v8380_v62  ;;  %2137 = vmatprep.subr.mxu0 %v11034_v12  ;;  %5533 = vrot.lane.b32.xlu0 %v5532_v39, %s5877_s26  ;;  %11280 = vst [vmem:[#allocation6_spill] sm:$0xff] %v8410_v63  ;;  %v8548_v62 = vld [vmem:[%s10612_s2 + $0x1d8] sm:$0xff] }
 0x203   :  { %2138 = vmatpush1.msra.mxu0 %v11227_v35  ;;  %1895 = vmatpush2.msra.mxu1 %v11275_v5  ;;  %v11279_v35 = vld [vmem:[#allocation79_spill] sm:$0xff]  ;;  %11287 = vst [vmem:[#allocation38_spill] sm:$0xff] %v8440_v1  ;;  %11296 = vst [vmem:[#allocation18_spill] sm:$0xff] %v8548_v62 }
 0x204   :  { %2139 = vmatprep.subr.mxu0 %v11034_v12  ;;  %1896 = vmatprep.subr.mxu1 %v11034_v12 }
 0x205   :  { %2140 = vmatpush1.msra.mxu0 %v11229_v28  ;;  %1897 = vmatpush2.msra.mxu1 %v11276_v54  ;;  %v1068_v28 = vrot.slane %v1058_v19, %v11080_v15  ;;  %v1700_v19 = vsel %vm1694_vm11, %v7952_v10, %v8294_v53  ;;  %v8472_v10 = vld [vmem:[%s10612_s2 + $0x1f8] sm:$0xff]  ;;  %v8478_v53 = vld [vmem:[%s10612_s2 + $0x228] sm:$0xff]  ;;  %vm9426_vm11 = vmor %vm1353_vm9, %vm1352_vm8 }
 0x206   :  { %2141 = vmatprep.subr.mxu0 %v11034_v12  ;;  %1898 = vmatprep.subr.mxu1 %v11034_v12  ;;  %v8394_v39 = vpop.permute.xlu1 %3684  ;;  %11290 = vst [vmem:[#allocation23_spill] sm:$0xff] %v8478_v53  ;;  %v8599_v15 = vld [vmem:[%s10612_s2 + $0x148] sm:$0xff] }
 0x207   :  { %11277 = vst [vmem:[#allocation47_spill] sm:$0xff] %v8394_v39  ;;  %2142 = vmatpush1.msra.mxu0 %v8399_v4  ;;  %4061 = vrot.lane.b32.xlu0 %v4047_v61, %s5877_s26  ;;  %v8503_v39 = vld [vmem:[%s10612_s2 + $0x170] sm:$0xff]  ;;  %11304 = vst [vmem:[#allocation70_spill] sm:$0xff] %v8599_v15  ;;  %v8606_v4 = vld [vmem:[%s10612_s2 + $0x1c0] sm:$0xff] }
 0x208   :  { %1899 = vmatpush2.msra.mxu1 %v11279_v35  ;;  %2143 = vmatprep.subr.mxu0 %v11034_v12  ;;  %11305 = vst [vmem:[#allocation59_spill] sm:$0xff] %v8606_v4 }
 0x209   :  { %1900 = vmatprep.subr.mxu1 %v11034_v12  ;;  %2144 = vmatpush1.msra.mxu0 %v8410_v63  ;;  %v8586_v63 = vld [vmem:[%s10612_s2 + $0x1c8] sm:$0xff] }
 0x20a   :  { %1901 = vmatpush2.msra.mxu1 %v11281_v6  ;;  %2145 = vmatprep.subr.mxu0 %v11034_v12  ;;  %v8415_v0 = vpop.permute.xlu1 %4059  ;;  %11302 = vst [vmem:[#allocation49_spill] sm:$0xff] %v8586_v63 }
 0x20b   :  { %11282 = vst [vmem:[#allocation7_spill] sm:$0xff] %v8415_v0  ;;  %1902 = vmatprep.subr.mxu1 %v11034_v12  ;;  %2146 = vmatpush1.msra.mxu0 %v8421_v47  ;;  %v8497_v0 = vld [vmem:[%s10612_s2 + $0x220] sm:$0xff]  ;;  %v8579_v47 = vld [vmem:[%s10612_s2 + $0x150] sm:$0xff] }
 0x20c   :  { %1903 = vmatpush2.msra.mxu1 %v11284_v16  ;;  %2147 = vmatprep.subr.mxu0 %v11034_v12  ;;  %11291 = vst [vmem:[#allocation27_spill] sm:$0xff] %v8497_v0  ;;  %11301 = vst [vmem:[#allocation34_spill] sm:$0xff] %v8579_v47 }
 0x20d   :  { %1069 = vrot.lane.b32.xlu0 %v1068_v28, %s5880_s23  ;;  %1904 = vmatprep.subr.mxu1 %v11034_v12  ;;  %v8453_v28 = vld [vmem:[%s10612_s2 + $0x238] sm:$0xff] }
 0x20e   :  { %2148 = vmatpush1.msra.mxu0 %v8431_v29  ;;  %1905 = vmatpush2.msra.mxu1 %v11286_v52  ;;  %11288 = vst [vmem:[#allocation15_spill] sm:$0xff] %v8453_v28  ;;  %v8567_v29 = vld [vmem:[%s10612_s2 + $0x1d0] sm:$0xff] }
 0x20f   :  { %2149 = vmatprep.subr.mxu0 %v11034_v12  ;;  %1906 = vmatprep.subr.mxu1 %v11034_v12  ;;  %11299 = vst [vmem:[#allocation26_spill] sm:$0xff] %v8567_v29 }
 0x210   :  { %2150 = vmatpush1.msra.mxu0 %v8440_v1  ;;  %1907 = vmatpush2.msra.mxu1 %v7807_v46  ;;  %v494_v61 = vpop.permute.xlu1 %493  ;;  %v8560_v1 = vld [vmem:[%s10612_s2 + $0x158] sm:$0xff] }
 0x211   :  { %2151 = vmatprep.subr.mxu0 %v11034_v12  ;;  %1908 = vmatprep.subr.mxu1 %v11034_v12  ;;  %497 = vst.msk [vmem:[#allocation2] sm:$0x3] %vm496_vm13, %v494_v61  ;;  %v8462_v61 = vld [vmem:[%s10612_s2 + $0x230] sm:$0xff]  ;;  %11298 = vst [vmem:[#allocation22_spill] sm:$0xff] %v8560_v1 }
 0x212   :  { %2152 = vmatpush1.msra.mxu0 %v8453_v28  ;;  %1909 = vmatpush2.msra.mxu1 %v7820_v14  ;;  %11289 = vst [vmem:[#allocation19_spill] sm:$0xff] %v8462_v61  ;;  %v8541_v28 = vld [vmem:[%s10612_s2 + $0x160] sm:$0xff] }
 0x213   :  { %2153 = vmatprep.subr.mxu0 %v11034_v12  ;;  %1910 = vmatprep.subr.mxu1 %v11034_v12  ;;  %11295 = vst [vmem:[#allocation41_spill] sm:$0xff] %v8541_v28 }
 0x214   :  { %2154 = vmatpush1.msra.mxu0 %v8462_v61  ;;  %1911 = vmatpush2.msra.mxu1 %v7838_v30  ;;  %v8529_v61 = vld [vmem:[%s10612_s2 + $0x1e0] sm:$0xff] }
 0x215   :  { %4334 = vmatprep.mubr.msk.f32.mxu1 %vm268_vm6, %v1700_v19  ;;  %2155 = vmatprep.subr.mxu0 %v11034_v12  ;;  %v8484_v19 = vld [vmem:[%s10612_s2 + $0x178] sm:$0xff]  ;;  %11293 = vst [vmem:[#allocation31_spill] sm:$0xff] %v8529_v61 }
 0x216   :  { %1913 = vmatmul.mubr.f32.vlgmr.msra.gmra.mxu1 %v8008_v57  ;;  %4821 = vmatprep.subr.mxu1 %v8472_v10  ;;  %v8491_v57 = vld [vmem:[%s10612_s2 + $0x1f0] sm:$0xff] }
 0x217   :  { %2156 = vmatpush1.msra.mxu0 %v8478_v53  ;;  %4822 = vmatpush3.msra.mxu1 %v8484_v19  ;;  %v8522_v53 = vld [vmem:[%s10612_s2 + $0x168] sm:$0xff] }
 0x218   :  { %2157 = vmatprep.subr.mxu0 %v11034_v12  ;;  %4823 = vmatprep.subr.mxu1 %v8491_v57 }
 0x219   :  { %2158 = vmatpush1.msra.mxu0 %v8497_v0  ;;  %4824 = vmatpush3.msra.mxu1 %v8503_v39  ;;  %v8516_v0 = vld [vmem:[%s10612_s2 + $0x218] sm:$0xff] }
 0x21a   :  { %2159 = vmatprep.subr.mxu0 %v11034_v12  ;;  %4825 = vmatprep.subr.mxu1 %v8510_v20  ;;  %11292 = vst [vmem:[#allocation58_spill] sm:$0xff] %v8516_v0 }
 0x21b   :  { %2160 = vmatpush1.msra.mxu0 %v8516_v0  ;;  %4826 = vmatpush3.msra.mxu1 %v8522_v53  ;;  %v8535_v0 = vld [vmem:[%s10612_s2 + $0x210] sm:$0xff] }
 0x21c   :  { %2161 = vmatprep.subr.mxu0 %v11034_v12  ;;  %4827 = vmatprep.subr.mxu1 %v8529_v61  ;;  %11294 = vst [vmem:[#allocation14_spill] sm:$0xff] %v8535_v0 }
 0x21d   :  { %2162 = vmatpush1.msra.mxu0 %v8535_v0  ;;  %4828 = vmatpush3.msra.mxu1 %v8541_v28  ;;  %v8554_v0 = vld [vmem:[%s10612_s2 + $0x208] sm:$0xff] }
 0x21e   :  { %2163 = vmatprep.subr.mxu0 %v11034_v12  ;;  %4829 = vmatprep.subr.mxu1 %v8548_v62  ;;  %11297 = vst [vmem:[#allocation55_spill] sm:$0xff] %v8554_v0 }
 0x21f   :  { %2164 = vmatpush1.msra.mxu0 %v8554_v0  ;;  %4830 = vmatpush3.msra.mxu1 %v8560_v1  ;;  %v8573_v0 = vld [vmem:[%s10612_s2 + $0x200] sm:$0xff] }
 0x220   :  { %2165 = vmatprep.subr.mxu0 %v11034_v12  ;;  %4831 = vmatprep.subr.mxu1 %v8567_v29  ;;  %11300 = vst [vmem:[#allocation30_spill] sm:$0xff] %v8573_v0 }
 0x221   :  { %2166 = vmatpush1.msra.mxu0 %v8573_v0  ;;  %4832 = vmatpush3.msra.mxu1 %v8579_v47  ;;  %v8592_v0 = vld [vmem:[%s10612_s2 + $0x2e0] sm:$0xf]  ;;  %v8642_v18 = vpop.permute.xlu0 %5468 }
 0x222   :  { %2173 = vmatprep.subr.mxu0 %v11034_v12  ;;  %4833 = vmatprep.subr.mxu1 %v8586_v63  ;;  %11303 = vst [vmem:[#allocation52_spill] sm:$0xff] %v8592_v0  ;;  %11311 = vst [vmem:[#allocation44_spill] sm:$0xff] %v8642_v18  ;;  %v5466_v18 = vunpack.i.h.bf16 %v7980_v51 }
 0x223   :  { %4335 = vmatpush2.msk.msra.mxu0 %vm271_vm5, %v8592_v0  ;;  %4834 = vmatpush3.msra.mxu1 %v8599_v15  ;;  %v8612_v0 = vld [vmem:[%s10612_s2 + $0x2d8] sm:$0xff] }
 0x224   :  { %2175 = vmatprep.subr.mxu0 %v11034_v12  ;;  %4835 = vmatprep.subr.mxu1 %v8606_v4  ;;  %11306 = vst [vmem:[#allocation74_spill] sm:$0xff] %v8612_v0 }
 0x225   :  { %2176 = vmatpush2.msra.mxu0 %v8612_v0  ;;  %4836 = vmatpush3.msra.mxu1 %v8618_v59  ;;  %v8632_v0 = vld [vmem:[%s10612_s2 + $0x138] sm:$0xff] }
 0x226   :  { %2177 = vmatprep.subr.mxu0 %v11034_v12  ;;  %4837 = vmatprep.subr.mxu1 %v8625_v8  ;;  %11309 = vst [vmem:[#allocation39_spill] sm:$0xff] %v8632_v0 }
 0x227   :  { %2178 = vmatpush2.msra.mxu0 %v11270_v42  ;;  %4838 = vmatpush3.msra.mxu1 %v8632_v0  ;;  %v11317_v42 = vunpack.i.l.bf16 %v8063_v24  ;;  %v8700_v24 = vld [vmem:[%s10612_s2 + $0x118] sm:$0xff] }
 0x228   :  { %2179 = vmatprep.subr.mxu0 %v11034_v12  ;;  %4839 = vmatprep.subr.mxu1 %v8639_v37 }
 0x229   :  { %2180 = vmatpush2.msra.mxu0 %v11273_v60  ;;  %4840 = vmatpush3.msra.mxu1 %v8649_v58  ;;  %v8664_v60 = vld [vmem:[%s10612_s2 + $0x128] sm:$0xff]  ;;  %v8671_v58 = vld [vmem:[%s10612_s2 + $0x1a0] sm:$0xff] }
 0x22a   :  { %2181 = vmatprep.subr.mxu0 %v11034_v12  ;;  %4841 = vmatprep.subr.mxu1 %v8656_v33  ;;  %11314 = vst [vmem:[#allocation50_spill] sm:$0xff] %v8664_v60  ;;  %11315 = vst [vmem:[#allocation68_spill] sm:$0xff] %v8671_v58 }
 0x22b   :  { %2182 = vmatpush2.msra.mxu0 %v11275_v5  ;;  %4842 = vmatpush3.msra.mxu1 %v8664_v60  ;;  %v8678_v5 = vld [vmem:[%s10612_s2 + $0x120] sm:$0xff]  ;;  %v11318_v60 = vunpack.i.h.bf16 %v8049_v9 }
 0x22c   :  { %2183 = vmatprep.subr.mxu0 %v11034_v12  ;;  %4843 = vmatprep.subr.mxu1 %v8671_v58  ;;  %11316 = vst [vmem:[#allocation51_spill] sm:$0xff] %v8678_v5  ;;  %v1978_v58 = vpop.permute.xlu0 %1977 }
 0x22d   :  { %2184 = vmatpush2.msra.mxu0 %v11276_v54  ;;  %4844 = vmatpush3.msra.mxu1 %v8678_v5  ;;  %v8686_v33 = vsel %vm2547_vm14, %v11318_v60, %v11317_v42  ;;  %v8692_v54 = vld [vmem:[%s10612_s2 + $0x198] sm:$0xff]  ;;  %v8707_v42 = vld [vmem:[%s10612_s2 + $0x190] sm:$0xff]  ;;  %v5465_v60 = vunpack.i.l.bf16 %v7980_v51  ;;  %v8731_v51 = vld [vmem:[%s10612_s2 + $0x108] sm:$0xff] }
 0x22e   :  { %11319 = vst [vmem:[#allocation65_spill] sm:$0xff] %v8686_v33  ;;  %2185 = vmatprep.subr.mxu0 %v11034_v12  ;;  %4845 = vmatprep.subr.mxu1 %v8692_v54  ;;  %v8722_v33 = vld [vmem:[%s10612_s2 + $0x188] sm:$0xff]  ;;  %11322 = vst [vmem:[#allocation57_spill] sm:$0xff] %v8731_v51 }
 0x22f   :  { %2186 = vmatpush2.msra.mxu0 %v11279_v35  ;;  %4846 = vmatpush3.msra.mxu1 %v8700_v24  ;;  %v8715_v35 = vld [vmem:[%s10612_s2 + $0x110] sm:$0xff]  ;;  %11321 = vst [vmem:[#allocation78_spill] sm:$0xff] %v8722_v33 }
 0x230   :  { %2187 = vmatprep.subr.mxu0 %v11034_v12  ;;  %4847 = vmatprep.subr.mxu1 %v8707_v42  ;;  %11320 = vst [vmem:[#allocation53_spill] sm:$0xff] %v8715_v35 }
 0x231   :  { %2188 = vmatpush2.msra.mxu0 %v11281_v6  ;;  %4848 = vmatpush3.msra.mxu1 %v8715_v35  ;;  %v1985_v6 = vsel %vm1981_vm12, %v5465_v60, %v5466_v18  ;;  %v8739_v35 = vld [vmem:[%s10612_s2 + $0x180] sm:$0xff] }
 0x232   :  { %2189 = vmatprep.subr.mxu0 %v11034_v12  ;;  %4849 = vmatprep.subr.mxu1 %v8722_v33  ;;  %v8725_v9 = vpop.permute.xlu0 %5473  ;;  %11323 = vst [vmem:[#allocation60_spill] sm:$0xff] %v8739_v35 }
 0x233   :  { %2190 = vmatpush2.msra.mxu0 %v11284_v16  ;;  %4850 = vmatpush3.msra.mxu1 %v8731_v51  ;;  %v8746_v16 = vld [vmem:[%s10612_s2 + $0x100] sm:$0xff]  ;;  %v11324_v51 = vunpack.i.h.bf16 %v7966_v49  ;;  %v1986_v49 = vsel %vm1981_vm12, %v5466_v18, %v1978_v58 }
 0x234   :  { %2191 = vmatprep.subr.mxu0 %v11034_v12  ;;  %4851 = vmatprep.subr.mxu1 %v8739_v35 }
 0x235   :  { %2192 = vmatpush2.msra.mxu0 %v11286_v52  ;;  %4852 = vmatpush3.msra.mxu1 %v8746_v16  ;;  %v1984_v33 = vsel %vm1981_vm12, %v11324_v51, %v5465_v60  ;;  %v1987_v52 = vsel %vm1981_vm12, %v1978_v58, %v8021_v32  ;;  %v10856_v58 = vunpack.i.h.bf16 %v8097_v13  ;;  %vm3686_vm12 = vcmask 859136  }
 0x236   :  { %2129 = vmatprep.mubr.f32.mxu1 %v1985_v6  ;;  %2193 = vmatprep.subr.mxu0 %v11034_v12 }
 0x237   :  { %2130 = vmatmul.mubr.f32.vlgmr.msra.gmra.mxu1 %v1984_v33  ;;  %2194 = vmatpush2.msra.mxu0 %v7807_v46  ;;  %v8754_v35 = vpop.permute.xlu0 %2266 }
 0x238   :  { %4856 = vmatprep.subr.mxu1 %v8091_v56  ;;  %2195 = vmatprep.subr.mxu0 %v11034_v12 }
 0x239   :  { %4857 = vmatpush3.msra.mxu1 %v8102_v25  ;;  %2196 = vmatpush2.msra.mxu0 %v7820_v14  ;;  %v8784_v14 = vpop.f32.mrf.mxu1 }
 0x23a   :  { %4858 = vmatprep.subr.mxu1 %v8109_v26  ;;  %2197 = vmatprep.subr.mxu0 %v11034_v12 }
 0x23b   :  { %4859 = vmatpush3.msra.mxu1 %v8117_v55  ;;  %2198 = vmatpush2.msra.mxu0 %v7838_v30  ;;  %v8766_v46 = vpop.permute.xlu0 %2535  ;;  %v8796_v33 = vpop.f32.mrf.mxu1 }
 0x23c   :  { %4336 = vmatprep.mubr.msk.f32.mxu0 %vm268_vm6, %v1987_v52  ;;  %4860 = vmatprep.subr.mxu1 %v8126_v38 }
 0x23d   :  { %2200 = vmatmul.mubr.f32.vlgmr.msra.gmra.mxu0 %v1986_v49  ;;  %4861 = vmatpush3.msra.mxu1 %v8134_v36  ;;  %v11329_v49 = vld [vmem:[#allocation24_spill] sm:$0xff] }
 0x23e   :  { %4891 = vmatprep.subr.mxu0 %v8472_v10  ;;  %4862 = vmatprep.subr.mxu1 %v8145_v3 }
 0x23f   :  { %4892 = vmatpush3.msra.mxu0 %v8484_v19  ;;  %4863 = vmatpush3.msra.mxu1 %v8153_v44 }
 0x240   :  { %4893 = vmatprep.subr.mxu0 %v8491_v57  ;;  %4864 = vmatprep.subr.mxu1 %v8161_v17  ;;  %v8778_v30 = vpop.permute.xlu0 %5488 }
 0x241   :  { %4894 = vmatpush3.msra.mxu0 %v8503_v39  ;;  %4865 = vmatpush3.msra.mxu1 %v8172_v50 }
 0x242   :  { %4895 = vmatprep.subr.mxu0 %v8510_v20  ;;  %4866 = vmatprep.subr.mxu1 %v8181_v27 }
 0x243   :  { %4896 = vmatpush3.msra.mxu0 %v8522_v53  ;;  %4867 = vmatpush3.msra.mxu1 %v8190_v40 }
 0x244   :  { %4897 = vmatprep.subr.mxu0 %v8529_v61  ;;  %4868 = vmatprep.subr.mxu1 %v8200_v31 }
 0x245   :  { %4898 = vmatpush3.msra.mxu0 %v8541_v28  ;;  %4869 = vmatpush3.msra.mxu1 %v8207_v34  ;;  %v8792_v32 = vpop.permute.xlu0 %2545 }
 0x246   :  { %11325 = vst [vmem:[#allocation69_spill] sm:$0xff] %v8792_v32  ;;  %4899 = vmatprep.subr.mxu0 %v8548_v62  ;;  %4870 = vmatprep.subr.mxu1 %v8216_v23  ;;  %v11331_v32 = vld [vmem:[#allocation73_spill] sm:$0xff]  ;;  %v5475_v62 = vunpack.i.l.bf16 %v8725_v9 }
 0x247   :  { %4900 = vmatpush3.msra.mxu0 %v8560_v1  ;;  %4871 = vmatpush3.msra.mxu1 %v8223_v48 }
 0x248   :  { %4901 = vmatprep.subr.mxu0 %v8567_v29  ;;  %4872 = vmatprep.subr.mxu1 %v8231_v41  ;;  %v11341_v29 = vld [vmem:[#allocation12_spill] sm:$0xff] }
 0x249   :  { %4902 = vmatpush3.msra.mxu0 %v8579_v47  ;;  %4873 = vmatpush3.msra.mxu1 %v8240_v21  ;;  %v8805_v18 = vpop.f32.mrf.mxu1  ;;  %v11340_v47 = vld [vmem:[#allocation8_spill] sm:$0xff]  ;;  %v11347_v28 = vunpack.i.l.bf16 %v11341_v29  ;;  %v11353_v29 = vunpack.i.h.bf16 %v8725_v9 }
 0x24a   :  { %4903 = vmatprep.subr.mxu0 %v8586_v63  ;;  %4874 = vmatprep.subr.mxu1 %v8247_v2  ;;  %v8809_v60 = vpop.permute.xlu0 %2829  ;;  %v11338_v63 = vld [vmem:[#allocation37_spill] sm:$0xff] }
 0x24b   :  { %11326 = vst [vmem:[#allocation61_spill] sm:$0xff] %v8809_v60  ;;  %4904 = vmatpush3.msra.mxu0 %v8599_v15  ;;  %4875 = vmatpush3.msra.mxu1 %v8256_v11  ;;  %v8817_v51 = vsel %vm2833_vm15, %v10856_v58, %v8809_v60  ;;  %v1336_v6 = vpop.f32.mrf.mxu1  ;;  %v11330_v58 = vld [vmem:[#allocation44_spill] sm:$0xff] }
 0x24c   :  { %11327 = vst [vmem:[#allocation72_spill] sm:$0xff] %v8817_v51  ;;  %4905 = vmatprep.subr.mxu0 %v8606_v4  ;;  %4876 = vmatprep.subr.mxu1 %v8264_v7  ;;  %v4643_v6 = vpop.f32.mrf.mxu0  ;;  %v5471_v51 = vunpack.i.h.bf16 %v11330_v58  ;;  %v5470_v60 = vunpack.i.l.bf16 %v11330_v58  ;;  %v11337_v15 = vld [vmem:[#allocation68_spill] sm:$0xff] }
 0x24d   :  { %4906 = vmatpush3.msra.mxu0 %v8618_v59  ;;  %4877 = vmatpush3.msra.mxu1 %v8273_v43  ;;  %v11334_v59 = vld [vmem:[#allocation32_spill] sm:$0xff] }
 0x24e   :  { %4907 = vmatprep.subr.mxu0 %v8625_v8  ;;  %4878 = vmatprep.subr.mxu1 %v8280_v22  ;;  %v11332_v8 = vld [vmem:[#allocation28_spill] sm:$0xff] }
 0x24f   :  { %4908 = vmatpush3.msra.mxu0 %v8632_v0  ;;  %4879 = vmatpush3.msra.mxu1 %v8289_v45  ;;  %v8827_v52 = vpop.permute.xlu0 %5498  ;;  %v11333_v0 = vld [vmem:[#allocation46_spill] sm:$0xff] }
 0x250   :  { %11328 = vst [vmem:[#allocation62_spill] sm:$0xff] %v8827_v52  ;;  %4909 = vmatprep.subr.mxu0 %v8639_v37  ;;  %4880 = vmatprep.subr.mxu1 %v11329_v49  ;;  %v11335_v52 = vld [vmem:[#allocation50_spill] sm:$0xff]  ;;  %v11336_v37 = vld [vmem:[#allocation36_spill] sm:$0xff] }
 0x251   :  { %4910 = vmatpush3.msra.mxu0 %v11331_v32  ;;  %4881 = vmatpush3.msra.mxu1 %v11332_v8  ;;  %v4644_v32 = vpop.f32.mrf.mxu0 }
 0x252   :  { %4911 = vmatprep.subr.mxu0 %v11333_v0  ;;  %4882 = vmatprep.subr.mxu1 %v11334_v59  ;;  %v2270_v0 = vsel %vm2268_vm1, %v5470_v60, %v5471_v51  ;;  %v4645_v61 = vadd.f32 %v4644_v32, %v4643_v6  ;;  %v11350_v6 = vunpack.i.h.bf16 %v8778_v30 }
 0x253   :  { %4912 = vmatpush3.msra.mxu0 %v11335_v52  ;;  %4883 = vmatpush3.msra.mxu1 %v11336_v37  ;;  %v782_v4 = vpop.permute.xlu1 %781  ;;  %v11345_v52 = vld [vmem:[#allocation53_spill] sm:$0xff] }
 0x254   :  { %4913 = vmatprep.subr.mxu0 %v11337_v15  ;;  %4884 = vmatprep.subr.mxu1 %v11338_v63  ;;  %785 = vst.msk [vmem:[#allocation2] sm:$0x3] %vm784_vm0, %v782_v4  ;;  %v8842_v58 = vpop.permute.xlu0 %5503  ;;  %v11342_v15 = vld [vmem:[#allocation33_spill] sm:$0xff]  ;;  %v11343_v4 = vld [vmem:[#allocation10_spill] sm:$0xff] }
 0x255   :  { %11339 = vst [vmem:[#allocation85_spill] sm:$0xff] %v8842_v58  ;;  %4914 = vmatpush3.msra.mxu0 %v8678_v5  ;;  %4885 = vmatpush3.msra.mxu1 %v11340_v47  ;;  %v2269_v58 = vsel %vm2268_vm1, %v11343_v4, %v5470_v60  ;;  %v11344_v5 = vld [vmem:[#allocation42_spill] sm:$0xff]  ;;  %v4610_v60 = vadd.f32 %v8796_v33, %v8784_v14  ;;  %v11352_v33 = vld [vmem:[#allocation57_spill] sm:$0xff] }
 0x256   :  { %4915 = vmatprep.subr.mxu0 %v8692_v54  ;;  %4886 = vmatprep.subr.mxu1 %v11342_v15  ;;  %v11346_v4 = vld [vmem:[#allocation78_spill] sm:$0xff] }
 0x257   :  { %4916 = vmatpush3.msra.mxu0 %v8700_v24  ;;  %4887 = vmatpush3.msra.mxu1 %v11344_v5  ;;  %v8879_v14 = vld [vmem:[%s10612_s2 + $0x278] sm:$0xff] }
 0x258   :  { %2346 = vmatprep.mubr.f32.mxu1 %v2270_v0  ;;  %4917 = vmatprep.subr.mxu0 %v8707_v42  ;;  %v11349_v0 = vunpack.i.l.bf16 %v8097_v13 }
 0x259   :  { %2347 = vmatmul.mubr.f32.vlgmr.msra.gmra.mxu1 %v2269_v58  ;;  %4918 = vmatpush3.msra.mxu0 %v11345_v52  ;;  %v3394_v1 = vpop.permute.xlu0 %3393 }
 0x25a   :  { %2422 = vmatprep.subr.mxu1 %v11034_v12  ;;  %4919 = vmatprep.subr.mxu0 %v11346_v4  ;;  %v8867_v32 = vsel %vm3407_vm2, %v3394_v1, %v11347_v28  ;;  %v8874_v58 = vsel %vm2833_vm15, %v11350_v6, %v11349_v0  ;;  %v2272_v1 = vsel %vm2268_vm1, %v5475_v62, %v11353_v29  ;;  %v11354_v28 = vld [vmem:[#allocation60_spill] sm:$0xff]  ;;  %v8891_v0 = vld [vmem:[%s10612_s2 + $0x270] sm:$0xff] }
 0x25b   :  { %11348 = vst [vmem:[#allocation63_spill] sm:$0xff] %v8867_v32  ;;  %11351 = vst [vmem:[#allocation64_spill] sm:$0xff] %v8874_v58  ;;  %2423 = vmatpush1.msra.mxu1 %v8879_v14  ;;  %4920 = vmatpush3.msra.mxu0 %v11352_v33  ;;  %v1265_v32 = vadd.f32 %v4645_v61, %v4610_v60  ;;  %v2271_v29 = vsel %vm2268_vm1, %v5471_v51, %v5475_v62  ;;  %v8903_v61 = vld [vmem:[%s10612_s2 + $0x268] sm:$0xff] }
 0x25c   :  { %2424 = vmatprep.subr.mxu1 %v11034_v12  ;;  %4921 = vmatprep.subr.mxu0 %v11354_v28  ;;  %v11356_v60 = vld [vmem:[#allocation20_spill] sm:$0xff]  ;;  %v11358_v62 = vld [vmem:[#allocation5_spill] sm:$0xff] }
 0x25d   :  { %2425 = vmatpush1.msra.mxu1 %v8891_v0  ;;  %4922 = vmatpush3.msra.mxu0 %v8746_v16  ;;  %v8895_v6 = vpop.permute.xlu0 %3118  ;;  %v1335_v58 = vadd.f32 %v8805_v18, %v1265_v32  ;;  %v11360_v32 = vld [vmem:[#allocation6_spill] sm:$0xff] }
 0x25e   :  { %11355 = vst [vmem:[#allocation84_spill] sm:$0xff] %v8895_v6  ;;  %2416 = vmatprep.mubr.f32.mxu0 %v2272_v1  ;;  %2426 = vmatprep.subr.mxu1 %v11034_v12  ;;  %v10891_v1 = vunpack.i.h.bf16 %v11356_v60  ;;  %v11357_v6 = vld [vmem:[#allocation48_spill] sm:$0xff] }
 0x25f   :  { %2417 = vmatmul.mubr.f32.vlgmr.msra.gmra.mxu0 %v2271_v29  ;;  %2427 = vmatpush1.msra.mxu1 %v8903_v61  ;;  %v1345_v18 = vrot.slane %v1335_v58, %v11358_v62  ;;  %v11368_v58 = vld [vmem:[#allocation15_spill] sm:$0xff] }
 0x260   :  { %4926 = vmatprep.subr.mxu0 %v8091_v56  ;;  %2428 = vmatprep.subr.mxu1 %v11034_v12 }
 0x261   :  { %4927 = vmatpush3.msra.mxu0 %v8102_v25  ;;  %2429 = vmatpush1.msra.mxu1 %v11357_v6  ;;  %v11362_v25 = vld [vmem:[#allocation9_spill] sm:$0xff] }
 0x262   :  { %4928 = vmatprep.subr.mxu0 %v8109_v26  ;;  %2430 = vmatprep.subr.mxu1 %v11034_v12  ;;  %v8914_v51 = vpop.permute.xlu0 %3403 }
 0x263   :  { %11359 = vst [vmem:[#allocation66_spill] sm:$0xff] %v8914_v51  ;;  %4929 = vmatpush3.msra.mxu0 %v8117_v55  ;;  %2431 = vmatpush1.msra.mxu1 %v11360_v32  ;;  %v8922_v56 = vsel %vm3407_vm2, %v10891_v1, %v8914_v51  ;;  %v11364_v55 = vld [vmem:[#allocation40_spill] sm:$0xff]  ;;  %v11417_v51 = vld [vmem:[#allocation69_spill] sm:$0xff] }
 0x264   :  { %11361 = vst [vmem:[#allocation83_spill] sm:$0xff] %v8922_v56  ;;  %4930 = vmatprep.subr.mxu0 %v8126_v38  ;;  %2432 = vmatprep.subr.mxu1 %v11034_v12  ;;  %v11365_v38 = vld [vmem:[#allocation38_spill] sm:$0xff]  ;;  %v11416_v56 = vld [vmem:[#allocation65_spill] sm:$0xff] }
 0x265   :  { %4931 = vmatpush3.msra.mxu0 %v8134_v36  ;;  %2433 = vmatpush1.msra.mxu1 %v11362_v25 }
 0x266   :  { %4932 = vmatprep.subr.mxu0 %v8145_v3  ;;  %1346 = vrot.lane.b32.xlu0 %v1345_v18, %s5881_s17  ;;  %v8930_v26 = vpop.permute.xlu0 %5518  ;;  %v11367_v3 = vld [vmem:[#allocation45_spill] sm:$0xff]  ;;  %v11375_v18 = vld [vmem:[#allocation14_spill] sm:$0xff] }
 0x267   :  { %11363 = vst [vmem:[#allocation67_spill] sm:$0xff] %v8930_v26  ;;  %2434 = vmatprep.subr.mxu1 %v11034_v12  ;;  %4933 = vmatpush3.msra.mxu0 %v8153_v44  ;;  %v10890_v44 = vunpack.i.l.bf16 %v11367_v3  ;;  %v9224_v3 = vld [vmem:[%s10612_s2 + $0xe8] sm:$0xff] }
 0x268   :  { %2435 = vmatpush1.msra.mxu1 %v11364_v55  ;;  %4934 = vmatprep.subr.mxu0 %v8161_v17  ;;  %v4678_v17 = vpop.f32.mrf.mxu0 }
 0x269   :  { %2436 = vmatprep.subr.mxu1 %v11034_v12  ;;  %4935 = vmatpush3.msra.mxu0 %v8172_v50  ;;  %v11369_v50 = vld [vmem:[#allocation19_spill] sm:$0xff] }
 0x26a   :  { %2437 = vmatpush1.msra.mxu1 %v11365_v38  ;;  %4936 = vmatprep.subr.mxu0 %v8181_v27 }
 0x26b   :  { %2438 = vmatprep.subr.mxu1 %v11034_v12  ;;  %4937 = vmatpush3.msra.mxu0 %v8190_v40  ;;  %v8942_v36 = vpop.permute.xlu0 %5523  ;;  %v11370_v40 = vld [vmem:[#allocation23_spill] sm:$0xff] }
 0x26c   :  { %11366 = vst [vmem:[#allocation87_spill] sm:$0xff] %v8942_v36  ;;  %2439 = vmatpush1.msra.mxu1 %v11368_v58  ;;  %4938 = vmatprep.subr.mxu0 %v8200_v31 }
 0x26d   :  { %2440 = vmatprep.subr.mxu1 %v11034_v12  ;;  %4939 = vmatpush3.msra.mxu0 %v8207_v34  ;;  %v4679_v34 = vpop.f32.mrf.mxu0 }
 0x26e   :  { %2441 = vmatpush1.msra.mxu1 %v11369_v50  ;;  %4940 = vmatprep.subr.mxu0 %v8216_v23  ;;  %v11372_v23 = vld [vmem:[#allocation27_spill] sm:$0xff]  ;;  %v4680_v1 = vadd.f32 %v4679_v34, %v4678_v17  ;;  %v9040_v17 = vld [vmem:[%s10612_s2 + $0x2b0] sm:$0xff] }
 0x26f   :  { %2442 = vmatprep.subr.mxu1 %v11034_v12  ;;  %4941 = vmatpush3.msra.mxu0 %v8223_v48  ;;  %v4050_v27 = vpop.permute.xlu0 %4049  ;;  %11384 = vst [vmem:[#allocation79_spill] sm:$0xff] %v9040_v17 }
 0x270   :  { %2443 = vmatpush1.msra.mxu1 %v11370_v40  ;;  %4942 = vmatprep.subr.mxu0 %v8231_v41  ;;  %v8958_v31 = vsel %vm4063_vm3, %v4050_v27, %v10890_v44  ;;  %v11373_v41 = vld [vmem:[#allocation58_spill] sm:$0xff] }
 0x271   :  { %11371 = vst [vmem:[#allocation86_spill] sm:$0xff] %v8958_v31  ;;  %2444 = vmatprep.subr.mxu1 %v11034_v12  ;;  %4943 = vmatpush3.msra.mxu0 %v8240_v21 }
 0x272   :  { %2445 = vmatpush1.msra.mxu1 %v11372_v23  ;;  %4944 = vmatprep.subr.mxu0 %v8247_v2  ;;  %v4713_v2 = vpop.f32.mrf.mxu1 }
 0x273   :  { %2446 = vmatprep.subr.mxu1 %v11034_v12  ;;  %4945 = vmatpush3.msra.mxu0 %v8256_v11  ;;  %v1627_v48 = vpop.f32.mrf.mxu0  ;;  %v11376_v11 = vld [vmem:[#allocation55_spill] sm:$0xff] }
 0x274   :  { %2447 = vmatpush1.msra.mxu1 %v11373_v41  ;;  %4946 = vmatprep.subr.mxu0 %v8264_v7  ;;  %v8968_v29 = vpop.permute.xlu0 %5533  ;;  %v11377_v7 = vld [vmem:[#allocation13_spill] sm:$0xff] }
 0x275   :  { %11374 = vst [vmem:[#allocation71_spill] sm:$0xff] %v8968_v29  ;;  %2448 = vmatprep.subr.mxu1 %v11034_v12  ;;  %4947 = vmatpush3.msra.mxu0 %v8273_v43  ;;  %v1629_v21 = vpop.f32.mrf.mxu0  ;;  %v5480_v27 = vunpack.i.l.bf16 %v11377_v7 }
 0x276   :  { %2449 = vmatpush1.msra.mxu1 %v11375_v18  ;;  %4948 = vmatprep.subr.mxu0 %v8280_v22  ;;  %v11379_v21 = vld [vmem:[#allocation30_spill] sm:$0xff]  ;;  %v4714_v22 = vpop.f32.mrf.mxu1 }
 0x277   :  { %2450 = vmatprep.subr.mxu1 %v11034_v12  ;;  %4949 = vmatpush3.msra.mxu0 %v8289_v45  ;;  %v11380_v45 = vld [vmem:[#allocation52_spill] sm:$0xff]  ;;  %v4715_v44 = vadd.f32 %v4714_v22, %v4713_v2  ;;  %v11400_v22 = vld [vmem:[#allocation70_spill] sm:$0xff] }
 0x278   :  { %2451 = vmatpush1.msra.mxu1 %v11376_v11  ;;  %4950 = vmatprep.subr.mxu0 %v11329_v49 }
 0x279   :  { %2452 = vmatprep.subr.mxu1 %v11034_v12  ;;  %4951 = vmatpush3.msra.mxu0 %v11332_v8  ;;  %v8981_v43 = vpop.permute.xlu0 %4061  ;;  %v11381_v8 = vunpack.i.h.bf16 %v11377_v7  ;;  %v9100_v7 = vld [vmem:[%s10612_s2 + $0x280] sm:$0xff] }
 0x27a   :  { %11378 = vst [vmem:[#allocation75_spill] sm:$0xff] %v8981_v43  ;;  %2453 = vmatpush1.msra.mxu1 %v11379_v21  ;;  %4952 = vmatprep.subr.mxu0 %v11334_v59  ;;  %v11382_v59 = vld [vmem:[#allocation74_spill] sm:$0xff]  ;;  %11391 = vst [vmem:[#allocation28_spill] sm:$0xff] %v9100_v7  ;;  %v11414_v43 = vld [vmem:[#allocation17_spill] sm:$0xff] }
 0x27b   :  { %2460 = vmatprep.subr.mxu1 %v11034_v12  ;;  %4953 = vmatpush3.msra.mxu0 %v11336_v37  ;;  %v2549_v49 = vsel %vm2547_vm14, %v5480_v27, %v11381_v8  ;;  %v2548_v37 = vsel %vm2547_vm14, %v8766_v46, %v5480_v27  ;;  %v9022_v46 = vld [vmem:[%s10612_s2 + $0x2c0] sm:$0xff]  ;;  %v11398_v27 = vld [vmem:[#allocation34_spill] sm:$0xff]  ;;  %v5486_v31 = vunpack.i.h.bf16 %v11414_v43 }
 0x27c   :  { %4337 = vmatpush2.msk.msra.mxu1 %vm271_vm5, %v11380_v45  ;;  %4954 = vmatprep.subr.mxu0 %v11338_v63  ;;  %v11402_v8 = vld [vmem:[#allocation76_spill] sm:$0xff] }
 0x27d   :  { %2462 = vmatprep.subr.mxu1 %v11034_v12  ;;  %4955 = vmatpush3.msra.mxu0 %v11340_v47  ;;  %v9004_v47 = vld [vmem:[%s10612_s2 + $0x2d0] sm:$0xff]  ;;  %v2552_v29 = vsel %vm2547_vm14, %v5486_v31, %v11417_v51 }
 0x27e   :  { %2463 = vmatpush2.msra.mxu1 %v11382_v59  ;;  %4956 = vmatprep.subr.mxu0 %v11342_v15  ;;  %v1558_v15 = vadd.f32 %v4715_v44, %v4680_v1  ;;  %v9031_v44 = vld [vmem:[%s10612_s2 + $0x2b8] sm:$0xff] }
 0x27f   :  { %2464 = vmatprep.subr.mxu1 %v11034_v12  ;;  %4957 = vmatpush3.msra.mxu0 %v11344_v5  ;;  %v1070_v63 = vpop.permute.xlu0 %1069  ;;  %v9013_v5 = vld [vmem:[%s10612_s2 + $0x2c8] sm:$0xff]  ;;  %11383 = vst [vmem:[#allocation77_spill] sm:$0xff] %v9031_v44 }
 0x280   :  { %2465 = vmatpush2.msra.mxu1 %v9004_v47  ;;  %2624 = vmatprep.mubr.f32.mxu0 %v2549_v49  ;;  %1073 = vst.msk [vmem:[#allocation2] sm:$0x3] %vm1072_vm4, %v1070_v63  ;;  %v1628_v1 = vadd.f32 %v1627_v48, %v1558_v15  ;;  %v9050_v48 = vld [vmem:[%s10612_s2 + $0x2a8] sm:$0xff]  ;;  %v11404_v49 = vld [vmem:[#allocation39_spill] sm:$0xff] }
 0x281   :  { %2700 = vmatprep.subr.mxu0 %v11034_v12  ;;  %2466 = vmatprep.subr.mxu1 %v11034_v12  ;;  %11385 = vst [vmem:[#allocation80_spill] sm:$0xff] %v9050_v48  ;;  %v11407_v15 = vld [vmem:[#allocation73_spill] sm:$0xff] }
 0x282   :  { %2625 = vmatmul.mubr.f32.vlgmr.msra.gmra.mxu0 %v2548_v37  ;;  %2467 = vmatpush2.msra.mxu1 %v9013_v5  ;;  %v1638_v34 = vrot.slane %v1628_v1, %v11358_v62  ;;  %v11406_v37 = vld [vmem:[#allocation85_spill] sm:$0xff]  ;;  %v11409_v1 = vld [vmem:[#allocation62_spill] sm:$0xff] }
 0x283   :  { %2701 = vmatpush1.msra.mxu0 %v8879_v14  ;;  %2468 = vmatprep.subr.mxu1 %v11034_v12  ;;  %v10892_v63 = vunpack.i.l.bf16 %v11406_v37  ;;  %v5490_v37 = vunpack.i.l.bf16 %v8778_v30 }
 0x284   :  { %2702 = vmatprep.subr.mxu0 %v11034_v12  ;;  %2469 = vmatpush2.msra.mxu1 %v9022_v46 }
 0x285   :  { %2703 = vmatpush1.msra.mxu0 %v8891_v0  ;;  %2470 = vmatprep.subr.mxu1 %v11034_v12 }
 0x286   :  { %2704 = vmatprep.subr.mxu0 %v11034_v12  ;;  %2471 = vmatpush2.msra.mxu1 %v9031_v44 }
 0x287   :  { %2705 = vmatpush1.msra.mxu0 %v8903_v61  ;;  %2472 = vmatprep.subr.mxu1 %v11034_v12 }
 0x288   :  { %2706 = vmatprep.subr.mxu0 %v11034_v12  ;;  %2473 = vmatpush2.msra.mxu1 %v9040_v17 }
 0x289   :  { %2707 = vmatpush1.msra.mxu0 %v11357_v6  ;;  %2474 = vmatprep.subr.mxu1 %v11034_v12  ;;  %v9059_v6 = vld [vmem:[%s10612_s2 + $0x2a0] sm:$0xff] }
 0x28a   :  { %2708 = vmatprep.subr.mxu0 %v11034_v12  ;;  %2475 = vmatpush2.msra.mxu1 %v9050_v48  ;;  %11386 = vst [vmem:[#allocation81_spill] sm:$0xff] %v9059_v6 }
 0x28b   :  { %2709 = vmatpush1.msra.mxu0 %v11360_v32  ;;  %2476 = vmatprep.subr.mxu1 %v11034_v12  ;;  %v9070_v32 = vld [vmem:[%s10612_s2 + $0x298] sm:$0xff] }
 0x28c   :  { %2710 = vmatprep.subr.mxu0 %v11034_v12  ;;  %2477 = vmatpush2.msra.mxu1 %v9059_v6  ;;  %11387 = vst [vmem:[#allocation82_spill] sm:$0xff] %v9070_v32 }
 0x28d   :  { %2711 = vmatpush1.msra.mxu0 %v11362_v25  ;;  %1639 = vrot.lane.b32.xlu1 %v1638_v34, %s5878_s0  ;;  %v9079_v25 = vld [vmem:[%s10612_s2 + $0x290] sm:$0xff]  ;;  %v10893_v34 = vunpack.i.h.bf16 %v11409_v1 }
 0x28e   :  { %2712 = vmatprep.subr.mxu0 %v11034_v12  ;;  %2478 = vmatprep.subr.mxu1 %v11034_v12  ;;  %11388 = vst [vmem:[#allocation24_spill] sm:$0xff] %v9079_v25 }
 0x28f   :  { %2713 = vmatpush1.msra.mxu0 %v11364_v55  ;;  %2479 = vmatpush2.msra.mxu1 %v9070_v32  ;;  %v11389_v55 = vld [vmem:[#allocation11_spill] sm:$0xff] }
 0x290   :  { %2714 = vmatprep.subr.mxu0 %v11034_v12  ;;  %2480 = vmatprep.subr.mxu1 %v11034_v12  ;;  %v2274_v2 = vsel %vm2268_vm1, %v11389_v55, %v8754_v35  ;;  %v11392_v35 = vunpack.i.h.bf16 %v8725_v9  ;;  %v11393_v9 = vld [vmem:[#allocation31_spill] sm:$0xff] }
 0x291   :  { %2715 = vmatpush1.msra.mxu0 %v11365_v38  ;;  %2481 = vmatpush2.msra.mxu1 %v9079_v25  ;;  %v9091_v38 = vld [vmem:[%s10612_s2 + $0x288] sm:$0xff] }
 0x292   :  { %2716 = vmatprep.subr.mxu0 %v11034_v12  ;;  %2482 = vmatprep.subr.mxu1 %v11034_v12  ;;  %11390 = vst [vmem:[#allocation44_spill] sm:$0xff] %v9091_v38 }
 0x293   :  { %2717 = vmatpush1.msra.mxu0 %v11368_v58  ;;  %2483 = vmatpush2.msra.mxu1 %v9091_v38  ;;  %v2273_v58 = vsel %vm2268_vm1, %v11392_v35, %v11389_v55  ;;  %v11410_v55 = vld [vmem:[#allocation50_spill] sm:$0xff]  ;;  %v11412_v35 = vld [vmem:[#allocation51_spill] sm:$0xff] }
 0x294   :  { %2718 = vmatprep.subr.mxu0 %v11034_v12  ;;  %2484 = vmatprep.subr.mxu1 %v11034_v12 }
 0x295   :  { %2719 = vmatpush1.msra.mxu0 %v11369_v50  ;;  %2485 = vmatpush2.msra.mxu1 %v9100_v7  ;;  %v11394_v50 = vld [vmem:[#allocation41_spill] sm:$0xff] }
 0x296   :  { %4338 = vmatprep.mubr.msk.f32.mxu1 %vm268_vm6, %v2274_v2  ;;  %2720 = vmatprep.subr.mxu0 %v11034_v12  ;;  %v11411_v2 = vld [vmem:[#allocation68_spill] sm:$0xff] }
 0x297   :  { %2487 = vmatmul.mubr.f32.vlgmr.msra.gmra.mxu1 %v2273_v58  ;;  %4961 = vmatprep.subr.mxu1 %v8472_v10  ;;  %v9164_v58 = vsel %vm3120_vm7, %v10893_v34, %v10892_v63  ;;  %v11415_v63 = vunpack.i.l.bf16 %v11414_v43  ;;  %v9192_v43 = vld [vmem:[%s10612_s2 + $0xf8] sm:$0xff] }
 0x298   :  { %2721 = vmatpush1.msra.mxu0 %v11370_v40  ;;  %4962 = vmatpush3.msra.mxu1 %v8484_v19  ;;  %v11395_v40 = vld [vmem:[#allocation18_spill] sm:$0xff]  ;;  %11413 = vst [vmem:[#allocation32_spill] sm:$0xff] %v9164_v58  ;;  %v9230_v58 = vld [vmem:[%s10612_s2 + $0x68] sm:$0xff] }
 0x299   :  { %2722 = vmatprep.subr.mxu0 %v11034_v12  ;;  %4963 = vmatprep.subr.mxu1 %v8491_v57  ;;  %v2551_v34 = vsel %vm2547_vm14, %v11415_v63, %v5486_v31  ;;  %v9199_v63 = vld [vmem:[%s10612_s2 + $0x78] sm:$0xff]  ;;  %v9244_v31 = vld [vmem:[%s10612_s2 + $0x60] sm:$0xff]  ;;  %v4783_v26 = vpop.f32.mrf.mxu0  ;;  %vm4303_vm14 = vcmask 240642  }
 0x29a   :  { %2723 = vmatpush1.msra.mxu0 %v11372_v23  ;;  %4964 = vmatpush3.msra.mxu1 %v8503_v39  ;;  %v11396_v23 = vld [vmem:[#allocation22_spill] sm:$0xff] }
 0x29b   :  { %2724 = vmatprep.subr.mxu0 %v11034_v12  ;;  %4965 = vmatprep.subr.mxu1 %v8510_v20 }
 0x29c   :  { %2725 = vmatpush1.msra.mxu0 %v11373_v41  ;;  %4966 = vmatpush3.msra.mxu1 %v8522_v53  ;;  %v11397_v41 = vld [vmem:[#allocation26_spill] sm:$0xff] }
 0x29d   :  { %2726 = vmatprep.subr.mxu0 %v11034_v12  ;;  %4967 = vmatprep.subr.mxu1 %v11393_v9 }
 0x29e   :  { %2727 = vmatpush1.msra.mxu0 %v11375_v18  ;;  %4968 = vmatpush3.msra.mxu1 %v11394_v50  ;;  %v11399_v18 = vld [vmem:[#allocation49_spill] sm:$0xff] }
 0x29f   :  { %2728 = vmatprep.subr.mxu0 %v11034_v12  ;;  %4969 = vmatprep.subr.mxu1 %v11395_v40 }
 0x2a0   :  { %2729 = vmatpush1.msra.mxu0 %v11376_v11  ;;  %4970 = vmatpush3.msra.mxu1 %v11396_v23  ;;  %v11401_v11 = vld [vmem:[#allocation59_spill] sm:$0xff] }
 0x2a1   :  { %2730 = vmatprep.subr.mxu0 %v11034_v12  ;;  %4971 = vmatprep.subr.mxu1 %v11397_v41 }
 0x2a2   :  { %2731 = vmatpush1.msra.mxu0 %v11379_v21  ;;  %4972 = vmatpush3.msra.mxu1 %v11398_v27  ;;  %v11403_v21 = vld [vmem:[#allocation54_spill] sm:$0xff] }
 0x2a3   :  { %2738 = vmatprep.subr.mxu0 %v11034_v12  ;;  %4973 = vmatprep.subr.mxu1 %v11399_v18 }
 0x2a4   :  { %4340 = vmatpush2.msk.msra.mxu0 %vm271_vm5, %v11380_v45  ;;  %4974 = vmatpush3.msra.mxu1 %v11400_v22  ;;  %v11405_v45 = vld [vmem:[#allocation56_spill] sm:$0xff] }
 0x2a5   :  { %2740 = vmatprep.subr.mxu0 %v11034_v12  ;;  %4975 = vmatprep.subr.mxu1 %v11401_v11 }
 0x2a6   :  { %2741 = vmatpush2.msra.mxu0 %v11382_v59  ;;  %4976 = vmatpush3.msra.mxu1 %v11402_v8  ;;  %v11408_v59 = vld [vmem:[#allocation46_spill] sm:$0xff] }
 0x2a7   :  { %2742 = vmatprep.subr.mxu0 %v11034_v12  ;;  %4977 = vmatprep.subr.mxu1 %v11403_v21 }
 0x2a8   :  { %2743 = vmatpush2.msra.mxu0 %v9004_v47  ;;  %4978 = vmatpush3.msra.mxu1 %v11404_v49 }
 0x2a9   :  { %2744 = vmatprep.subr.mxu0 %v11034_v12  ;;  %4979 = vmatprep.subr.mxu1 %v11405_v45 }
 0x2aa   :  { %2745 = vmatpush2.msra.mxu0 %v9013_v5  ;;  %4980 = vmatpush3.msra.mxu1 %v11407_v15 }
 0x2ab   :  { %2746 = vmatprep.subr.mxu0 %v11034_v12  ;;  %4981 = vmatprep.subr.mxu1 %v11408_v59 }
 0x2ac   :  { %2747 = vmatpush2.msra.mxu0 %v9022_v46  ;;  %4982 = vmatpush3.msra.mxu1 %v11410_v55 }
 0x2ad   :  { %2748 = vmatprep.subr.mxu0 %v11034_v12  ;;  %4983 = vmatprep.subr.mxu1 %v11411_v2 }
 0x2ae   :  { %2749 = vmatpush2.msra.mxu0 %v9031_v44  ;;  %4984 = vmatpush3.msra.mxu1 %v11412_v35 }
 0x2af   :  { %2750 = vmatprep.subr.mxu0 %v11034_v12  ;;  %4985 = vmatprep.subr.mxu1 %v8692_v54 }
 0x2b0   :  { %2751 = vmatpush2.msra.mxu0 %v9040_v17  ;;  %4986 = vmatpush3.msra.mxu1 %v8700_v24  ;;  %v11426_v17 = vld [vmem:[#allocation21_spill] sm:$0xff] }
 0x2b1   :  { %2752 = vmatprep.subr.mxu0 %v11034_v12  ;;  %4987 = vmatprep.subr.mxu1 %v8707_v42 }
 0x2b2   :  { %2753 = vmatpush2.msra.mxu0 %v9050_v48  ;;  %4988 = vmatpush3.msra.mxu1 %v11345_v52 }
 0x2b3   :  { %2754 = vmatprep.subr.mxu0 %v11034_v12  ;;  %4989 = vmatprep.subr.mxu1 %v11346_v4 }
 0x2b4   :  { %2755 = vmatpush2.msra.mxu0 %v9059_v6  ;;  %4990 = vmatpush3.msra.mxu1 %v11352_v33 }
 0x2b5   :  { %2756 = vmatprep.subr.mxu0 %v11034_v12  ;;  %4991 = vmatprep.subr.mxu1 %v11354_v28 }
 0x2b6   :  { %2757 = vmatpush2.msra.mxu0 %v9070_v32  ;;  %4992 = vmatpush3.msra.mxu1 %v8746_v16  ;;  %v11424_v32 = vld [vmem:[#allocation12_spill] sm:$0xff] }
 0x2b7   :  { %2694 = vmatprep.mubr.f32.mxu1 %v2551_v34  ;;  %2758 = vmatprep.subr.mxu0 %v11034_v12  ;;  %v9213_v34 = vld [vmem:[%s10612_s2 + $0x70] sm:$0xff] }
 0x2b8   :  { %2695 = vmatmul.mubr.f32.vlgmr.msra.gmra.mxu1 %v11416_v56  ;;  %2759 = vmatpush2.msra.mxu0 %v9079_v25  ;;  %v9206_v56 = vld [vmem:[%s10612_s2 + $0xf0] sm:$0xff] }
 0x2b9   :  { %4996 = vmatprep.subr.mxu1 %v9192_v43  ;;  %2760 = vmatprep.subr.mxu0 %v11034_v12 }
 0x2ba   :  { %4997 = vmatpush3.msra.mxu1 %v9199_v63  ;;  %2761 = vmatpush2.msra.mxu0 %v9091_v38  ;;  %v11423_v38 = vunpack.i.h.bf16 %v8778_v30  ;;  %v2834_v30 = vsel %vm2833_vm15, %v11426_v17, %v5490_v37  ;;  %v11428_v17 = vmov 0 }
 0x2bb   :  { %4998 = vmatprep.subr.mxu1 %v9206_v56  ;;  %2762 = vmatprep.subr.mxu0 %v11034_v12  ;;  %v11429_v17 = vsel %vm9426_vm11, 4294967295, %v11428_v17 }
 0x2bc   :  { %4999 = vmatpush3.msra.mxu1 %v9213_v34  ;;  %2763 = vmatpush2.msra.mxu0 %v9100_v7  ;;  %v4784_v7 = vpop.f32.mrf.mxu0  ;;  %11430 = vst [vmem:[#allocation78_spill] sm:$0xff] %v11429_v17 }
 0x2bd   :  { %4341 = vmatprep.mubr.msk.f32.mxu0 %vm268_vm6, %v11417_v51  ;;  %5000 = vmatprep.subr.mxu1 %v9224_v3  ;;  %v9237_v51 = vld [vmem:[%s10612_s2 + $0xe0] sm:$0xff]  ;;  %v4785_v48 = vadd.f32 %v4784_v7, %v4783_v26 }
 0x2be   :  { %2765 = vmatmul.mubr.f32.vlgmr.msra.gmra.mxu0 %v2552_v29  ;;  %5001 = vmatpush3.msra.mxu1 %v9230_v58  ;;  %v9293_v29 = vld [vmem:[%s10612_s2 + $0xc0] sm:$0xff] }
 0x2bf   :  { %5031 = vmatprep.subr.mxu0 %v8472_v10  ;;  %5002 = vmatprep.subr.mxu1 %v9237_v51  ;;  %v9251_v10 = vld [vmem:[%s10612_s2 + $0xd8] sm:$0xff] }
 0x2c0   :  { %5032 = vmatpush3.msra.mxu0 %v8484_v19  ;;  %5003 = vmatpush3.msra.mxu1 %v9244_v31  ;;  %v9258_v19 = vld [vmem:[%s10612_s2 + $0x58] sm:$0xff] }
 0x2c1   :  { %5033 = vmatprep.subr.mxu0 %v8491_v57  ;;  %5004 = vmatprep.subr.mxu1 %v9251_v10  ;;  %v9265_v57 = vld [vmem:[%s10612_s2 + $0xd0] sm:$0xff] }
 0x2c2   :  { %5034 = vmatpush3.msra.mxu0 %v8503_v39  ;;  %5005 = vmatpush3.msra.mxu1 %v9258_v19  ;;  %v9272_v39 = vld [vmem:[%s10612_s2 + $0x50] sm:$0xff] }
 0x2c3   :  { %5035 = vmatprep.subr.mxu0 %v8510_v20  ;;  %5006 = vmatprep.subr.mxu1 %v9265_v57  ;;  %v9279_v20 = vld [vmem:[%s10612_s2 + $0xc8] sm:$0xff] }
 0x2c4   :  { %5036 = vmatpush3.msra.mxu0 %v8522_v53  ;;  %5007 = vmatpush3.msra.mxu1 %v9272_v39  ;;  %v9286_v53 = vld [vmem:[%s10612_s2 + $0x48] sm:$0xff] }
 0x2c5   :  { %5037 = vmatprep.subr.mxu0 %v11393_v9  ;;  %5008 = vmatprep.subr.mxu1 %v9279_v20  ;;  %v9300_v9 = vld [vmem:[%s10612_s2 + $0x40] sm:$0xff] }
 0x2c6   :  { %5038 = vmatpush3.msra.mxu0 %v11394_v50  ;;  %5009 = vmatpush3.msra.mxu1 %v9286_v53  ;;  %v9307_v50 = vld [vmem:[%s10612_s2 + $0xb8] sm:$0xff] }
 0x2c7   :  { %5039 = vmatprep.subr.mxu0 %v11395_v40  ;;  %5010 = vmatprep.subr.mxu1 %v9293_v29  ;;  %v9314_v40 = vld [vmem:[%s10612_s2 + $0x38] sm:$0xff] }
 0x2c8   :  { %5040 = vmatpush3.msra.mxu0 %v11396_v23  ;;  %5011 = vmatpush3.msra.mxu1 %v9300_v9  ;;  %v9321_v23 = vld [vmem:[%s10612_s2 + $0xb0] sm:$0xff] }
 0x2c9   :  { %5041 = vmatprep.subr.mxu0 %v11397_v41  ;;  %5012 = vmatprep.subr.mxu1 %v9307_v50  ;;  %v9328_v41 = vld [vmem:[%s10612_s2 + $0x30] sm:$0xff] }
 0x2ca   :  { %5042 = vmatpush3.msra.mxu0 %v11398_v27  ;;  %5013 = vmatpush3.msra.mxu1 %v9314_v40  ;;  %v9335_v27 = vld [vmem:[%s10612_s2 + $0xa8] sm:$0xff] }
 0x2cb   :  { %5043 = vmatprep.subr.mxu0 %v11399_v18  ;;  %5014 = vmatprep.subr.mxu1 %v9321_v23  ;;  %v9342_v18 = vld [vmem:[%s10612_s2 + $0x28] sm:$0xff] }
 0x2cc   :  { %5044 = vmatpush3.msra.mxu0 %v11400_v22  ;;  %5015 = vmatpush3.msra.mxu1 %v9328_v41  ;;  %v9349_v22 = vld [vmem:[%s10612_s2 + $0xa0] sm:$0xff] }
 0x2cd   :  { %5045 = vmatprep.subr.mxu0 %v11401_v11  ;;  %5016 = vmatprep.subr.mxu1 %v9335_v27  ;;  %v4748_v11 = vpop.f32.mrf.mxu1 }
 0x2ce   :  { %5046 = vmatpush3.msra.mxu0 %v11402_v8  ;;  %5017 = vmatpush3.msra.mxu1 %v9342_v18  ;;  %v9356_v8 = vld [vmem:[%s10612_s2 + $0x20] sm:$0xff] }
 0x2cf   :  { %5047 = vmatprep.subr.mxu0 %v11403_v21  ;;  %5018 = vmatprep.subr.mxu1 %v9349_v22  ;;  %v9363_v21 = vld [vmem:[%s10612_s2 + $0x98] sm:$0xff]  ;;  %v4749_v36 = vpop.f32.mrf.mxu1 }
 0x2d0   :  { %5048 = vmatpush3.msra.mxu0 %v11404_v49  ;;  %5019 = vmatpush3.msra.mxu1 %v9356_v8  ;;  %v9371_v49 = vld [vmem:[%s10612_s2 + $0x18] sm:$0xff] }
 0x2d1   :  { %5049 = vmatprep.subr.mxu0 %v11405_v45  ;;  %5020 = vmatprep.subr.mxu1 %v9363_v21  ;;  %11418 = vst [vmem:[#allocation36_spill] sm:$0xff] %v9371_v49  ;;  %v9378_v45 = vld [vmem:[%s10612_s2 + $0x90] sm:$0xff] }
 0x2d2   :  { %5050 = vmatpush3.msra.mxu0 %v11407_v15  ;;  %5021 = vmatpush3.msra.mxu1 %v9371_v49  ;;  %11419 = vst [vmem:[#allocation37_spill] sm:$0xff] %v9378_v45  ;;  %v9385_v15 = vld [vmem:[%s10612_s2 + $0x10] sm:$0xff] }
 0x2d3   :  { %5051 = vmatprep.subr.mxu0 %v11408_v59  ;;  %5022 = vmatprep.subr.mxu1 %v9378_v45  ;;  %11420 = vst [vmem:[#allocation8_spill] sm:$0xff] %v9385_v15  ;;  %v9392_v59 = vld [vmem:[%s10612_s2 + $0x88] sm:$0xff] }
 0x2d4   :  { %5052 = vmatpush3.msra.mxu0 %v11410_v55  ;;  %5023 = vmatpush3.msra.mxu1 %v9385_v15  ;;  %11421 = vst [vmem:[#allocation33_spill] sm:$0xff] %v9392_v59  ;;  %v9399_v55 = vld [vmem:[%s10612_s2 + $0x8] sm:$0xff] }
 0x2d5   :  { %5053 = vmatprep.subr.mxu0 %v11411_v2  ;;  %5024 = vmatprep.subr.mxu1 %v9392_v59  ;;  %11422 = vst [vmem:[#allocation10_spill] sm:$0xff] %v9399_v55  ;;  %v2835_v2 = vsel %vm2833_vm15, %v5490_v37, %v11423_v38  ;;  %v9420_v38 = vld [vmem:[%s10612_s2] sm:$0xff] }
 0x2d6   :  { %5054 = vmatpush3.msra.mxu0 %v11412_v35  ;;  %5025 = vmatpush3.msra.mxu1 %v9399_v55  ;;  %v1914_v25 = vpop.f32.mrf.mxu1  ;;  %v9411_v35 = vld [vmem:[%s10612_s2 + $0x80] sm:$0xff]  ;;  %11427 = vst [vmem:[#allocation53_spill] sm:$0xff] %v9420_v38 }
 0x2d7   :  { %5055 = vmatprep.subr.mxu0 %v8692_v54  ;;  %11425 = vst [vmem:[#allocation42_spill] sm:$0xff] %v9411_v35  ;;  %5026 = vmatprep.subr.mxu1 %v9411_v35 }
 0x2d8   :  { %5056 = vmatpush3.msra.mxu0 %v8700_v24  ;;  %5027 = vmatpush3.msra.mxu1 %v9420_v38  ;;  %v1347_v54 = vpop.permute.xlu0 %1346  ;;  %v1916_v6 = vpop.f32.mrf.mxu1  ;;  %v4750_v24 = vadd.f32 %v4749_v36, %v4748_v11  ;;  %v11435_v36 = vunpack.i.l.bf16 %v8097_v13  ;;  %v9501_v11 = vld [vmem:[%s10612_s2 + $0x240] sm:$0xff] }
 0x2d9   :  { %2911 = vmatprep.mubr.f32.mxu1 %v2835_v2  ;;  %5057 = vmatprep.subr.mxu0 %v8707_v42  ;;  %v1348_v44 = vrot.slane %v1347_v54, 6  ;;  %v11431_v6 = vunpack.i.l.bf16 %v11356_v60  ;;  %v11432_v42 = vunpack.i.h.bf16 %v11424_v32  ;;  %11441 = vst [vmem:[#allocation40_spill] sm:$0xff] %v9501_v11  ;;  %v9510_v2 = vld [vmem:[%s10612_s2 + $0x238] sm:$0xff] }
 0x2da   :  { %2912 = vmatmul.mubr.f32.vlgmr.msra.gmra.mxu1 %v2834_v30  ;;  %5058 = vmatpush3.msra.mxu0 %v11345_v52  ;;  %v11434_v52 = vunpack.i.h.bf16 %v8097_v13  ;;  %v9463_v13 = vld [vmem:[%s10612_s2 + $0x260] sm:$0xff]  ;;  %11442 = vst [vmem:[#allocation38_spill] sm:$0xff] %v9510_v2  ;;  %v9519_v30 = vld [vmem:[%s10612_s2 + $0x230] sm:$0xff] }
 0x2db   :  { %2987 = vmatprep.subr.mxu1 %v11034_v12  ;;  %5059 = vmatprep.subr.mxu0 %v11346_v4  ;;  %v1350_v26 = vsel %vm1349_vm10, %v1348_v44, %v1347_v54  ;;  %v9439_v7 = vsel %vm3407_vm2, %v11432_v42, %v11431_v6  ;;  %v1845_v4 = vadd.f32 %v4785_v48, %v4750_v24  ;;  %v11436_v44 = vld [vmem:[#allocation64_spill] sm:$0xff]  ;;  %v9482_v48 = vld [vmem:[%s10612_s2 + $0x250] sm:$0xff]  ;;  %v4818_v6 = vpop.f32.mrf.mxu0 }
 0x2dc   :  { %11433 = vst [vmem:[#allocation57_spill] sm:$0xff] %v9439_v7  ;;  %2988 = vmatpush1.msra.mxu1 %v8879_v14  ;;  %5060 = vmatpush3.msra.mxu0 %v11352_v33  ;;  %v2837_v37 = vsel %vm2833_vm15, %v11435_v36, %v11434_v52  ;;  %1355 = vst.msk [vmem:[#allocation2] sm:$0xf] %vm9426_vm11, %v1350_v26  ;;  %v9528_v54 = vld [vmem:[%s10612_s2 + $0x228] sm:$0xff]  ;;  %v9537_v24 = vld [vmem:[%s10612_s2 + $0x220] sm:$0xff]  ;;  %v11451_v7 = vunpack.i.h.bf16 %v11409_v1 }
 0x2dd   :  { %2989 = vmatprep.subr.mxu1 %v11034_v12  ;;  %5061 = vmatprep.subr.mxu0 %v11354_v28  ;;  %v1915_v33 = vadd.f32 %v1914_v25, %v1845_v4  ;;  %11437 = vst [vmem:[#allocation60_spill] sm:$0xff] %v9463_v13  ;;  %v9473_v28 = vld [vmem:[%s10612_s2 + $0x258] sm:$0xff]  ;;  %11439 = vst [vmem:[#allocation6_spill] sm:$0xff] %v9482_v48  ;;  %v9492_v25 = vld [vmem:[%s10612_s2 + $0x248] sm:$0xff]  ;;  %v4819_v4 = vpop.f32.mrf.mxu0 }
 0x2de   :  { %2990 = vmatpush1.msra.mxu1 %v8891_v0  ;;  %5062 = vmatpush3.msra.mxu0 %v8746_v16  ;;  %11438 = vst [vmem:[#allocation48_spill] sm:$0xff] %v9473_v28  ;;  %11440 = vst [vmem:[#allocation9_spill] sm:$0xff] %v9492_v25  ;;  %v9546_v26 = vld [vmem:[%s10612_s2 + $0x218] sm:$0xff]  ;;  %v9555_v42 = vld [vmem:[%s10612_s2 + $0x210] sm:$0xff] }
 0x2df   :  { %2981 = vmatprep.mubr.f32.mxu0 %v2837_v37  ;;  %2991 = vmatprep.subr.mxu1 %v11034_v12  ;;  %v1925_v16 = vrot.slane %v1915_v33, %v11358_v62  ;;  %11443 = vst [vmem:[#allocation15_spill] sm:$0xff] %v9519_v30  ;;  %11444 = vst [vmem:[#allocation19_spill] sm:$0xff] %v9528_v54  ;;  %v9564_v36 = vld [vmem:[%s10612_s2 + $0x208] sm:$0xff]  ;;  %v5500_v37 = vunpack.i.l.bf16 %v11409_v1  ;;  %v9574_v33 = vld [vmem:[%s10612_s2 + $0x200] sm:$0xff] }
 0x2e0   :  { %2982 = vmatmul.mubr.f32.vlgmr.msra.gmra.mxu0 %v11436_v44  ;;  %2992 = vmatpush1.msra.mxu1 %v8903_v61  ;;  %11445 = vst [vmem:[#allocation23_spill] sm:$0xff] %v9537_v24  ;;  %11446 = vst [vmem:[#allocation27_spill] sm:$0xff] %v9546_v26  ;;  %v11453_v1 = vld [vmem:[#allocation29_spill] sm:$0xff] }
 0x2e1   :  { %5066 = vmatprep.subr.mxu0 %v9192_v43  ;;  %2993 = vmatprep.subr.mxu1 %v11034_v12  ;;  %11447 = vst [vmem:[#allocation58_spill] sm:$0xff] %v9555_v42  ;;  %11448 = vst [vmem:[#allocation14_spill] sm:$0xff] %v9564_v36  ;;  %v3122_v60 = vsel %vm3120_vm7, %v5500_v37, %v11451_v7  ;;  %v3121_v7 = vsel %vm3120_vm7, %v11453_v1, %v5500_v37  ;;  %v11464_v1 = vld [vmem:[#allocation72_spill] sm:$0xff] }
 0x2e2   :  { %5067 = vmatpush3.msra.mxu0 %v9199_v63  ;;  %2994 = vmatpush1.msra.mxu1 %v9463_v13  ;;  %11449 = vst [vmem:[#allocation55_spill] sm:$0xff] %v9574_v33 }
 0x2e3   :  { %5068 = vmatprep.subr.mxu0 %v9206_v56  ;;  %2995 = vmatprep.subr.mxu1 %v11034_v12 }
 0x2e4   :  { %5069 = vmatpush3.msra.mxu0 %v9213_v34  ;;  %2996 = vmatpush1.msra.mxu1 %v9473_v28 }
 0x2e5   :  { %5070 = vmatprep.subr.mxu0 %v9224_v3  ;;  %2997 = vmatprep.subr.mxu1 %v11034_v12 }
 0x2e6   :  { %5071 = vmatpush3.msra.mxu0 %v9230_v58  ;;  %2998 = vmatpush1.msra.mxu1 %v9482_v48 }
 0x2e7   :  { %5072 = vmatprep.subr.mxu0 %v9237_v51  ;;  %1926 = vrot.lane.b32.xlu1 %v1925_v16, %s5879_s1  ;;  %v9583_v16 = vld [vmem:[%s10612_s2 + $0x2e0] sm:$0xf] }
 0x2e8   :  { %2999 = vmatprep.subr.mxu1 %v11034_v12  ;;  %5073 = vmatpush3.msra.mxu0 %v9244_v31  ;;  %11450 = vst [vmem:[#allocation13_spill] sm:$0xff] %v9583_v16 }
 0x2e9   :  { %3000 = vmatpush1.msra.mxu1 %v9492_v25  ;;  %5074 = vmatprep.subr.mxu0 %v9251_v10 }
 0x2ea   :  { %3001 = vmatprep.subr.mxu1 %v11034_v12  ;;  %5075 = vmatpush3.msra.mxu0 %v9258_v19 }
 0x2eb   :  { %3002 = vmatpush1.msra.mxu1 %v9501_v11  ;;  %5076 = vmatprep.subr.mxu0 %v9265_v57 }
 0x2ec   :  { %3003 = vmatprep.subr.mxu1 %v11034_v12  ;;  %5077 = vmatpush3.msra.mxu0 %v9272_v39 }
 0x2ed   :  { %3004 = vmatpush1.msra.mxu1 %v9510_v2  ;;  %5078 = vmatprep.subr.mxu0 %v9279_v20 }
 0x2ee   :  { %3005 = vmatprep.subr.mxu1 %v11034_v12  ;;  %5079 = vmatpush3.msra.mxu0 %v9286_v53 }
 0x2ef   :  { %3006 = vmatpush1.msra.mxu1 %v9519_v30  ;;  %5080 = vmatprep.subr.mxu0 %v9293_v29 }
 0x2f0   :  { %3007 = vmatprep.subr.mxu1 %v11034_v12  ;;  %5081 = vmatpush3.msra.mxu0 %v9300_v9 }
 0x2f1   :  { %3008 = vmatpush1.msra.mxu1 %v9528_v54  ;;  %5082 = vmatprep.subr.mxu0 %v9307_v50 }
 0x2f2   :  { %3009 = vmatprep.subr.mxu1 %v11034_v12  ;;  %5083 = vmatpush3.msra.mxu0 %v9314_v40 }
 0x2f3   :  { %3010 = vmatpush1.msra.mxu1 %v9537_v24  ;;  %5084 = vmatprep.subr.mxu0 %v9321_v23 }
 0x2f4   :  { %3011 = vmatprep.subr.mxu1 %v11034_v12  ;;  %5085 = vmatpush3.msra.mxu0 %v9328_v41 }
 0x2f5   :  { %3012 = vmatpush1.msra.mxu1 %v9546_v26  ;;  %5086 = vmatprep.subr.mxu0 %v9335_v27 }
 0x2f6   :  { %3013 = vmatprep.subr.mxu1 %v11034_v12  ;;  %5087 = vmatpush3.msra.mxu0 %v9342_v18 }
 0x2f7   :  { %3014 = vmatpush1.msra.mxu1 %v9555_v42  ;;  %5088 = vmatprep.subr.mxu0 %v9349_v22  ;;  %v4853_v52 = vpop.f32.mrf.mxu1 }
 0x2f8   :  { %3015 = vmatprep.subr.mxu1 %v11034_v12  ;;  %5089 = vmatpush3.msra.mxu0 %v9356_v8 }
 0x2f9   :  { %3016 = vmatpush1.msra.mxu1 %v9564_v36  ;;  %5090 = vmatprep.subr.mxu0 %v9363_v21  ;;  %v4854_v44 = vpop.f32.mrf.mxu1 }
 0x2fa   :  { %3017 = vmatprep.subr.mxu1 %v11034_v12  ;;  %5091 = vmatpush3.msra.mxu0 %v9371_v49  ;;  %v4855_v32 = vadd.f32 %v4854_v44, %v4853_v52  ;;  %v4820_v49 = vadd.f32 %v4819_v4, %v4818_v6  ;;  %v11461_v6 = vld [vmem:[#allocation61_spill] sm:$0xff]  ;;  %v11462_v4 = vld [vmem:[#allocation44_spill] sm:$0xff] }
 0x2fb   :  { %3018 = vmatpush1.msra.mxu1 %v9574_v33  ;;  %5092 = vmatprep.subr.mxu0 %v9378_v45  ;;  %v11463_v44 = vld [vmem:[#allocation28_spill] sm:$0xff] }
 0x2fc   :  { %3025 = vmatprep.subr.mxu1 %v11034_v12  ;;  %5093 = vmatpush3.msra.mxu0 %v9385_v15  ;;  %v9596_v15 = vld [vmem:[%s10612_s2 + $0x2d8] sm:$0xff]  ;;  %v2132_v52 = vadd.f32 %v4855_v32, %v4820_v49 }
 0x2fd   :  { %4342 = vmatpush2.msk.msra.mxu1 %vm271_vm5, %v9583_v16  ;;  %5094 = vmatprep.subr.mxu0 %v9392_v59  ;;  %v2201_v17 = vpop.f32.mrf.mxu0  ;;  %11452 = vst [vmem:[#allocation30_spill] sm:$0xff] %v9596_v15  ;;  %v11458_v49 = vld [vmem:[#allocation82_spill] sm:$0xff] }
 0x2fe   :  { %3027 = vmatprep.subr.mxu1 %v11034_v12  ;;  %5095 = vmatpush3.msra.mxu0 %v9399_v55  ;;  %v11485_v55 = vld [vmem:[#allocation85_spill] sm:$0xff] }
 0x2ff   :  { %3028 = vmatpush2.msra.mxu1 %v9596_v15  ;;  %5096 = vmatprep.subr.mxu0 %v9411_v35  ;;  %v1640_v59 = vpop.permute.xlu1 %1639  ;;  %v2203_v45 = vpop.f32.mrf.mxu0 }
 0x300   :  { %3029 = vmatprep.subr.mxu1 %v11034_v12  ;;  %5097 = vmatpush3.msra.mxu0 %v9420_v38  ;;  %1642 = vst.msk [vmem:[#allocation2 + $0x2] sm:$0x3] %vm496_vm13, %v1640_v59  ;;  %v11454_v45 = vld [vmem:[#allocation77_spill] sm:$0xff]  ;;  %v11459_v59 = vld [vmem:[#allocation24_spill] sm:$0xff] }
 0x301   :  { %3030 = vmatpush2.msra.mxu1 %v9004_v47  ;;  %3198 = vmatprep.mubr.f32.mxu0 %v3122_v60  ;;  %v2202_v60 = vadd.f32 %v2201_v17, %v2132_v52  ;;  %v11460_v17 = vld [vmem:[#allocation25_spill] sm:$0xff]  ;;  %v9664_v52 = vld [vmem:[%s10612_s2 + $0x178] sm:$0xff] }
 0x302   :  { %3274 = vmatprep.subr.mxu0 %v11034_v12  ;;  %3031 = vmatprep.subr.mxu1 %v11034_v12  ;;  %v2839_v37 = vsel %vm2833_vm15, %v11461_v6, %v11460_v17  ;;  %v9685_v17 = vld [vmem:[%s10612_s2 + $0x1e8] sm:$0xff]  ;;  %vm4299_vm15 = vcmask 441344  }
 0x303   :  { %3199 = vmatmul.mubr.f32.vlgmr.msra.gmra.mxu0 %v3121_v7  ;;  %3032 = vmatpush2.msra.mxu1 %v9013_v5  ;;  %v2212_v32 = vrot.slane %v2202_v60, %v11358_v62  ;;  %v9657_v7 = vld [vmem:[%s10612_s2 + $0x1f8] sm:$0xff]  ;;  %v9671_v60 = vld [vmem:[%s10612_s2 + $0x1f0] sm:$0xff]  ;;  %v9692_v6 = vld [vmem:[%s10612_s2 + $0x168] sm:$0xff] }
 0x304   :  { %3275 = vmatpush1.msra.mxu0 %v8879_v14  ;;  %3033 = vmatprep.subr.mxu1 %v11034_v12  ;;  %v11455_v14 = vld [vmem:[#allocation79_spill] sm:$0xff] }
 0x305   :  { %3276 = vmatprep.subr.mxu0 %v11034_v12  ;;  %3034 = vmatpush2.msra.mxu1 %v9022_v46  ;;  %v11478_v62 = vld [vmem:[#allocation67_spill] sm:$0xff] }
 0x306   :  { %3277 = vmatpush1.msra.mxu0 %v8891_v0  ;;  %3035 = vmatprep.subr.mxu1 %v11034_v12  ;;  %v11456_v0 = vld [vmem:[#allocation80_spill] sm:$0xff]  ;;  %v11483_v38 = vunpack.i.h.bf16 %v11478_v62 }
 0x307   :  { %3278 = vmatprep.subr.mxu0 %v11034_v12  ;;  %3036 = vmatpush2.msra.mxu1 %v11454_v45 }
 0x308   :  { %3279 = vmatpush1.msra.mxu0 %v8903_v61  ;;  %3037 = vmatprep.subr.mxu1 %v11034_v12  ;;  %v11457_v61 = vld [vmem:[#allocation81_spill] sm:$0xff] }
 0x309   :  { %3280 = vmatprep.subr.mxu0 %v11034_v12  ;;  %3038 = vmatpush2.msra.mxu1 %v11455_v14 }
 0x30a   :  { %3281 = vmatpush1.msra.mxu0 %v9463_v13  ;;  %3039 = vmatprep.subr.mxu1 %v11034_v12  ;;  %v9814_v13 = vld [vmem:[%s10612_s2 + $0x1a0] sm:$0xff] }
 0x30b   :  { %3282 = vmatprep.subr.mxu0 %v11034_v12  ;;  %3040 = vmatpush2.msra.mxu1 %v11456_v0  ;;  %11480 = vst [vmem:[#allocation54_spill] sm:$0xff] %v9814_v13 }
 0x30c   :  { %3283 = vmatpush1.msra.mxu0 %v9473_v28  ;;  %3041 = vmatprep.subr.mxu1 %v11034_v12  ;;  %v9799_v28 = vld [vmem:[%s10612_s2 + $0x1a8] sm:$0xff] }
 0x30d   :  { %3284 = vmatprep.subr.mxu0 %v11034_v12  ;;  %3042 = vmatpush2.msra.mxu1 %v11457_v61  ;;  %11477 = vst [vmem:[#allocation59_spill] sm:$0xff] %v9799_v28 }
 0x30e   :  { %3285 = vmatpush1.msra.mxu0 %v9482_v48  ;;  %2213 = vrot.lane.b32.xlu0 %v2212_v32, %s5880_s23  ;;  %v9678_v32 = vld [vmem:[%s10612_s2 + $0x170] sm:$0xff] }
 0x30f   :  { %3286 = vmatprep.subr.mxu0 %v11034_v12  ;;  %3043 = vmatprep.subr.mxu1 %v11034_v12 }
 0x310   :  { %3287 = vmatpush1.msra.mxu0 %v9492_v25  ;;  %3044 = vmatpush2.msra.mxu1 %v11458_v49  ;;  %v11475_v25 = vld [vmem:[#allocation87_spill] sm:$0xff] }
 0x311   :  { %3288 = vmatprep.subr.mxu0 %v11034_v12  ;;  %3045 = vmatprep.subr.mxu1 %v11034_v12  ;;  %v11482_v48 = vunpack.i.l.bf16 %v11475_v25  ;;  %v9843_v25 = vld [vmem:[%s10612_s2 + $0x118] sm:$0xff] }
 0x312   :  { %3289 = vmatpush1.msra.mxu0 %v9501_v11  ;;  %3046 = vmatpush2.msra.mxu1 %v11459_v59  ;;  %v9784_v11 = vld [vmem:[%s10612_s2 + $0x1b0] sm:$0xff] }
 0x313   :  { %3290 = vmatprep.subr.mxu0 %v11034_v12  ;;  %3047 = vmatprep.subr.mxu1 %v11034_v12  ;;  %11474 = vst [vmem:[#allocation49_spill] sm:$0xff] %v9784_v11  ;;  %v9829_v35 = vsel %vm3686_vm12, %v11483_v38, %v11482_v48  ;;  %v9850_v38 = vld [vmem:[%s10612_s2 + $0x190] sm:$0xff] }
 0x314   :  { %3291 = vmatpush1.msra.mxu0 %v9510_v2  ;;  %3048 = vmatpush2.msra.mxu1 %v11462_v4  ;;  %v9770_v2 = vld [vmem:[%s10612_s2 + $0x1b8] sm:$0xff]  ;;  %11484 = vst [vmem:[#allocation56_spill] sm:$0xff] %v9829_v35  ;;  %v9857_v48 = vld [vmem:[%s10612_s2 + $0x110] sm:$0xff]  ;;  %v11487_v35 = vunpack.i.l.bf16 %v11485_v55 }
 0x315   :  { %3292 = vmatprep.subr.mxu0 %v11034_v12  ;;  %3049 = vmatprep.subr.mxu1 %v11034_v12  ;;  %11472 = vst [vmem:[#allocation26_spill] sm:$0xff] %v9770_v2  ;;  %11486 = vst [vmem:[#allocation73_spill] sm:$0xff] %v9857_v48 }
 0x316   :  { %3293 = vmatpush1.msra.mxu0 %v9519_v30  ;;  %3050 = vmatpush2.msra.mxu1 %v11463_v44  ;;  %v9756_v30 = vld [vmem:[%s10612_s2 + $0x1c0] sm:$0xff] }
 0x317   :  { %4343 = vmatprep.mubr.msk.f32.mxu1 %vm268_vm6, %v2839_v37  ;;  %3294 = vmatprep.subr.mxu0 %v11034_v12  ;;  %v9699_v37 = vld [vmem:[%s10612_s2 + $0x1e0] sm:$0xff]  ;;  %11470 = vst [vmem:[#allocation18_spill] sm:$0xff] %v9756_v30 }
 0x318   :  { %3052 = vmatmul.mubr.f32.vlgmr.msra.gmra.mxu1 %v11464_v1  ;;  %5101 = vmatprep.subr.mxu1 %v9657_v7  ;;  %v9706_v1 = vld [vmem:[%s10612_s2 + $0x160] sm:$0xff] }
 0x319   :  { %3295 = vmatpush1.msra.mxu0 %v9528_v54  ;;  %5102 = vmatpush3.msra.mxu1 %v9664_v52  ;;  %v9741_v54 = vld [vmem:[%s10612_s2 + $0x1c8] sm:$0xff] }
 0x31a   :  { %3296 = vmatprep.subr.mxu0 %v11034_v12  ;;  %5103 = vmatprep.subr.mxu1 %v9671_v60  ;;  %11468 = vst [vmem:[#allocation31_spill] sm:$0xff] %v9741_v54 }
 0x31b   :  { %3297 = vmatpush1.msra.mxu0 %v9537_v24  ;;  %5104 = vmatpush3.msra.mxu1 %v9678_v32  ;;  %v9727_v24 = vld [vmem:[%s10612_s2 + $0x1d0] sm:$0xff] }
 0x31c   :  { %3298 = vmatprep.subr.mxu0 %v11034_v12  ;;  %5105 = vmatprep.subr.mxu1 %v9685_v17  ;;  %11466 = vst [vmem:[#allocation74_spill] sm:$0xff] %v9727_v24 }
 0x31d   :  { %3299 = vmatpush1.msra.mxu0 %v9546_v26  ;;  %5106 = vmatpush3.msra.mxu1 %v9692_v6  ;;  %v9713_v26 = vld [vmem:[%s10612_s2 + $0x1d8] sm:$0xff] }
 0x31e   :  { %3300 = vmatprep.subr.mxu0 %v11034_v12  ;;  %5107 = vmatprep.subr.mxu1 %v9699_v37 }
 0x31f   :  { %3301 = vmatpush1.msra.mxu0 %v9555_v42  ;;  %5108 = vmatpush3.msra.mxu1 %v9706_v1  ;;  %v9720_v42 = vld [vmem:[%s10612_s2 + $0x158] sm:$0xff] }
 0x320   :  { %3302 = vmatprep.subr.mxu0 %v11034_v12  ;;  %5109 = vmatprep.subr.mxu1 %v9713_v26  ;;  %11465 = vst [vmem:[#allocation52_spill] sm:$0xff] %v9720_v42 }
 0x321   :  { %3303 = vmatpush1.msra.mxu0 %v9564_v36  ;;  %5110 = vmatpush3.msra.mxu1 %v9720_v42  ;;  %v9734_v36 = vld [vmem:[%s10612_s2 + $0x150] sm:$0xff] }
 0x322   :  { %3304 = vmatprep.subr.mxu0 %v11034_v12  ;;  %5111 = vmatprep.subr.mxu1 %v9727_v24  ;;  %11467 = vst [vmem:[#allocation11_spill] sm:$0xff] %v9734_v36 }
 0x323   :  { %3305 = vmatpush1.msra.mxu0 %v9574_v33  ;;  %5112 = vmatpush3.msra.mxu1 %v9734_v36  ;;  %v9749_v33 = vld [vmem:[%s10612_s2 + $0x148] sm:$0xff] }
 0x324   :  { %3312 = vmatprep.subr.mxu0 %v11034_v12  ;;  %5113 = vmatprep.subr.mxu1 %v9741_v54  ;;  %11469 = vst [vmem:[#allocation41_spill] sm:$0xff] %v9749_v33 }
 0x325   :  { %4344 = vmatpush2.msk.msra.mxu0 %vm271_vm5, %v9583_v16  ;;  %5114 = vmatpush3.msra.mxu1 %v9749_v33  ;;  %v9763_v16 = vld [vmem:[%s10612_s2 + $0x140] sm:$0xff] }
 0x326   :  { %3314 = vmatprep.subr.mxu0 %v11034_v12  ;;  %5115 = vmatprep.subr.mxu1 %v9756_v30  ;;  %11471 = vst [vmem:[#allocation22_spill] sm:$0xff] %v9763_v16 }
 0x327   :  { %3315 = vmatpush2.msra.mxu0 %v9596_v15  ;;  %5116 = vmatpush3.msra.mxu1 %v9763_v16  ;;  %v9777_v15 = vld [vmem:[%s10612_s2 + $0x138] sm:$0xff] }
 0x328   :  { %3316 = vmatprep.subr.mxu0 %v11034_v12  ;;  %5117 = vmatprep.subr.mxu1 %v9770_v2  ;;  %11473 = vst [vmem:[#allocation34_spill] sm:$0xff] %v9777_v15 }
 0x329   :  { %3317 = vmatpush2.msra.mxu0 %v9004_v47  ;;  %5118 = vmatpush3.msra.mxu1 %v9777_v15  ;;  %v9792_v47 = vld [vmem:[%s10612_s2 + $0x130] sm:$0xff] }
 0x32a   :  { %3318 = vmatprep.subr.mxu0 %v11034_v12  ;;  %5119 = vmatprep.subr.mxu1 %v9784_v11  ;;  %11476 = vst [vmem:[#allocation70_spill] sm:$0xff] %v9792_v47 }
 0x32b   :  { %3319 = vmatpush2.msra.mxu0 %v9013_v5  ;;  %5120 = vmatpush3.msra.mxu1 %v9792_v47  ;;  %v9807_v5 = vld [vmem:[%s10612_s2 + $0x128] sm:$0xff] }
 0x32c   :  { %3320 = vmatprep.subr.mxu0 %v11034_v12  ;;  %5121 = vmatprep.subr.mxu1 %v9799_v28  ;;  %11479 = vst [vmem:[#allocation76_spill] sm:$0xff] %v9807_v5 }
 0x32d   :  { %3321 = vmatpush2.msra.mxu0 %v9022_v46  ;;  %5122 = vmatpush3.msra.mxu1 %v9807_v5  ;;  %v9821_v46 = vld [vmem:[%s10612_s2 + $0x120] sm:$0xff] }
 0x32e   :  { %3322 = vmatprep.subr.mxu0 %v11034_v12  ;;  %5123 = vmatprep.subr.mxu1 %v9814_v13  ;;  %11481 = vst [vmem:[#allocation39_spill] sm:$0xff] %v9821_v46  ;;  %v5506_v13 = vunpack.i.h.bf16 %v11485_v55  ;;  %v11489_v55 = vld [vmem:[#allocation32_spill] sm:$0xff] }
 0x32f   :  { %3323 = vmatpush2.msra.mxu0 %v11454_v45  ;;  %5124 = vmatpush3.msra.mxu1 %v9821_v46  ;;  %v9835_v45 = vld [vmem:[%s10612_s2 + $0x198] sm:$0xff] }
 0x330   :  { %3324 = vmatprep.subr.mxu0 %v11034_v12  ;;  %5125 = vmatprep.subr.mxu1 %v9835_v45  ;;  %v3124_v62 = vsel %vm3120_vm7, %v11487_v35, %v5506_v13  ;;  %v11490_v35 = vld [vmem:[#allocation84_spill] sm:$0xff] }
 0x331   :  { %3325 = vmatpush2.msra.mxu0 %v11455_v14  ;;  %5126 = vmatpush3.msra.mxu1 %v9843_v25  ;;  %v9864_v14 = vld [vmem:[%s10612_s2 + $0x188] sm:$0xff] }
 0x332   :  { %3326 = vmatprep.subr.mxu0 %v11034_v12  ;;  %5127 = vmatprep.subr.mxu1 %v9850_v38 }
 0x333   :  { %3327 = vmatpush2.msra.mxu0 %v11456_v0  ;;  %5128 = vmatpush3.msra.mxu1 %v9857_v48  ;;  %v9871_v0 = vld [vmem:[%s10612_s2 + $0x108] sm:$0xff]  ;;  %v9881_v48 = vld [vmem:[%s10612_s2 + $0x180] sm:$0xff] }
 0x334   :  { %3328 = vmatprep.subr.mxu0 %v11034_v12  ;;  %5129 = vmatprep.subr.mxu1 %v9864_v14  ;;  %11488 = vst [vmem:[#allocation46_spill] sm:$0xff] %v9881_v48 }
 0x335   :  { %3329 = vmatpush2.msra.mxu0 %v11457_v61  ;;  %5130 = vmatpush3.msra.mxu1 %v9871_v0  ;;  %v9888_v61 = vld [vmem:[%s10612_s2 + $0x100] sm:$0xff] }
 0x336   :  { %3330 = vmatprep.subr.mxu0 %v11034_v12  ;;  %5131 = vmatprep.subr.mxu1 %v9881_v48 }
 0x337   :  { %3331 = vmatpush2.msra.mxu0 %v11458_v49  ;;  %5132 = vmatpush3.msra.mxu1 %v9888_v61  ;;  %v11491_v49 = vld [vmem:[#allocation16_spill] sm:$0xff] }
 0x338   :  { %3268 = vmatprep.mubr.f32.mxu1 %v3124_v62  ;;  %3332 = vmatprep.subr.mxu0 %v11034_v12  ;;  %v3126_v48 = vsel %vm3120_vm7, %v11491_v49, %v11490_v35  ;;  %v3125_v62 = vsel %vm3120_vm7, %v5506_v13, %v11491_v49  ;;  %v4888_v13 = vpop.f32.mrf.mxu1  ;;  %v11495_v35 = vld [vmem:[#allocation54_spill] sm:$0xff]  ;;  %v11496_v49 = vld [vmem:[#allocation33_spill] sm:$0xff] }
 0x339   :  { %3269 = vmatmul.mubr.f32.vlgmr.msra.gmra.mxu1 %v11489_v55  ;;  %3333 = vmatpush2.msra.mxu0 %v11459_v59  ;;  %v4923_v59 = vpop.f32.mrf.mxu0  ;;  %v11494_v55 = vld [vmem:[#allocation8_spill] sm:$0xff] }
 0x33a   :  { %5136 = vmatprep.subr.mxu1 %v9192_v43  ;;  %3334 = vmatprep.subr.mxu0 %v11034_v12 }
 0x33b   :  { %5137 = vmatpush3.msra.mxu1 %v9199_v63  ;;  %3335 = vmatpush2.msra.mxu0 %v11462_v4  ;;  %v11492_v4 = vld [vmem:[#allocation36_spill] sm:$0xff] }
 0x33c   :  { %5138 = vmatprep.subr.mxu1 %v9206_v56  ;;  %3336 = vmatprep.subr.mxu0 %v11034_v12 }
 0x33d   :  { %5139 = vmatpush3.msra.mxu1 %v9213_v34  ;;  %3337 = vmatpush2.msra.mxu0 %v11463_v44  ;;  %v11493_v44 = vld [vmem:[#allocation37_spill] sm:$0xff] }
 0x33e   :  { %4345 = vmatprep.mubr.msk.f32.mxu0 %vm268_vm6, %v3126_v48  ;;  %5140 = vmatprep.subr.mxu1 %v9224_v3  ;;  %v4889_v48 = vpop.f32.mrf.mxu1 }
 0x33f   :  { %3339 = vmatmul.mubr.f32.vlgmr.msra.gmra.mxu0 %v3125_v62  ;;  %5141 = vmatpush3.msra.mxu1 %v9230_v58  ;;  %v4924_v62 = vpop.f32.mrf.mxu0 }
 0x340   :  { %5171 = vmatprep.subr.mxu0 %v9657_v7  ;;  %5142 = vmatprep.subr.mxu1 %v9237_v51 }
 0x341   :  { %5172 = vmatpush3.msra.mxu0 %v9664_v52  ;;  %5143 = vmatpush3.msra.mxu1 %v9244_v31 }
 0x342   :  { %5173 = vmatprep.subr.mxu0 %v9671_v60  ;;  %5144 = vmatprep.subr.mxu1 %v9251_v10 }
 0x343   :  { %5174 = vmatpush3.msra.mxu0 %v9678_v32  ;;  %5145 = vmatpush3.msra.mxu1 %v9258_v19 }
 0x344   :  { %5175 = vmatprep.subr.mxu0 %v9685_v17  ;;  %5146 = vmatprep.subr.mxu1 %v9265_v57 }
 0x345   :  { %5176 = vmatpush3.msra.mxu0 %v9692_v6  ;;  %5147 = vmatpush3.msra.mxu1 %v9272_v39 }
 0x346   :  { %5177 = vmatprep.subr.mxu0 %v9699_v37  ;;  %5148 = vmatprep.subr.mxu1 %v9279_v20 }
 0x347   :  { %5178 = vmatpush3.msra.mxu0 %v9706_v1  ;;  %5149 = vmatpush3.msra.mxu1 %v9286_v53 }
 0x348   :  { %5179 = vmatprep.subr.mxu0 %v9713_v26  ;;  %5150 = vmatprep.subr.mxu1 %v9293_v29 }
 0x349   :  { %5180 = vmatpush3.msra.mxu0 %v9720_v42  ;;  %5151 = vmatpush3.msra.mxu1 %v9300_v9  ;;  %v4925_v42 = vadd.f32 %v4924_v62, %v4923_v59  ;;  %v11510_v62 = vld [vmem:[#allocation46_spill] sm:$0xff] }
 0x34a   :  { %5181 = vmatprep.subr.mxu0 %v9727_v24  ;;  %5152 = vmatprep.subr.mxu1 %v9307_v50 }
 0x34b   :  { %5182 = vmatpush3.msra.mxu0 %v9734_v36  ;;  %5153 = vmatpush3.msra.mxu1 %v9314_v40 }
 0x34c   :  { %5183 = vmatprep.subr.mxu0 %v9741_v54  ;;  %5154 = vmatprep.subr.mxu1 %v9321_v23 }
 0x34d   :  { %5184 = vmatpush3.msra.mxu0 %v9749_v33  ;;  %5155 = vmatpush3.msra.mxu1 %v9328_v41  ;;  %v11502_v33 = vld [vmem:[#allocation71_spill] sm:$0xff] }
 0x34e   :  { %5185 = vmatprep.subr.mxu0 %v9756_v30  ;;  %5156 = vmatprep.subr.mxu1 %v9335_v27  ;;  %v11501_v30 = vld [vmem:[#allocation45_spill] sm:$0xff]  ;;  %v10987_v54 = vunpack.i.l.bf16 %v11502_v33 }
 0x34f   :  { %5186 = vmatpush3.msra.mxu0 %v9763_v16  ;;  %5157 = vmatpush3.msra.mxu1 %v9342_v18 }
 0x350   :  { %5187 = vmatprep.subr.mxu0 %v9770_v2  ;;  %5158 = vmatprep.subr.mxu1 %v9349_v22 }
 0x351   :  { %5188 = vmatpush3.msra.mxu0 %v9777_v15  ;;  %5159 = vmatpush3.msra.mxu1 %v9356_v8 }
 0x352   :  { %5189 = vmatprep.subr.mxu0 %v9784_v11  ;;  %5160 = vmatprep.subr.mxu1 %v9363_v21  ;;  %v11497_v11 = vld [vmem:[#allocation10_spill] sm:$0xff] }
 0x353   :  { %5190 = vmatpush3.msra.mxu0 %v9792_v47  ;;  %5161 = vmatpush3.msra.mxu1 %v11492_v4  ;;  %v11498_v47 = vld [vmem:[#allocation12_spill] sm:$0xff] }
 0x354   :  { %5191 = vmatprep.subr.mxu0 %v9799_v28  ;;  %5162 = vmatprep.subr.mxu1 %v11493_v44  ;;  %v11499_v15 = vunpack.i.h.bf16 %v11498_v47  ;;  %v11500_v28 = vunpack.i.l.bf16 %v11498_v47  ;;  %v4890_v47 = vadd.f32 %v4889_v48, %v4888_v13 }
 0x355   :  { %5192 = vmatpush3.msra.mxu0 %v9807_v5  ;;  %5163 = vmatpush3.msra.mxu1 %v11494_v55  ;;  %v10988_v5 = vunpack.i.h.bf16 %v11501_v30 }
 0x356   :  { %5193 = vmatprep.subr.mxu0 %v11495_v35  ;;  %5164 = vmatprep.subr.mxu1 %v11496_v49  ;;  %v3409_v2 = vsel %vm3407_vm2, %v11500_v28, %v11499_v15  ;;  %v11503_v35 = vld [vmem:[#allocation42_spill] sm:$0xff]  ;;  %v11505_v15 = vld [vmem:[#allocation63_spill] sm:$0xff]  ;;  %v11506_v28 = vld [vmem:[#allocation73_spill] sm:$0xff] }
 0x357   :  { %5194 = vmatpush3.msra.mxu0 %v9821_v46  ;;  %5165 = vmatpush3.msra.mxu1 %v11497_v11  ;;  %v2488_v16 = vpop.f32.mrf.mxu1  ;;  %v11504_v46 = vld [vmem:[#allocation53_spill] sm:$0xff] }
 0x358   :  { %5195 = vmatprep.subr.mxu0 %v9835_v45  ;;  %5166 = vmatprep.subr.mxu1 %v11503_v35 }
 0x359   :  { %5196 = vmatpush3.msra.mxu0 %v9843_v25  ;;  %5167 = vmatpush3.msra.mxu1 %v11504_v46  ;;  %v1927_v36 = vpop.permute.xlu1 %1926  ;;  %v2490_v24 = vpop.f32.mrf.mxu1 }
 0x35a   :  { %3485 = vmatprep.mubr.f32.mxu1 %v3409_v2  ;;  %5197 = vmatprep.subr.mxu0 %v9850_v38  ;;  %1929 = vst.msk [vmem:[#allocation2 + $0x2] sm:$0x3] %vm784_vm0, %v1927_v36  ;;  %v9980_v24 = vsel %vm4063_vm3, %v10988_v5, %v10987_v54  ;;  %v9985_v2 = vld [vmem:[%s10612_s2 + $0x278] sm:$0xff]  ;;  %v11507_v36 = vld [vmem:[#allocation20_spill] sm:$0xff]  ;;  %v9999_v54 = vld [vmem:[%s10612_s2 + $0x270] sm:$0xff] }
 0x35b   :  { %3486 = vmatmul.mubr.f32.vlgmr.msra.gmra.mxu1 %v11505_v15  ;;  %5198 = vmatpush3.msra.mxu0 %v11506_v28  ;;  %v11508_v13 = vunpack.i.h.bf16 %v11507_v36  ;;  %v11509_v59 = vunpack.i.l.bf16 %v11507_v36  ;;  %v2419_v15 = vadd.f32 %v4925_v42, %v4890_v47  ;;  %v11511_v5 = vld [vmem:[#allocation57_spill] sm:$0xff]  ;;  %v11512_v42 = vld [vmem:[#allocation60_spill] sm:$0xff] }
 0x35c   :  { %3561 = vmatprep.subr.mxu1 %v11034_v12  ;;  %5199 = vmatprep.subr.mxu0 %v9864_v14  ;;  %v11513_v47 = vld [vmem:[#allocation5_spill] sm:$0xff] }
 0x35d   :  { %3562 = vmatpush1.msra.mxu1 %v9985_v2  ;;  %5200 = vmatpush3.msra.mxu0 %v9871_v0  ;;  %v3411_v48 = vsel %vm3407_vm2, %v11509_v59, %v11508_v13  ;;  %v2489_v36 = vadd.f32 %v2488_v16, %v2419_v15  ;;  %v10008_v13 = vld [vmem:[%s10612_s2 + $0x268] sm:$0xff] }
 0x35e   :  { %3563 = vmatprep.subr.mxu1 %v11034_v12  ;;  %5201 = vmatprep.subr.mxu0 %v11510_v62  ;;  %v11514_v16 = vld [vmem:[#allocation48_spill] sm:$0xff] }
 0x35f   :  { %3564 = vmatpush1.msra.mxu1 %v9999_v54  ;;  %5202 = vmatpush3.msra.mxu0 %v9888_v61  ;;  %v2499_v59 = vrot.slane %v2489_v36, %v11513_v47  ;;  %v10132_v15 = vld [vmem:[%s10612_s2 + $0x2a8] sm:$0xff]  ;;  %v10141_v36 = vld [vmem:[%s10612_s2 + $0x2a0] sm:$0xff] }
 0x360   :  { %3555 = vmatprep.mubr.f32.mxu0 %v3411_v48  ;;  %3565 = vmatprep.subr.mxu1 %v11034_v12 }
 0x361   :  { %3556 = vmatmul.mubr.f32.vlgmr.msra.gmra.mxu0 %v11511_v5  ;;  %3566 = vmatpush1.msra.mxu1 %v10008_v13 }
 0x362   :  { %5206 = vmatprep.subr.mxu0 %v9192_v43  ;;  %3567 = vmatprep.subr.mxu1 %v11034_v12  ;;  %v11515_v43 = vld [vmem:[#allocation6_spill] sm:$0xff] }
 0x363   :  { %5207 = vmatpush3.msra.mxu0 %v9199_v63  ;;  %3568 = vmatpush1.msra.mxu1 %v11512_v42  ;;  %v11516_v63 = vld [vmem:[#allocation9_spill] sm:$0xff] }
 0x364   :  { %5208 = vmatprep.subr.mxu0 %v9206_v56  ;;  %3569 = vmatprep.subr.mxu1 %v11034_v12  ;;  %v11519_v56 = vld [vmem:[#allocation15_spill] sm:$0xff] }
 0x365   :  { %5209 = vmatpush3.msra.mxu0 %v9213_v34  ;;  %3570 = vmatpush1.msra.mxu1 %v11514_v16  ;;  %v11520_v34 = vld [vmem:[#allocation19_spill] sm:$0xff] }
 0x366   :  { %5210 = vmatprep.subr.mxu0 %v9224_v3  ;;  %3571 = vmatprep.subr.mxu1 %v11034_v12  ;;  %v11517_v3 = vld [vmem:[#allocation40_spill] sm:$0xff] }
 0x367   :  { %5211 = vmatpush3.msra.mxu0 %v9230_v58  ;;  %3572 = vmatpush1.msra.mxu1 %v11515_v43  ;;  %v11518_v58 = vld [vmem:[#allocation38_spill] sm:$0xff] }
 0x368   :  { %5212 = vmatprep.subr.mxu0 %v9237_v51  ;;  %2500 = vrot.lane.b32.xlu0 %v2499_v59, %s5881_s17  ;;  %v11521_v51 = vld [vmem:[#allocation23_spill] sm:$0xff] }
 0x369   :  { %3573 = vmatprep.subr.mxu1 %v11034_v12  ;;  %5213 = vmatpush3.msra.mxu0 %v9244_v31  ;;  %v11522_v31 = vld [vmem:[#allocation27_spill] sm:$0xff] }
 0x36a   :  { %3574 = vmatpush1.msra.mxu1 %v11516_v63  ;;  %5214 = vmatprep.subr.mxu0 %v9251_v10  ;;  %v4958_v10 = vpop.f32.mrf.mxu0  ;;  %v11531_v59 = vld [vmem:[#allocation35_spill] sm:$0xff] }
 0x36b   :  { %3575 = vmatprep.subr.mxu1 %v11034_v12  ;;  %5215 = vmatpush3.msra.mxu0 %v9258_v19  ;;  %v11523_v19 = vld [vmem:[#allocation58_spill] sm:$0xff] }
 0x36c   :  { %3576 = vmatpush1.msra.mxu1 %v11517_v3  ;;  %5216 = vmatprep.subr.mxu0 %v9265_v57 }
 0x36d   :  { %3577 = vmatprep.subr.mxu1 %v11034_v12  ;;  %5217 = vmatpush3.msra.mxu0 %v9272_v39  ;;  %v11524_v39 = vld [vmem:[#allocation14_spill] sm:$0xff] }
 0x36e   :  { %3578 = vmatpush1.msra.mxu1 %v11518_v58  ;;  %5218 = vmatprep.subr.mxu0 %v9279_v20  ;;  %v11525_v20 = vld [vmem:[#allocation67_spill] sm:$0xff] }
 0x36f   :  { %3579 = vmatprep.subr.mxu1 %v11034_v12  ;;  %5219 = vmatpush3.msra.mxu0 %v9286_v53  ;;  %v5520_v53 = vunpack.i.l.bf16 %v11525_v20 }
 0x370   :  { %3580 = vmatpush1.msra.mxu1 %v11519_v56  ;;  %5220 = vmatprep.subr.mxu0 %v9293_v29  ;;  %v4959_v29 = vpop.f32.mrf.mxu0 }
 0x371   :  { %3581 = vmatprep.subr.mxu1 %v11034_v12  ;;  %5221 = vmatpush3.msra.mxu0 %v9300_v9  ;;  %v11526_v9 = vld [vmem:[#allocation55_spill] sm:$0xff]  ;;  %v4960_v5 = vadd.f32 %v4959_v29, %v4958_v10  ;;  %v11547_v10 = vld [vmem:[#allocation54_spill] sm:$0xff] }
 0x372   :  { %3582 = vmatpush1.msra.mxu1 %v11520_v34  ;;  %5222 = vmatprep.subr.mxu0 %v9307_v50  ;;  %v3951_v29 = vld [vmem:[%s10613_s3 + $0xe0] sm:$0xff] }
 0x373   :  { %3583 = vmatprep.subr.mxu1 %v11034_v12  ;;  %5223 = vmatpush3.msra.mxu0 %v9314_v40  ;;  %v11527_v40 = vld [vmem:[#allocation13_spill] sm:$0xff] }
 0x374   :  { %3584 = vmatpush1.msra.mxu1 %v11521_v51  ;;  %5224 = vmatprep.subr.mxu0 %v9321_v23 }
 0x375   :  { %3585 = vmatprep.subr.mxu1 %v11034_v12  ;;  %5225 = vmatpush3.msra.mxu0 %v9328_v41  ;;  %v11528_v41 = vunpack.i.h.bf16 %v11525_v20  ;;  %v3936_v20 = vld [vmem:[%s10613_s3 + $0x68] sm:$0xff] }
 0x376   :  { %3586 = vmatpush1.msra.mxu1 %v11522_v31  ;;  %5226 = vmatprep.subr.mxu0 %v9335_v27 }
 0x377   :  { %3587 = vmatprep.subr.mxu1 %v11034_v12  ;;  %5227 = vmatpush3.msra.mxu0 %v9342_v18  ;;  %v3688_v27 = vsel %vm3686_vm12, %v5520_v53, %v11528_v41  ;;  %v3985_v41 = vld [vmem:[%s10613_s3 + $0x1f0] sm:$0xff] }
 0x378   :  { %3588 = vmatpush1.msra.mxu1 %v11523_v19  ;;  %5228 = vmatprep.subr.mxu0 %v9349_v22  ;;  %v4993_v57 = vpop.f32.mrf.mxu1  ;;  %v11529_v22 = vld [vmem:[#allocation30_spill] sm:$0xff] }
 0x379   :  { %3589 = vmatprep.subr.mxu1 %v11034_v12  ;;  %5229 = vmatpush3.msra.mxu0 %v9356_v8 }
 0x37a   :  { %3590 = vmatpush1.msra.mxu1 %v11524_v39  ;;  %5230 = vmatprep.subr.mxu0 %v9363_v21  ;;  %v4994_v50 = vpop.f32.mrf.mxu1 }
 0x37b   :  { %3591 = vmatprep.subr.mxu1 %v11034_v12  ;;  %5231 = vmatpush3.msra.mxu0 %v11492_v4  ;;  %v4995_v18 = vadd.f32 %v4994_v50, %v4993_v57  ;;  %v11530_v4 = vld [vmem:[#allocation43_spill] sm:$0xff] }
 0x37c   :  { %3592 = vmatpush1.msra.mxu1 %v11526_v9  ;;  %5232 = vmatprep.subr.mxu0 %v11493_v44  ;;  %v3687_v44 = vsel %vm3686_vm12, %v11530_v4, %v5520_v53  ;;  %v11549_v57 = vld [vmem:[#allocation87_spill] sm:$0xff]  ;;  %v3933_v4 = vld [vmem:[%s10613_s3 + $0x50] sm:$0xff] }
 0x37d   :  { %3599 = vmatprep.subr.mxu1 %v11034_v12  ;;  %5233 = vmatpush3.msra.mxu0 %v11494_v55  ;;  %v2697_v55 = vadd.f32 %v4995_v18, %v4960_v5  ;;  %v3986_v53 = vld [vmem:[%s10613_s3 + $0x1f8] sm:$0xff]  ;;  %v3969_v18 = vld [vmem:[%s10613_s3 + $0x170] sm:$0xff]  ;;  %v3968_v5 = vld [vmem:[%s10613_s3 + $0x168] sm:$0xff] }
 0x37e   :  { %4346 = vmatpush2.msk.msra.mxu1 %vm271_vm5, %v11527_v40  ;;  %5234 = vmatprep.subr.mxu0 %v11496_v49  ;;  %v2766_v23 = vpop.f32.mrf.mxu0 }
 0x37f   :  { %3601 = vmatprep.subr.mxu1 %v11034_v12  ;;  %5235 = vmatpush3.msra.mxu0 %v11497_v11  ;;  %v10087_v11 = vld [vmem:[%s10612_s2 + $0x2d0] sm:$0xff]  ;;  %v2767_v49 = vadd.f32 %v2766_v23, %v2697_v55  ;;  %v3935_v23 = vld [vmem:[%s10613_s3 + $0x60] sm:$0xff] }
 0x380   :  { %3602 = vmatpush2.msra.mxu1 %v11529_v22  ;;  %5236 = vmatprep.subr.mxu0 %v11503_v35  ;;  %v2214_v8 = vpop.permute.xlu0 %2213  ;;  %v2768_v21 = vpop.f32.mrf.mxu0  ;;  %v10104_v35 = vld [vmem:[%s10612_s2 + $0x2c0] sm:$0xff] }
 0x381   :  { %3603 = vmatprep.subr.mxu1 %v11034_v12  ;;  %5237 = vmatpush3.msra.mxu0 %v11504_v46  ;;  %2216 = vst.msk [vmem:[#allocation2 + $0x2] sm:$0x3] %vm1072_vm4, %v2214_v8  ;;  %v10095_v46 = vld [vmem:[%s10612_s2 + $0x2c8] sm:$0xff]  ;;  %v2777_v48 = vrot.slane %v2767_v49, %v11513_v47  ;;  %v3949_v21 = vld [vmem:[%s10613_s3 + $0xd0] sm:$0xff]  ;;  %v3967_v55 = vld [vmem:[%s10613_s3 + $0x160] sm:$0xff] }
 0x382   :  { %3604 = vmatpush2.msra.mxu1 %v10087_v11  ;;  %3763 = vmatprep.mubr.f32.mxu0 %v3688_v27  ;;  %v3950_v27 = vld [vmem:[%s10613_s3 + $0xd8] sm:$0xff]  ;;  %v3984_v8 = vld [vmem:[%s10613_s3 + $0x1e8] sm:$0xff]  ;;  %v3947_v49 = vld [vmem:[%s10613_s3 + $0xc0] sm:$0xff] }
 0x383   :  { %3839 = vmatprep.subr.mxu0 %v11034_v12  ;;  %3605 = vmatprep.subr.mxu1 %v11034_v12 }
 0x384   :  { %3764 = vmatmul.mubr.f32.vlgmr.msra.gmra.mxu0 %v3687_v44  ;;  %3606 = vmatpush2.msra.mxu1 %v10095_v46  ;;  %v3983_v44 = vld [vmem:[%s10613_s3 + $0x1e0] sm:$0xff] }
 0x385   :  { %3840 = vmatpush1.msra.mxu0 %v9985_v2  ;;  %3607 = vmatprep.subr.mxu1 %v11034_v12  ;;  %v10113_v2 = vld [vmem:[%s10612_s2 + $0x2b8] sm:$0xff] }
 0x386   :  { %3841 = vmatprep.subr.mxu0 %v11034_v12  ;;  %3608 = vmatpush2.msra.mxu1 %v10104_v35 }
 0x387   :  { %3842 = vmatpush1.msra.mxu0 %v9999_v54  ;;  %3609 = vmatprep.subr.mxu1 %v11034_v12  ;;  %v10122_v54 = vld [vmem:[%s10612_s2 + $0x2b0] sm:$0xff] }
 0x388   :  { %3843 = vmatprep.subr.mxu0 %v11034_v12  ;;  %3610 = vmatpush2.msra.mxu1 %v10113_v2 }
 0x389   :  { %3844 = vmatpush1.msra.mxu0 %v10008_v13  ;;  %3611 = vmatprep.subr.mxu1 %v11034_v12  ;;  %v10152_v13 = vld [vmem:[%s10612_s2 + $0x298] sm:$0xff] }
 0x38a   :  { %3845 = vmatprep.subr.mxu0 %v11034_v12  ;;  %3612 = vmatpush2.msra.mxu1 %v10122_v54 }
 0x38b   :  { %3846 = vmatpush1.msra.mxu0 %v11512_v42  ;;  %3613 = vmatprep.subr.mxu1 %v11034_v12  ;;  %v10161_v42 = vld [vmem:[%s10612_s2 + $0x290] sm:$0xff] }
 0x38c   :  { %3847 = vmatprep.subr.mxu0 %v11034_v12  ;;  %3614 = vmatpush2.msra.mxu1 %v10132_v15 }
 0x38d   :  { %3848 = vmatpush1.msra.mxu0 %v11514_v16  ;;  %3615 = vmatprep.subr.mxu1 %v11034_v12  ;;  %v11532_v16 = vld [vmem:[#allocation66_spill] sm:$0xff] }
 0x38e   :  { %3849 = vmatprep.subr.mxu0 %v11034_v12  ;;  %3616 = vmatpush2.msra.mxu1 %v10141_v36 }
 0x38f   :  { %3850 = vmatpush1.msra.mxu0 %v11515_v43  ;;  %2778 = vrot.lane.b32.xlu1 %v2777_v48, %s5878_s0  ;;  %v3413_v43 = vsel %vm3407_vm2, %v11532_v16, %v11531_v59  ;;  %v3981_v48 = vld [vmem:[%s10613_s3 + $0x1d0] sm:$0xff]  ;;  %v3964_v16 = vld [vmem:[%s10613_s3 + $0x148] sm:$0xff] }
 0x390   :  { %3851 = vmatprep.subr.mxu0 %v11034_v12  ;;  %3617 = vmatprep.subr.mxu1 %v11034_v12  ;;  %v3945_v59 = vld [vmem:[%s10613_s3 + $0xb0] sm:$0xff] }
 0x391   :  { %3852 = vmatpush1.msra.mxu0 %v11516_v63  ;;  %3618 = vmatpush2.msra.mxu1 %v10152_v13  ;;  %v10173_v63 = vld [vmem:[%s10612_s2 + $0x288] sm:$0xff] }
 0x392   :  { %3853 = vmatprep.subr.mxu0 %v11034_v12  ;;  %3619 = vmatprep.subr.mxu1 %v11034_v12 }
 0x393   :  { %3854 = vmatpush1.msra.mxu0 %v11517_v3  ;;  %3620 = vmatpush2.msra.mxu1 %v10161_v42  ;;  %v10182_v3 = vld [vmem:[%s10612_s2 + $0x280] sm:$0xff] }
 0x394   :  { %3855 = vmatprep.subr.mxu0 %v11034_v12  ;;  %3621 = vmatprep.subr.mxu1 %v11034_v12 }
 0x395   :  { %3856 = vmatpush1.msra.mxu0 %v11518_v58  ;;  %3622 = vmatpush2.msra.mxu1 %v10173_v63  ;;  %v11533_v58 = vld [vmem:[#allocation83_spill] sm:$0xff] }
 0x396   :  { %3857 = vmatprep.subr.mxu0 %v11034_v12  ;;  %3623 = vmatprep.subr.mxu1 %v11034_v12 }
 0x397   :  { %3858 = vmatpush1.msra.mxu0 %v11519_v56  ;;  %3624 = vmatpush2.msra.mxu1 %v10182_v3  ;;  %v11543_v56 = vld [vmem:[#allocation49_spill] sm:$0xff] }
 0x398   :  { %4347 = vmatprep.mubr.msk.f32.mxu1 %vm268_vm6, %v3413_v43  ;;  %3859 = vmatprep.subr.mxu0 %v11034_v12  ;;  %v3929_v43 = vld [vmem:[%s10613_s3 + $0x30] sm:$0xff] }
 0x399   :  { %3626 = vmatmul.mubr.f32.vlgmr.msra.gmra.mxu1 %v11533_v58  ;;  %5241 = vmatprep.subr.mxu1 %v9657_v7  ;;  %v11534_v7 = vld [vmem:[#allocation52_spill] sm:$0xff] }
 0x39a   :  { %3860 = vmatpush1.msra.mxu0 %v11520_v34  ;;  %5242 = vmatpush3.msra.mxu1 %v9664_v52  ;;  %v11535_v52 = vld [vmem:[#allocation74_spill] sm:$0xff]  ;;  %v3963_v58 = vld [vmem:[%s10613_s3 + $0x140] sm:$0xff] }
 0x39b   :  { %3861 = vmatprep.subr.mxu0 %v11034_v12  ;;  %5243 = vmatprep.subr.mxu1 %v9671_v60  ;;  %v11536_v60 = vld [vmem:[#allocation11_spill] sm:$0xff]  ;;  %v11544_v34 = vld [vmem:[#allocation70_spill] sm:$0xff] }
 0x39c   :  { %3862 = vmatpush1.msra.mxu0 %v11521_v51  ;;  %5244 = vmatpush3.msra.mxu1 %v9678_v32  ;;  %v11537_v32 = vld [vmem:[#allocation31_spill] sm:$0xff] }
 0x39d   :  { %3863 = vmatprep.subr.mxu0 %v11034_v12  ;;  %5245 = vmatprep.subr.mxu1 %v9685_v17  ;;  %v11539_v17 = vld [vmem:[#allocation18_spill] sm:$0xff]  ;;  %v11545_v51 = vld [vmem:[#allocation59_spill] sm:$0xff] }
 0x39e   :  { %3864 = vmatpush1.msra.mxu0 %v11522_v31  ;;  %5246 = vmatpush3.msra.mxu1 %v9692_v6  ;;  %v11540_v6 = vld [vmem:[#allocation22_spill] sm:$0xff]  ;;  %v11546_v31 = vld [vmem:[#allocation76_spill] sm:$0xff] }
 0x39f   :  { %3865 = vmatprep.subr.mxu0 %v11034_v12  ;;  %5247 = vmatprep.subr.mxu1 %v9699_v37  ;;  %v11541_v37 = vld [vmem:[#allocation26_spill] sm:$0xff] }
 0x3a0   :  { %3866 = vmatpush1.msra.mxu0 %v11523_v19  ;;  %5248 = vmatpush3.msra.mxu1 %v9706_v1  ;;  %v11542_v1 = vld [vmem:[#allocation34_spill] sm:$0xff]  ;;  %v11548_v19 = vld [vmem:[#allocation39_spill] sm:$0xff] }
 0x3a1   :  { %3867 = vmatprep.subr.mxu0 %v11034_v12  ;;  %5249 = vmatprep.subr.mxu1 %v9713_v26  ;;  %v11538_v26 = vld [vmem:[#allocation41_spill] sm:$0xff] }
 0x3a2   :  { %3868 = vmatpush1.msra.mxu0 %v11524_v39  ;;  %5250 = vmatpush3.msra.mxu1 %v11534_v7  ;;  %v5526_v39 = vunpack.i.h.bf16 %v11549_v57  ;;  %v3928_v7 = vld [vmem:[%s10613_s3 + $0x28] sm:$0xff] }
 0x3a3   :  { %3869 = vmatprep.subr.mxu0 %v11034_v12  ;;  %5251 = vmatprep.subr.mxu1 %v11535_v52  ;;  %v5063_v52 = vpop.f32.mrf.mxu0 }
 0x3a4   :  { %3870 = vmatpush1.msra.mxu0 %v11526_v9  ;;  %5252 = vmatpush3.msra.mxu1 %v11536_v60  ;;  %v11552_v9 = vld [vmem:[#allocation47_spill] sm:$0xff] }
 0x3a5   :  { %3877 = vmatprep.subr.mxu0 %v11034_v12  ;;  %5253 = vmatprep.subr.mxu1 %v11537_v32  ;;  %v3691_v50 = vsel %vm3686_vm12, %v5526_v39, %v11552_v9  ;;  %v3978_v60 = vld [vmem:[%s10613_s3 + $0x1b8] sm:$0xff]  ;;  %v3943_v32 = vld [vmem:[%s10613_s3 + $0xa0] sm:$0xff] }
 0x3a6   :  { %4349 = vmatpush2.msk.msra.mxu0 %vm271_vm5, %v11527_v40  ;;  %5254 = vmatpush3.msra.mxu1 %v11538_v26  ;;  %v3970_v40 = vld [vmem:[%s10613_s3 + $0x178] sm:$0xff]  ;;  %vm4075_vm5 = vcmask 719872  }
 0x3a7   :  { %3879 = vmatprep.subr.mxu0 %v11034_v12  ;;  %5255 = vmatprep.subr.mxu1 %v11539_v17  ;;  %v3962_v26 = vld [vmem:[%s10613_s3 + $0x138] sm:$0xff]  ;;  %v3927_v17 = vld [vmem:[%s10613_s3 + $0x20] sm:$0xff] }
 0x3a8   :  { %3880 = vmatpush2.msra.mxu0 %v11529_v22  ;;  %5256 = vmatpush3.msra.mxu1 %v11540_v6  ;;  %v3934_v22 = vld [vmem:[%s10613_s3 + $0x58] sm:$0xff]  ;;  %v5028_v6 = vpop.f32.mrf.mxu1 }
 0x3a9   :  { %3881 = vmatprep.subr.mxu0 %v11034_v12  ;;  %5257 = vmatprep.subr.mxu1 %v11541_v37  ;;  %v3977_v37 = vld [vmem:[%s10613_s3 + $0x1b0] sm:$0xff] }
 0x3aa   :  { %3882 = vmatpush2.msra.mxu0 %v10087_v11  ;;  %5258 = vmatpush3.msra.mxu1 %v11542_v1  ;;  %v3948_v11 = vld [vmem:[%s10613_s3 + $0xc8] sm:$0xff]  ;;  %v3942_v1 = vld [vmem:[%s10613_s3 + $0x98] sm:$0xff] }
 0x3ab   :  { %3883 = vmatprep.subr.mxu0 %v11034_v12  ;;  %5259 = vmatprep.subr.mxu1 %v11543_v56  ;;  %v3961_v56 = vld [vmem:[%s10613_s3 + $0x130] sm:$0xff] }
 0x3ac   :  { %3884 = vmatpush2.msra.mxu0 %v10095_v46  ;;  %5260 = vmatpush3.msra.mxu1 %v11544_v34  ;;  %v3932_v46 = vld [vmem:[%s10613_s3 + $0x48] sm:$0xff]  ;;  %v3926_v34 = vld [vmem:[%s10613_s3 + $0x18] sm:$0xff] }
 0x3ad   :  { %3885 = vmatprep.subr.mxu0 %v11034_v12  ;;  %5261 = vmatprep.subr.mxu1 %v11545_v51  ;;  %v5064_v51 = vpop.f32.mrf.mxu0 }
 0x3ae   :  { %3886 = vmatpush2.msra.mxu0 %v10104_v35  ;;  %5262 = vmatpush3.msra.mxu1 %v11546_v31  ;;  %v3982_v35 = vld [vmem:[%s10613_s3 + $0x1d8] sm:$0xff]  ;;  %v3976_v31 = vld [vmem:[%s10613_s3 + $0x1a8] sm:$0xff] }
 0x3af   :  { %3887 = vmatprep.subr.mxu0 %v11034_v12  ;;  %5263 = vmatprep.subr.mxu1 %v11547_v10  ;;  %v3941_v10 = vld [vmem:[%s10613_s3 + $0x90] sm:$0xff] }
 0x3b0   :  { %3888 = vmatpush2.msra.mxu0 %v10113_v2  ;;  %5264 = vmatpush3.msra.mxu1 %v11548_v19  ;;  %v3966_v2 = vld [vmem:[%s10613_s3 + $0x158] sm:$0xff]  ;;  %v3960_v19 = vld [vmem:[%s10613_s3 + $0x128] sm:$0xff] }
 0x3b1   :  { %3889 = vmatprep.subr.mxu0 %v11034_v12  ;;  %5265 = vmatprep.subr.mxu1 %v9835_v45  ;;  %v11550_v45 = vunpack.i.l.bf16 %v11549_v57  ;;  %v3925_v57 = vld [vmem:[%s10613_s3 + $0x10] sm:$0xff] }
 0x3b2   :  { %3890 = vmatpush2.msra.mxu0 %v10122_v54  ;;  %5266 = vmatpush3.msra.mxu1 %v9843_v25  ;;  %v3931_v54 = vld [vmem:[%s10613_s3 + $0x40] sm:$0xff] }
 0x3b3   :  { %3891 = vmatprep.subr.mxu0 %v11034_v12  ;;  %5267 = vmatprep.subr.mxu1 %v9850_v38  ;;  %v3690_v25 = vsel %vm3686_vm12, %v11550_v45, %v5526_v39  ;;  %v3954_v38 = vld [vmem:[%s10613_s3 + $0xf8] sm:$0xff]  ;;  %v5029_v39 = vpop.f32.mrf.mxu1  ;;  %v3975_v45 = vld [vmem:[%s10613_s3 + $0x1a0] sm:$0xff] }
 0x3b4   :  { %3892 = vmatpush2.msra.mxu0 %v10132_v15  ;;  %5268 = vmatpush3.msra.mxu1 %v11506_v28  ;;  %v3953_v28 = vld [vmem:[%s10613_s3 + $0xf0] sm:$0xff]  ;;  %v3946_v15 = vld [vmem:[%s10613_s3 + $0xb8] sm:$0xff] }
 0x3b5   :  { %3893 = vmatprep.subr.mxu0 %v11034_v12  ;;  %5269 = vmatprep.subr.mxu1 %v9864_v14  ;;  %v3938_v14 = vld [vmem:[%s10613_s3 + $0x78] sm:$0xff] }
 0x3b6   :  { %3894 = vmatpush2.msra.mxu0 %v10141_v36  ;;  %5270 = vmatpush3.msra.mxu1 %v9871_v0  ;;  %v11551_v0 = vld [vmem:[#allocation56_spill] sm:$0xff]  ;;  %v3965_v36 = vld [vmem:[%s10613_s3 + $0x150] sm:$0xff] }
 0x3b7   :  { %3895 = vmatprep.subr.mxu0 %v11034_v12  ;;  %5271 = vmatprep.subr.mxu1 %v11510_v62  ;;  %v3952_v62 = vld [vmem:[%s10613_s3 + $0xe8] sm:$0xff] }
 0x3b8   :  { %3896 = vmatpush2.msra.mxu0 %v10152_v13  ;;  %5272 = vmatpush3.msra.mxu1 %v9888_v61  ;;  %v3937_v61 = vld [vmem:[%s10613_s3 + $0x70] sm:$0xff]  ;;  %v3930_v13 = vld [vmem:[%s10613_s3 + $0x38] sm:$0xff] }
 0x3b9   :  { %3833 = vmatprep.mubr.f32.mxu1 %v3690_v25  ;;  %3897 = vmatprep.subr.mxu0 %v11034_v12  ;;  %v3940_v25 = vld [vmem:[%s10613_s3 + $0x88] sm:$0xff] }
 0x3ba   :  { %3834 = vmatmul.mubr.f32.vlgmr.msra.gmra.mxu1 %v11551_v0  ;;  %3898 = vmatpush2.msra.mxu0 %v10161_v42  ;;  %v3980_v42 = vld [vmem:[%s10613_s3 + $0x1c8] sm:$0xff] }
 0x3bb   :  { %5276 = vmatprep.subr.mxu1 %v3954_v38  ;;  %3899 = vmatprep.subr.mxu0 %v11034_v12  ;;  %v5065_v38 = vadd.f32 %v5064_v51, %v5063_v52  ;;  %v3924_v0 = vld [vmem:[%s10613_s3 + $0x8] sm:$0xff] }
 0x3bc   :  { %5277 = vmatpush3.msra.mxu1 %v3938_v14  ;;  %3900 = vmatpush2.msra.mxu0 %v10173_v63  ;;  %v3979_v63 = vld [vmem:[%s10613_s3 + $0x1c0] sm:$0xff]  ;;  %v3992_v52 = vld [vmem:[%s10613_s3 + $0x228] sm:$0xff] }
 0x3bd   :  { %5278 = vmatprep.subr.mxu1 %v3953_v28  ;;  %3901 = vmatprep.subr.mxu0 %v11034_v12  ;;  %v3959_v14 = vld [vmem:[%s10613_s3 + $0x120] sm:$0xff]  ;;  %v3974_v28 = vld [vmem:[%s10613_s3 + $0x198] sm:$0xff] }
 0x3be   :  { %5279 = vmatpush3.msra.mxu1 %v3937_v61  ;;  %3902 = vmatpush2.msra.mxu0 %v10182_v3  ;;  %v3944_v3 = vld [vmem:[%s10613_s3 + $0xa8] sm:$0xff]  ;;  %v3939_v61 = vld [vmem:[%s10613_s3 + $0x80] sm:$0xff] }
 0x3bf   :  { %4350 = vmatprep.mubr.msk.f32.mxu0 %vm268_vm6, %v11552_v9  ;;  %5280 = vmatprep.subr.mxu1 %v3952_v62  ;;  %v5030_v62 = vadd.f32 %v5029_v39, %v5028_v6  ;;  %v11554_v9 = vunpack.i.l.bf16 %v11501_v30  ;;  %v3988_v6 = vld [vmem:[%s10613_s3 + $0x208] sm:$0xff]  ;;  %v4011_v39 = vld [vmem:[%s10613_s3 + $0x2c0] sm:$0xff]  ;;  %vm4302_vm6 = vcmask 1041840  }
 0x3c0   :  { %3904 = vmatmul.mubr.f32.vlgmr.msra.gmra.mxu0 %v3691_v50  ;;  %5281 = vmatpush3.msra.mxu1 %v3936_v20  ;;  %v3958_v20 = vld [vmem:[%s10613_s3 + $0x118] sm:$0xff] }
 0x3c1   :  { %5311 = vmatprep.subr.mxu0 %v3986_v53  ;;  %5282 = vmatprep.subr.mxu1 %v3951_v29  ;;  %v3923_v53 = vld [vmem:[%s10613_s3] sm:$0xff]  ;;  %v11553_v29 = vunpack.i.h.bf16 %v11501_v30  ;;  %v3972_v30 = vld [vmem:[%s10613_s3 + $0x188] sm:$0xff] }
 0x3c2   :  { %5312 = vmatpush3.msra.mxu0 %v3970_v40  ;;  %5283 = vmatpush3.msra.mxu1 %v3935_v23  ;;  %v3973_v40 = vld [vmem:[%s10613_s3 + $0x190] sm:$0xff] }
 0x3c3   :  { %5313 = vmatprep.subr.mxu0 %v3985_v41  ;;  %5284 = vmatprep.subr.mxu1 %v3950_v27  ;;  %v4065_v50 = vsel %vm4063_vm3, %v11554_v9, %v11553_v29  ;;  %v3957_v41 = vld [vmem:[%s10613_s3 + $0x110] sm:$0xff]  ;;  %v2984_v27 = vadd.f32 %v5065_v38, %v5030_v62  ;;  %v4010_v38 = vld [vmem:[%s10613_s3 + $0x2b8] sm:$0xff]  ;;  %v4008_v62 = vld [vmem:[%s10613_s3 + $0x2a8] sm:$0xff] }
 0x3c4   :  { %5314 = vmatpush3.msra.mxu0 %v3969_v18  ;;  %5285 = vmatpush3.msra.mxu1 %v3934_v22  ;;  %v5536_v18 = vunpack.i.h.bf16 %v11502_v33  ;;  %v4005_v29 = vld [vmem:[%s10613_s3 + $0x290] sm:$0xff]  ;;  %v4004_v9 = vld [vmem:[%s10613_s3 + $0x288] sm:$0xff] }
 0x3c5   :  { %5315 = vmatprep.subr.mxu0 %v3984_v8  ;;  %5286 = vmatprep.subr.mxu1 %v3949_v21  ;;  %v4002_v21 = vld [vmem:[%s10613_s3 + $0x278] sm:$0xff] }
 0x3c6   :  { %5316 = vmatpush3.msra.mxu0 %v3968_v5  ;;  %5287 = vmatpush3.msra.mxu1 %v3933_v4  ;;  %v3956_v5 = vld [vmem:[%s10613_s3 + $0x108] sm:$0xff] }
 0x3c7   :  { %5317 = vmatprep.subr.mxu0 %v3983_v44  ;;  %5288 = vmatprep.subr.mxu1 %v3948_v11  ;;  %v11555_v11 = vld [vmem:[#allocation86_spill] sm:$0xff] }
 0x3c8   :  { %5318 = vmatpush3.msra.mxu0 %v3967_v55  ;;  %5289 = vmatpush3.msra.mxu1 %v3932_v46  ;;  %v3971_v55 = vld [vmem:[%s10613_s3 + $0x180] sm:$0xff]  ;;  %v4001_v46 = vld [vmem:[%s10613_s3 + $0x270] sm:$0xff] }
 0x3c9   :  { %5319 = vmatprep.subr.mxu0 %v3982_v35  ;;  %5290 = vmatprep.subr.mxu1 %v3947_v49  ;;  %v3955_v49 = vld [vmem:[%s10613_s3 + $0x100] sm:$0xff] }
 0x3ca   :  { %5320 = vmatpush3.msra.mxu0 %v3966_v2  ;;  %5291 = vmatpush3.msra.mxu1 %v3931_v54  ;;  %v11557_v54 = vunpack.i.l.bf16 %v11502_v33 }
 0x3cb   :  { %5321 = vmatprep.subr.mxu0 %v3981_v48  ;;  %5292 = vmatprep.subr.mxu1 %v3946_v15  ;;  %v4000_v15 = vld [vmem:[%s10613_s3 + $0x268] sm:$0xff] }
 0x3cc   :  { %5322 = vmatpush3.msra.mxu0 %v3965_v36  ;;  %5293 = vmatpush3.msra.mxu1 %v3930_v13  ;;  %v4067_v48 = vsel %vm4063_vm3, %v11557_v54, %v5536_v18  ;;  %v11558_v13 = vld [vmem:[#allocation75_spill] sm:$0xff] }
 0x3cd   :  { %5323 = vmatprep.subr.mxu0 %v3980_v42  ;;  %5294 = vmatprep.subr.mxu1 %v3945_v59  ;;  %v11559_v42 = vld [vmem:[#allocation7_spill] sm:$0xff] }
 0x3ce   :  { %5324 = vmatpush3.msra.mxu0 %v3964_v16  ;;  %5295 = vmatpush3.msra.mxu1 %v3929_v43  ;;  %v4069_v59 = vsel %vm4063_vm3, %v11559_v42, %v11558_v13  ;;  %v3999_v16 = vld [vmem:[%s10613_s3 + $0x260] sm:$0xff]  ;;  %v3998_v43 = vld [vmem:[%s10613_s3 + $0x258] sm:$0xff] }
 0x3cf   :  { %5325 = vmatprep.subr.mxu0 %v3979_v63  ;;  %5296 = vmatprep.subr.mxu1 %v3944_v3  ;;  %v3997_v63 = vld [vmem:[%s10613_s3 + $0x250] sm:$0xff]  ;;  %v3995_v3 = vld [vmem:[%s10613_s3 + $0x240] sm:$0xff] }
 0x3d0   :  { %5326 = vmatpush3.msra.mxu0 %v3963_v58  ;;  %5297 = vmatpush3.msra.mxu1 %v3928_v7  ;;  %v3994_v58 = vld [vmem:[%s10613_s3 + $0x238] sm:$0xff]  ;;  %v3993_v7 = vld [vmem:[%s10613_s3 + $0x230] sm:$0xff] }
 0x3d1   :  { %5327 = vmatprep.subr.mxu0 %v3978_v60  ;;  %5298 = vmatprep.subr.mxu1 %v3943_v32  ;;  %v3991_v60 = vld [vmem:[%s10613_s3 + $0x220] sm:$0xff]  ;;  %v3990_v32 = vld [vmem:[%s10613_s3 + $0x218] sm:$0xff] }
 0x3d2   :  { %5328 = vmatpush3.msra.mxu0 %v3962_v26  ;;  %5299 = vmatpush3.msra.mxu1 %v3927_v17  ;;  %v5098_v26 = vpop.f32.mrf.mxu0  ;;  %v3989_v17 = vld [vmem:[%s10613_s3 + $0x210] sm:$0xff] }
 0x3d3   :  { %5329 = vmatprep.subr.mxu0 %v3977_v37  ;;  %5300 = vmatprep.subr.mxu1 %v3942_v1  ;;  %v3987_v1 = vld [vmem:[%s10613_s3 + $0x200] sm:$0xff] }
 0x3d4   :  { %5330 = vmatpush3.msra.mxu0 %v3961_v56  ;;  %5301 = vmatpush3.msra.mxu1 %v3926_v34  ;;  %v5099_v37 = vpop.f32.mrf.mxu0  ;;  %v4013_v34 = vld [vmem:[%s10613_s3 + $0x2d0] sm:$0xff] }
 0x3d5   :  { %5331 = vmatprep.subr.mxu0 %v3976_v31  ;;  %5302 = vmatprep.subr.mxu1 %v3941_v10  ;;  %v5100_v31 = vadd.f32 %v5099_v37, %v5098_v26 }
 0x3d6   :  { %5332 = vmatpush3.msra.mxu0 %v3960_v19  ;;  %5303 = vmatpush3.msra.mxu1 %v3925_v57  ;;  %v4012_v19 = vld [vmem:[%s10613_s3 + $0x2c8] sm:$0xff] }
 0x3d7   :  { %5333 = vmatprep.subr.mxu0 %v3975_v45  ;;  %5304 = vmatprep.subr.mxu1 %v3940_v25 }
 0x3d8   :  { %5334 = vmatpush3.msra.mxu0 %v3959_v14  ;;  %5305 = vmatpush3.msra.mxu1 %v3924_v0  ;;  %v3053_v23 = vpop.f32.mrf.mxu1 }
 0x3d9   :  { %5335 = vmatprep.subr.mxu0 %v3974_v28  ;;  %5306 = vmatprep.subr.mxu1 %v3939_v61  ;;  %v3054_v44 = vadd.f32 %v3053_v23, %v2984_v27  ;;  %v4009_v61 = vld [vmem:[%s10613_s3 + $0x2b0] sm:$0xff] }
 0x3da   :  { %5336 = vmatpush3.msra.mxu0 %v3958_v20  ;;  %5307 = vmatpush3.msra.mxu1 %v3923_v53  ;;  %v2501_v22 = vpop.permute.xlu0 %2500  ;;  %v3055_v8 = vpop.f32.mrf.mxu1  ;;  %v4007_v20 = vld [vmem:[%s10613_s3 + $0x2a0] sm:$0xff]  ;;  %v4006_v53 = vld [vmem:[%s10613_s3 + $0x298] sm:$0xff] }
 0x3db   :  { %4142 = vmatprep.mubr.f32.mxu1 %v4065_v50  ;;  %5337 = vmatprep.subr.mxu0 %v3973_v40  ;;  %v2502_v4 = vrot.slane %v2501_v22, 6  ;;  %v3064_v36 = vrot.slane %v3054_v44, %v11513_v47  ;;  %v4003_v50 = vld [vmem:[%s10613_s3 + $0x280] sm:$0xff]  ;;  %v4068_v40 = vsel %vm4063_vm3, %v5536_v18, %v11559_v42 }
 0x3dc   :  { %4143 = vmatmul.mubr.f32.vlgmr.msra.gmra.mxu1 %v11555_v11  ;;  %5338 = vmatpush3.msra.mxu0 %v3957_v41 }
 0x3dd   :  { %4218 = vmatprep.subr.mxu1 %v11034_v12  ;;  %5339 = vmatprep.subr.mxu0 %v3972_v30  ;;  %v2503_v35 = vsel %vm1349_vm10, %v2502_v4, %v2501_v22 }
 0x3de   :  { %4219 = vmatpush1.msra.mxu1 %v4002_v21  ;;  %5340 = vmatpush3.msra.mxu0 %v3956_v5  ;;  %2505 = vst.msk [vmem:[#allocation2 + $0x2] sm:$0xf] %vm9426_vm11, %v2503_v35 }
 0x3df   :  { %4220 = vmatprep.subr.mxu1 %v11034_v12  ;;  %5341 = vmatprep.subr.mxu0 %v3971_v55 }
 0x3e0   :  { %4221 = vmatpush1.msra.mxu1 %v4001_v46  ;;  %5342 = vmatpush3.msra.mxu0 %v3955_v49 }
 0x3e1   :  { %4212 = vmatprep.mubr.f32.mxu0 %v4067_v48  ;;  %4222 = vmatprep.subr.mxu1 %v11034_v12 }
 0x3e2   :  { %4213 = vmatmul.mubr.f32.vlgmr.msra.gmra.mxu0 %v9980_v24  ;;  %4223 = vmatpush1.msra.mxu1 %v4000_v15  ;;  %v3996_v24 = vld [vmem:[%s10613_s3 + $0x248] sm:$0xff]  ;;  %s5882_s3 = smov [#allocation2]  }
 0x3e3   :  { %4224 = vmatprep.subr.mxu1 %v11034_v12  ;;  %3065 = vrot.lane.b32.xlu1 %v3064_v36, %s5879_s1 }
 0x3e4   :  { %4225 = vmatpush1.msra.mxu1 %v3999_v16  ;;  %4351 = vmatprep.mubr.msk.f32.mxu1 %vm4075_vm5, %v4069_v59 }
 0x3e5   :  { %4226 = vmatprep.subr.mxu1 %v11034_v12 }
 0x3e6   :  { %4227 = vmatpush1.msra.mxu1 %v3998_v43 }
 0x3e7   :  { %4228 = vmatprep.subr.mxu1 %v11034_v12 }
 0x3e8   :  { %4229 = vmatpush1.msra.mxu1 %v3997_v63 }
 0x3e9   :  { %4230 = vmatprep.subr.mxu1 %v11034_v12 }
 0x3ea   :  { %4231 = vmatpush1.msra.mxu1 %v3996_v24 }
 0x3eb   :  { %4232 = vmatprep.subr.mxu1 %v11034_v12 }
 0x3ec   :  { %4233 = vmatpush1.msra.mxu1 %v3995_v3 }
 0x3ed   :  { %4234 = vmatprep.subr.mxu1 %v11034_v12 }
 0x3ee   :  { %4235 = vmatpush1.msra.mxu1 %v3994_v58 }
 0x3ef   :  { %4236 = vmatprep.subr.mxu1 %v11034_v12 }
 0x3f0   :  { %4237 = vmatpush1.msra.mxu1 %v3993_v7 }
 0x3f1   :  { %4238 = vmatprep.subr.mxu1 %v11034_v12 }
 0x3f2   :  { %4239 = vmatpush1.msra.mxu1 %v3992_v52 }
 0x3f3   :  { %4240 = vmatprep.subr.mxu1 %v11034_v12 }
 0x3f4   :  { %4241 = vmatpush1.msra.mxu1 %v3991_v60 }
 0x3f5   :  { %4242 = vmatprep.subr.mxu1 %v11034_v12 }
 0x3f6   :  { %4243 = vmatpush1.msra.mxu1 %v3990_v32 }
 0x3f7   :  { %4244 = vmatprep.subr.mxu1 %v11034_v12 }
 0x3f8   :  { %4245 = vmatpush1.msra.mxu1 %v3989_v17 }
 0x3f9   :  { %4246 = vmatprep.subr.mxu1 %v11034_v12  ;;  %v5133_v56 = vpop.f32.mrf.mxu1 }
 0x3fa   :  { %4247 = vmatpush1.msra.mxu1 %v3988_v6 }
 0x3fb   :  { %4248 = vmatprep.subr.mxu1 %v11034_v12  ;;  %v5134_v51 = vpop.f32.mrf.mxu1 }
 0x3fc   :  { %4249 = vmatpush1.msra.mxu1 %v3987_v1  ;;  %v5135_v10 = vadd.f32 %v5134_v51, %v5133_v56 }
 0x3fd   :  { %4260 = vmatprep.subr.mxu1 %v11034_v12 }
 0x3fe   :  { %4261 = vmatpush2.msra.mxu1 %v4013_v34  ;;  %v3271_v57 = vadd.f32 %v5135_v10, %v5100_v31 }
 0x3ff   :  { %4262 = vmatprep.subr.mxu1 %v11034_v12  ;;  %v3340_v45 = vpop.f32.mrf.mxu0 }
 0x400   :  { %4263 = vmatpush2.msra.mxu1 %v4012_v19  ;;  %v3341_v25 = vadd.f32 %v3340_v45, %v3271_v57 }
 0x401   :  { %4264 = vmatprep.subr.mxu1 %v11034_v12  ;;  %v2779_v14 = vpop.permute.xlu1 %2778  ;;  %v3342_v0 = vpop.f32.mrf.mxu0 }
 0x402   :  { %4265 = vmatpush2.msra.mxu1 %v4011_v39  ;;  %2781 = vst.msk [vmem:[#allocation2 + $0x4] sm:$0x3] %vm496_vm13, %v2779_v14  ;;  %v3351_v28 = vrot.slane %v3341_v25, %v11513_v47 }
 0x403   :  { %4266 = vmatprep.subr.mxu1 %v11034_v12 }
 0x404   :  { %4267 = vmatpush2.msra.mxu1 %v4010_v38  ;;  %3352 = vrot.lane.b32.xlu0 %v3351_v28, %s5880_s23 }
 0x405   :  { %4268 = vmatprep.subr.mxu1 %v11034_v12 }
 0x406   :  { %4269 = vmatpush2.msra.mxu1 %v4009_v61 }
 0x407   :  { %4270 = vmatprep.subr.mxu1 %v11034_v12 }
 0x408   :  { %4271 = vmatpush2.msra.mxu1 %v4008_v62 }
 0x409   :  { %4272 = vmatprep.subr.mxu1 %v11034_v12 }
 0x40a   :  { %4273 = vmatpush2.msra.mxu1 %v4007_v20 }
 0x40b   :  { %4274 = vmatprep.subr.mxu1 %v11034_v12 }
 0x40c   :  { %4275 = vmatpush2.msra.mxu1 %v4006_v53 }
 0x40d   :  { %4276 = vmatprep.subr.mxu1 %v11034_v12 }
 0x40e   :  { %4277 = vmatpush2.msra.mxu1 %v4005_v29 }
 0x40f   :  { %4278 = vmatprep.subr.mxu1 %v11034_v12 }
 0x410   :  { %4279 = vmatpush2.msra.mxu1 %v4004_v9 }
 0x411   :  { %4280 = vmatprep.subr.mxu1 %v11034_v12 }
 0x412   :  { %4281 = vmatpush2.msra.mxu1 %v4003_v50 }
 0x413   :  { %4283 = vmatmul.mubr.f32.vlgmr.msra.gmra.mxu1 %v4068_v40 }
 0x41b   :  { %v5168_v41 = vpop.f32.mrf.mxu1 }
 0x41d   :  { %v5169_v30 = vpop.f32.mrf.mxu1 }
 0x41e   :  { %v5170_v21 = vadd.f32 %v5169_v30, %v5168_v41 }
 0x421   :  { %v5203_v23 = vpop.f32.mrf.mxu0 }
 0x423   :  { %v5204_v27 = vpop.f32.mrf.mxu0 }
 0x424   :  { %v5205_v22 = vadd.f32 %v5204_v27, %v5203_v23 }
 0x426   :  { %v3558_v5 = vadd.f32 %v5205_v22, %v5170_v21 }
 0x444   :  { %v5238_v33 = vpop.f32.mrf.mxu0 }
 0x446   :  { %v5239_v55 = vpop.f32.mrf.mxu0 }
 0x447   :  { %v5240_v49 = vadd.f32 %v5239_v55, %v5238_v33 }
 0x455   :  { %v3066_v8 = vpop.permute.xlu1 %3065 }
 0x456   :  { %3068 = vst.msk [vmem:[#allocation2 + $0x4] sm:$0x3] %vm784_vm0, %v3066_v8  ;;  %vm4304_vm0 = vmor %vm4303_vm14, %vm4302_vm6 }
 0x459   :  { %v3627_v4 = vpop.f32.mrf.mxu1 }
 0x45a   :  { %v3628_v44 = vadd.f32 %v3627_v4, %v3558_v5 }
 0x45b   :  { %v3629_v12 = vpop.f32.mrf.mxu1 }
 0x45c   :  { %v3638_v11 = vrot.slane %v3628_v44, %v11513_v47 }
 0x45e   :  { %3639 = vrot.lane.b32.xlu0 %v3638_v11, %s5881_s17 }
 0x476   :  { %v3353_v18 = vpop.permute.xlu0 %3352 }
 0x477   :  { %3355 = vst.msk [vmem:[#allocation2 + $0x4] sm:$0x3] %vm1072_vm4, %v3353_v18 }
 0x47a   :  { %v5273_v46 = vpop.f32.mrf.mxu1 }
 0x47c   :  { %v5274_v35 = vpop.f32.mrf.mxu1 }
 0x47d   :  { %v5275_v54 = vadd.f32 %v5274_v35, %v5273_v46 }
 0x47f   :  { %v3836_v48 = vadd.f32 %v5275_v54, %v5240_v49 }
 0x480   :  { %v3905_v15 = vpop.f32.mrf.mxu0 }
 0x481   :  { %v3906_v36 = vadd.f32 %v3905_v15, %v3836_v48 }
 0x482   :  { %v3907_v13 = vpop.f32.mrf.mxu0 }
 0x483   :  { %v3916_v42 = vrot.slane %v3906_v36, %v11513_v47 }
 0x485   :  { %3917 = vrot.lane.b32.xlu0 %v3916_v42, %s5878_s0  ;;  %s4312_s0 = sshll.u32 %s5882_s3, 4  ;;  %s4313_s0 = int_to_ptr.vmem [resolvable:$true] %s4312_s0 }
 0x486   :  { %s5839_s17 = scalar_lea.vmem %s4313_s0, 160  ;;  %p5844_p1 = scmp.lt.s32.totalorder %s4313_s0, %s4313_s0 }
 0x487   :  { %p5840_p0 = scmp.ne.s32.totalorder %s4313_s0, %s5839_s17  ;;  %p5845_p2 = scmp.lt.s32.totalorder %s5839_s17, %s5839_s17 }
 0x489   :  { %p5846_p3 = por %p5845_p2, %p5844_p1 }
 0x48b   :  { %p5847_p4 = pnand %p5846_p3, %p5840_p0 }
 0x49c   :  { %v5308_v16 = vpop.f32.mrf.mxu1 }
 0x49e   :  { %v5309_v63 = vpop.f32.mrf.mxu1 }
 0x49f   :  { %v5310_v3 = vadd.f32 %v5309_v63, %v5308_v16 }
 0x4a2   :  { %v5343_v59 = vpop.f32.mrf.mxu0 }
 0x4a4   :  { %v5344_v43 = vpop.f32.mrf.mxu0 }
 0x4a5   :  { %v5345_v24 = vadd.f32 %v5344_v43, %v5343_v59 }
 0x4a7   :  { %v4215_v52 = vadd.f32 %v5345_v24, %v5310_v3 }
 0x4d0   :  { %v3640_v58 = vpop.permute.xlu0 %3639 }
 0x4d1   :  { %v3641_v7 = vrot.slane %v3640_v58, 6 }
 0x4d3   :  { %v4284_v60 = vpop.f32.mrf.mxu1  ;;  %v3642_v32 = vsel %vm1349_vm10, %v3641_v7, %v3640_v58 }
 0x4d4   :  { %v4285_v26 = vadd.f32 %v4284_v60, %v4215_v52  ;;  %3644 = vst.msk [vmem:[#allocation2 + $0x4] sm:$0xf] %vm9426_vm11, %v3642_v32 }
 0x4d5   :  { %v4286_v17 = vpop.f32.mrf.mxu1 }
 0x4d6   :  { %v4295_v6 = vrot.slane %v4285_v26, %v11513_v47 }
 0x4d8   :  { %4296 = vrot.lane.b32.xlu1 %v4295_v6, %s5879_s1 }
 0x4f7   :  { %v3918_v37 = vpop.permute.xlu0 %3917 }
 0x4f8   :  { %3920 = vst.msk [vmem:[#allocation2 + $0x6] sm:$0x3] %vm496_vm13, %v3918_v37 }
 0x54a   :  { %v4297_v1 = vpop.permute.xlu1 %4296 }
 0x54b   :  { %v4298_v56 = vrot.slane %v4297_v1, 6 }
 0x54d   :  { %v4300_v34 = vsel %vm4299_vm15, %v4298_v56, %v4297_v1 }
 0x54e   :  { %4305 = vst.msk [vmem:[#allocation2 + $0x6] sm:$0xf] %vm4304_vm0, %v4300_v34 }
 0x54f   :  { %5850 = shalt.err (!%p5847_p4)
}
 0x550   :  { %4315 = dma.vmem_to_hbm [thread:$0]  %s4313_s0, 160, %s10614_s4, [#allocation3]  }
 0x551   :  { %5859 = dma.done.wait [#allocation3], 160  }
 0x552   :  { %5860 = vsyncadd [#allocation3], 4294967136 }
 0x553   :  { %4319 = vsyncpa [#allocation3], 1 }

</bundles_post_ra>
